<compile_context>
chip_gen: v7x
topology: tpu7x:2x2x1
jax: 0.10.0
libtpu: 0.0.40
codegen_flags: <defaults>
</compile_context>

<pallas_src>
import math
import functools

import jax
import jax.numpy as jnp
from jax import lax
from jax.experimental import pallas as pl
from jax.experimental.pallas import tpu as pltpu


def _round_up(x, m):
    return ((x + m - 1) // m) * m


# ----------------------------------------------------------------------------
# Fused Bottleneck kernel (one grid step per batch element)
# ----------------------------------------------------------------------------
def bottleneck_kernel(xp_ref, mask_ref,
                      w1_ref, s1_ref, t1_ref,
                      w2_ref, s2_ref, t2_ref,
                      w3_ref, s3_ref, t3_ref,
                      wd_ref, sd_ref, td_ref,
                      o_ref, *, tap_offsets, has_downsample):
    f32 = jnp.float32
    bf16 = jnp.bfloat16

    xp = xp_ref[...]        # (C_in, N_lanes) f32, spatially zero-padded & flattened
    mask = mask_ref[...]    # (1, N_lanes)   1.0 on interior voxels, 0.0 on padding

    # ---- conv1 (1x1x1) + BN1 + ReLU, epilogue fused in f32; zero the padded border
    h1 = jnp.dot(w1_ref[...], xp.astype(bf16), preferred_element_type=f32)
    h1 = jnp.maximum(h1 * s1_ref[...] + t1_ref[...], 0.0) * mask

    # ---- conv2 (3x3x3, stride 1, pad 1): 27 lane-shifted matmuls, f32 accumulation.
    # For interior output column p, tap (kd,kh,kw) reads column p + off; wrapped columns
    # only ever land on border/padding outputs, which are discarded by the wrapper slice.
    n = h1.shape[1]
    h1b = h1.astype(bf16)
    acc = None
    for t, off in enumerate(tap_offsets):
        s = off % n
        if s == 0:
            tap = h1b
        else:
            tap = jnp.concatenate([h1b[:, s:], h1b[:, :s]], axis=1)
        contrib = jnp.dot(w2_ref[t], tap, preferred_element_type=f32)
        acc = contrib if acc is None else acc + contrib
    h2 = jnp.maximum(acc * s2_ref[...] + t2_ref[...], 0.0)

    # ---- conv3 (1x1x1) + BN3 (no ReLU yet)
    out = jnp.dot(w3_ref[...], h2.astype(bf16), preferred_element_type=f32)
    out = out * s3_ref[...] + t3_ref[...]

    # ---- residual branch
    if has_downsample:
        res = jnp.dot(wd_ref[...], xp.astype(bf16), preferred_element_type=f32)
        res = res * sd_ref[...] + td_ref[...]
    else:
        res = xp  # identity residual (requires in_planes == planes * expansion)

    o_ref[...] = jnp.maximum(out + res, 0.0) * mask


# ----------------------------------------------------------------------------
# Wrapper: layout prep, BN folding, pallas_call
# ----------------------------------------------------------------------------
def _fold_bn(bn, eps=1e-5):
    gamma, beta, mean, var = bn
    scale = gamma / jnp.sqrt(var + eps)
    return scale, beta - mean * scale


def bottleneck_forward(params, x):
    """x: (B, C_in, D, H, W) -> (B, planes*4, D, H, W).  Eval-mode Bottleneck."""
    B, Cin, D, H, W = x.shape
    w1, w2, w3 = params["conv1_w"], params["conv2_w"], params["conv3_w"]
    P = w1.shape[0]          # planes
    Cout = w3.shape[0]       # planes * expansion
    has_ds = "ds_conv_w" in params
    assert has_ds or Cin == Cout, "identity residual needs in_planes == planes*4"

    Dp, Hp, Wp = D + 2, H + 2, W + 2
    npad = Dp * Hp * Wp
    nal = _round_up(npad, 128)    # lane-dense flattened (padded) spatial axis

    # -- wrapper glue: spatial zero-pad (conv padding=1), flatten spatial onto lanes
    xp = jnp.pad(x.astype(jnp.float32), ((0, 0), (0, 0), (1, 1), (1, 1), (1, 1)))
    xp = xp.reshape(B, Cin, npad)
    xp = jnp.pad(xp, ((0, 0), (0, 0), (0, nal - npad)))

    mask = jnp.pad(jnp.ones((D, H, W), jnp.float32), 1).reshape(1, npad)
    mask = jnp.pad(mask, ((0, 0), (0, nal - npad)))

    # -- fold eval-mode BatchNorm3d into per-channel scale/shift (column vectors)
    col = lambda v: v.reshape(-1, 1).astype(jnp.float32)
    s1, t1 = _fold_bn(params["bn1"])
    s2, t2 = _fold_bn(params["bn2"])
    s3, t3 = _fold_bn(params["bn3"])

    w1m = w1.reshape(P, Cin).astype(jnp.bfloat16)
    w2m = jnp.transpose(w2, (2, 3, 4, 0, 1)).reshape(27, P, P).astype(jnp.bfloat16)
    w3m = w3.reshape(Cout, P).astype(jnp.bfloat16)
    if has_ds:
        wdm = params["ds_conv_w"].reshape(Cout, Cin).astype(jnp.bfloat16)
        sd, td = _fold_bn(params["ds_bn"])
    else:
        wdm = jnp.zeros((Cout, Cin), jnp.bfloat16)
        sd = jnp.ones((Cout,), jnp.float32)
        td = jnp.zeros((Cout,), jnp.float32)

    # flat-index offset of each 3x3x3 tap on the padded grid
    tap_offsets = tuple((kd - 1) * Hp * Wp + (kh - 1) * Wp + (kw - 1)
                        for kd in range(3) for kh in range(3) for kw in range(3))

    kernel = functools.partial(bottleneck_kernel,
                               tap_offsets=tap_offsets,
                               has_downsample=has_ds)

    spec2 = lambda shp: pl.BlockSpec(shp, lambda b: (0, 0))
    spec3 = lambda shp: pl.BlockSpec(shp, lambda b: (0, 0, 0))

    out = pl.pallas_call(
        kernel,
        out_shape=jax.ShapeDtypeStruct((B, Cout, nal), jnp.float32),
        grid_spec=pltpu.PrefetchScalarGridSpec(
            num_scalar_prefetch=0,
            grid=(B,),
            in_specs=[
                pl.BlockSpec((None, Cin, nal), lambda b: (b, 0, 0)),    # padded input
                spec2((1, nal)),                                        # interior mask
                spec2((P, Cin)), spec2((P, 1)), spec2((P, 1)),          # conv1 / bn1
                spec3((27, P, P)), spec2((P, 1)), spec2((P, 1)),        # conv2 / bn2
                spec2((Cout, P)), spec2((Cout, 1)), spec2((Cout, 1)),   # conv3 / bn3
                spec2((Cout, Cin)), spec2((Cout, 1)), spec2((Cout, 1)), # downsample
            ],
            out_specs=pl.BlockSpec((None, Cout, nal), lambda b: (b, 0, 0)),
        ),
        compiler_params=pltpu.CompilerParams(dimension_semantics=("parallel",)),
    )(xp, mask, w1m, col(s1), col(t1), w2m, col(s2), col(t2),
      w3m, col(s3), col(t3), wdm, col(sd), col(td))

    # -- wrapper glue: drop lane alignment + conv padding, back to NCDHW
    out = out[:, :, :npad].reshape(B, Cout, Dp, Hp, Wp)
    return out[:, :, 1:-1, 1:-1, 1:-1]


# ----------------------------------------------------------------------------
# Pure-JAX reference (f32) for correctness checking
# ----------------------------------------------------------------------------
def bottleneck_reference(params, x):
    eps = 1e-5
    dn = ("NCDHW", "OIDHW", "NCDHW")

    def bn(y, b):
        g, be, m, v = (a.reshape(1, -1, 1, 1, 1) for a in b)
        return g * (y - m) / jnp.sqrt(v + eps) + be

    x = x.astype(jnp.float32)
    out = lax.conv_general_dilated(x, params["conv1_w"], (1, 1, 1), "VALID",
                                   dimension_numbers=dn)
    out = jax.nn.relu(bn(out, params["bn1"]))
    out = lax.conv_general_dilated(out, params["conv2_w"], (1, 1, 1),
                                   ((1, 1), (1, 1), (1, 1)), dimension_numbers=dn)
    out = jax.nn.relu(bn(out, params["bn2"]))
    out = lax.conv_general_dilated(out, params["conv3_w"], (1, 1, 1), "VALID",
                                   dimension_numbers=dn)
    out = bn(out, params["bn3"])
    if "ds_conv_w" in params:
        residual = lax.conv_general_dilated(x, params["ds_conv_w"], (1, 1, 1), "VALID",
                                            dimension_numbers=dn)
        residual = bn(residual, params["ds_bn"])
    else:
        residual = x
    return jax.nn.relu(out + residual)


# ----------------------------------------------------------------------------
# Deterministic synthetic parameters (eval-mode BN running stats)
# ----------------------------------------------------------------------------
class KeyGen:
    def __init__(self, key):
        self.key = key

    def __call__(self):
        self.key, sub = jax.random.split(self.key)
        return sub


def init_params(seed, in_planes, planes, with_downsample=True):
    kg = KeyGen(jax.random.PRNGKey(seed))
    expansion = 4

    def conv_w(c_out, c_in, k):
        fan = c_in * k ** 3
        return jax.random.normal(kg(), (c_out, c_in, k, k, k), jnp.float32) / math.sqrt(fan)

    def bn(c):
        return (1.0 + 0.1 * jax.random.normal(kg(), (c,), jnp.float32),
                0.1 * jax.random.normal(kg(), (c,), jnp.float32),
                0.1 * jax.random.normal(kg(), (c,), jnp.float32),
                1.0 + 0.1 * jnp.abs(jax.random.normal(kg(), (c,), jnp.float32)))

    p = {
        "conv1_w": conv_w(planes, in_planes, 1), "bn1": bn(planes),
        "conv2_w": conv_w(planes, planes, 3),    "bn2": bn(planes),
        "conv3_w": conv_w(planes * expansion, planes, 1), "bn3": bn(planes * expansion),
    }
    if with_downsample:
        p["ds_conv_w"] = conv_w(planes * expansion, in_planes, 1)
        p["ds_bn"] = bn(planes * expansion)
    return p


if __name__ == "__main__":
    B, in_planes, planes, D, H, W = 2, 16, 8, 8, 8, 8
    x = jax.random.normal(jax.random.PRNGKey(0), (B, in_planes, D, H, W), jnp.float32)
    params = init_params(1, in_planes, planes, with_downsample=True)

    fwd = jax.jit(bottleneck_forward)
    out = jax.block_until_ready(fwd(params, x))
    assert out.shape == (B, planes * 4, D, H, W), out.shape
    assert bool(jnp.all(jnp.isfinite(out)))

    ref = bottleneck_reference(params, x)
    err = float(jnp.max(jnp.abs(out - ref)))
    assert err < 0.2, f"max abs error vs f32 reference too large: {err}"

    print("KERNEL_OK")
</pallas_src>

<mosaic_0001>
module attributes {stable_mosaic.version = 11 : i64} {
  func.func @bottleneck_kernel(%arg0: i32, %arg1: memref<1x16x1024xf32, #tpu.memory_space<vmem>>, %arg2: memref<1x1024xf32, #tpu.memory_space<vmem>>, %arg3: memref<8x16xbf16, #tpu.memory_space<vmem>>, %arg4: memref<8x1xf32, #tpu.memory_space<vmem>>, %arg5: memref<8x1xf32, #tpu.memory_space<vmem>>, %arg6: memref<27x8x8xbf16, #tpu.memory_space<vmem>>, %arg7: memref<8x1xf32, #tpu.memory_space<vmem>>, %arg8: memref<8x1xf32, #tpu.memory_space<vmem>>, %arg9: memref<32x8xbf16, #tpu.memory_space<vmem>>, %arg10: memref<32x1xf32, #tpu.memory_space<vmem>>, %arg11: memref<32x1xf32, #tpu.memory_space<vmem>>, %arg12: memref<32x16xbf16, #tpu.memory_space<vmem>>, %arg13: memref<32x1xf32, #tpu.memory_space<vmem>>, %arg14: memref<32x1xf32, #tpu.memory_space<vmem>>, %arg15: memref<1x32x1024xf32, #tpu.memory_space<vmem>>) attributes {dimension_semantics = [#tpu.dimension_semantics<parallel>], iteration_bounds = array<i64: 2>, scalar_prefetch = 0 : i64, scratch_operands = 0 : i64, tpu.core_type = #tpu.core_type<tc>, window_params = [{transform_indices = @transform_0, window_bounds = array<i64: 1, 16, 1024>}, {pipeline_mode = #tpu.pipeline_mode<synchronous>, transform_indices = @transform_1, window_bounds = array<i64: 1, 1024>}, {pipeline_mode = #tpu.pipeline_mode<synchronous>, transform_indices = @transform_2, window_bounds = array<i64: 8, 16>}, {pipeline_mode = #tpu.pipeline_mode<synchronous>, transform_indices = @transform_3, window_bounds = array<i64: 8, 1>}, {pipeline_mode = #tpu.pipeline_mode<synchronous>, transform_indices = @transform_4, window_bounds = array<i64: 8, 1>}, {pipeline_mode = #tpu.pipeline_mode<synchronous>, transform_indices = @transform_5, window_bounds = array<i64: 27, 8, 8>}, {pipeline_mode = #tpu.pipeline_mode<synchronous>, transform_indices = @transform_6, window_bounds = array<i64: 8, 1>}, {pipeline_mode = #tpu.pipeline_mode<synchronous>, transform_indices = @transform_7, window_bounds = array<i64: 8, 1>}, {pipeline_mode = #tpu.pipeline_mode<synchronous>, transform_indices = @transform_8, window_bounds = array<i64: 32, 8>}, {pipeline_mode = #tpu.pipeline_mode<synchronous>, transform_indices = @transform_9, window_bounds = array<i64: 32, 1>}, {pipeline_mode = #tpu.pipeline_mode<synchronous>, transform_indices = @transform_10, window_bounds = array<i64: 32, 1>}, {pipeline_mode = #tpu.pipeline_mode<synchronous>, transform_indices = @transform_11, window_bounds = array<i64: 32, 16>}, {pipeline_mode = #tpu.pipeline_mode<synchronous>, transform_indices = @transform_12, window_bounds = array<i64: 32, 1>}, {pipeline_mode = #tpu.pipeline_mode<synchronous>, transform_indices = @transform_13, window_bounds = array<i64: 32, 1>}, {transform_indices = @transform_14, window_bounds = array<i64: 1, 32, 1024>}]} {
    %c0 = arith.constant 0 : index
    %c0_0 = arith.constant 0 : index
    %c0_1 = arith.constant 0 : index
    %0 = vector.load %arg1[%c0, %c0_0, %c0_1] : memref<1x16x1024xf32, #tpu.memory_space<vmem>>, vector<1x16x1024xf32>
    %1 = vector.shape_cast %0 : vector<1x16x1024xf32> to vector<16x1024xf32>
    %c0_2 = arith.constant 0 : index
    %c0_3 = arith.constant 0 : index
    %2 = vector.load %arg2[%c0_2, %c0_3] : memref<1x1024xf32, #tpu.memory_space<vmem>>, vector<1x1024xf32>
    %c0_4 = arith.constant 0 : index
    %c0_5 = arith.constant 0 : index
    %3 = vector.load %arg3[%c0_4, %c0_5] : memref<8x16xbf16, #tpu.memory_space<vmem>>, vector<8x16xbf16>
    %4 = arith.truncf %1 : vector<16x1024xf32> to vector<16x1024xbf16>
    %cst = arith.constant dense<0.000000e+00> : vector<8x1024xf32>
    %5 = tpu.matmul %3, %4, %cst {dimension_numbers = #tpu.dot_dimension_numbers<[1], [0], [0], [1], [0, 0, 1, 1], [], []>} : vector<8x16xbf16>, vector<16x1024xbf16>, vector<8x1024xf32> -> vector<8x1024xf32>
    %c0_6 = arith.constant 0 : index
    %c0_7 = arith.constant 0 : index
    %6 = vector.load %arg4[%c0_6, %c0_7] : memref<8x1xf32, #tpu.memory_space<vmem>>, vector<8x1xf32>
    %7 = vector.broadcast %6 : vector<8x1xf32> to vector<8x1024xf32>
    %8 = arith.mulf %5, %7 : vector<8x1024xf32>
    %c0_8 = arith.constant 0 : index
    %c0_9 = arith.constant 0 : index
    %9 = vector.load %arg5[%c0_8, %c0_9] : memref<8x1xf32, #tpu.memory_space<vmem>>, vector<8x1xf32>
    %10 = vector.broadcast %9 : vector<8x1xf32> to vector<8x1024xf32>
    %11 = arith.addf %8, %10 : vector<8x1024xf32>
    %cst_10 = arith.constant 0.000000e+00 : f32
    %12 = vector.broadcast %cst_10 : f32 to vector<8x1024xf32>
    %13 = arith.maximumf %11, %12 : vector<8x1024xf32>
    %14 = vector.broadcast %2 : vector<1x1024xf32> to vector<8x1024xf32>
    %15 = arith.mulf %13, %14 : vector<8x1024xf32>
    %16 = arith.truncf %15 : vector<8x1024xf32> to vector<8x1024xbf16>
    %17 = vector.extract_strided_slice %16 {offsets = [0, 913], sizes = [8, 111], strides = [1, 1]} : vector<8x1024xbf16> to vector<8x111xbf16>
    %18 = vector.extract_strided_slice %16 {offsets = [0, 0], sizes = [8, 913], strides = [1, 1]} : vector<8x1024xbf16> to vector<8x913xbf16>
    %19 = tpu.concatenate %17, %18 in 1 : vector<8x111xbf16>, vector<8x913xbf16> -> vector<8x1024xbf16>
    %c0_11 = arith.constant 0 : index
    %c0_12 = arith.constant 0 : index
    %c0_13 = arith.constant 0 : index
    %20 = vector.load %arg6[%c0_11, %c0_12, %c0_13] : memref<27x8x8xbf16, #tpu.memory_space<vmem>>, vector<1x8x8xbf16>
    %21 = vector.shape_cast %20 : vector<1x8x8xbf16> to vector<8x8xbf16>
    %cst_14 = arith.constant dense<0.000000e+00> : vector<8x1024xf32>
    %22 = tpu.matmul %21, %19, %cst_14 {dimension_numbers = #tpu.dot_dimension_numbers<[1], [0], [0], [1], [0, 0, 1, 1], [], []>} : vector<8x8xbf16>, vector<8x1024xbf16>, vector<8x1024xf32> -> vector<8x1024xf32>
    %23 = vector.extract_strided_slice %16 {offsets = [0, 914], sizes = [8, 110], strides = [1, 1]} : vector<8x1024xbf16> to vector<8x110xbf16>
    %24 = vector.extract_strided_slice %16 {offsets = [0, 0], sizes = [8, 914], strides = [1, 1]} : vector<8x1024xbf16> to vector<8x914xbf16>
    %25 = tpu.concatenate %23, %24 in 1 : vector<8x110xbf16>, vector<8x914xbf16> -> vector<8x1024xbf16>
    %c1 = arith.constant 1 : index
    %c0_15 = arith.constant 0 : index
    %c0_16 = arith.constant 0 : index
    %26 = vector.load %arg6[%c1, %c0_15, %c0_16] : memref<27x8x8xbf16, #tpu.memory_space<vmem>>, vector<1x8x8xbf16>
    %27 = vector.shape_cast %26 : vector<1x8x8xbf16> to vector<8x8xbf16>
    %cst_17 = arith.constant dense<0.000000e+00> : vector<8x1024xf32>
    %28 = tpu.matmul %27, %25, %cst_17 {dimension_numbers = #tpu.dot_dimension_numbers<[1], [0], [0], [1], [0, 0, 1, 1], [], []>} : vector<8x8xbf16>, vector<8x1024xbf16>, vector<8x1024xf32> -> vector<8x1024xf32>
    %29 = arith.addf %22, %28 : vector<8x1024xf32>
    %30 = vector.extract_strided_slice %16 {offsets = [0, 915], sizes = [8, 109], strides = [1, 1]} : vector<8x1024xbf16> to vector<8x109xbf16>
    %31 = vector.extract_strided_slice %16 {offsets = [0, 0], sizes = [8, 915], strides = [1, 1]} : vector<8x1024xbf16> to vector<8x915xbf16>
    %32 = tpu.concatenate %30, %31 in 1 : vector<8x109xbf16>, vector<8x915xbf16> -> vector<8x1024xbf16>
    %c2 = arith.constant 2 : index
    %c0_18 = arith.constant 0 : index
    %c0_19 = arith.constant 0 : index
    %33 = vector.load %arg6[%c2, %c0_18, %c0_19] : memref<27x8x8xbf16, #tpu.memory_space<vmem>>, vector<1x8x8xbf16>
    %34 = vector.shape_cast %33 : vector<1x8x8xbf16> to vector<8x8xbf16>
    %cst_20 = arith.constant dense<0.000000e+00> : vector<8x1024xf32>
    %35 = tpu.matmul %34, %32, %cst_20 {dimension_numbers = #tpu.dot_dimension_numbers<[1], [0], [0], [1], [0, 0, 1, 1], [], []>} : vector<8x8xbf16>, vector<8x1024xbf16>, vector<8x1024xf32> -> vector<8x1024xf32>
    %36 = arith.addf %29, %35 : vector<8x1024xf32>
    %37 = vector.extract_strided_slice %16 {offsets = [0, 923], sizes = [8, 101], strides = [1, 1]} : vector<8x1024xbf16> to vector<8x101xbf16>
    %38 = vector.extract_strided_slice %16 {offsets = [0, 0], sizes = [8, 923], strides = [1, 1]} : vector<8x1024xbf16> to vector<8x923xbf16>
    %39 = tpu.concatenate %37, %38 in 1 : vector<8x101xbf16>, vector<8x923xbf16> -> vector<8x1024xbf16>
    %c3 = arith.constant 3 : index
    %c0_21 = arith.constant 0 : index
    %c0_22 = arith.constant 0 : index
    %40 = vector.load %arg6[%c3, %c0_21, %c0_22] : memref<27x8x8xbf16, #tpu.memory_space<vmem>>, vector<1x8x8xbf16>
    %41 = vector.shape_cast %40 : vector<1x8x8xbf16> to vector<8x8xbf16>
    %cst_23 = arith.constant dense<0.000000e+00> : vector<8x1024xf32>
    %42 = tpu.matmul %41, %39, %cst_23 {dimension_numbers = #tpu.dot_dimension_numbers<[1], [0], [0], [1], [0, 0, 1, 1], [], []>} : vector<8x8xbf16>, vector<8x1024xbf16>, vector<8x1024xf32> -> vector<8x1024xf32>
    %43 = arith.addf %36, %42 : vector<8x1024xf32>
    %44 = vector.extract_strided_slice %16 {offsets = [0, 924], sizes = [8, 100], strides = [1, 1]} : vector<8x1024xbf16> to vector<8x100xbf16>
    %45 = vector.extract_strided_slice %16 {offsets = [0, 0], sizes = [8, 924], strides = [1, 1]} : vector<8x1024xbf16> to vector<8x924xbf16>
    %46 = tpu.concatenate %44, %45 in 1 : vector<8x100xbf16>, vector<8x924xbf16> -> vector<8x1024xbf16>
    %c4 = arith.constant 4 : index
    %c0_24 = arith.constant 0 : index
    %c0_25 = arith.constant 0 : index
    %47 = vector.load %arg6[%c4, %c0_24, %c0_25] : memref<27x8x8xbf16, #tpu.memory_space<vmem>>, vector<1x8x8xbf16>
    %48 = vector.shape_cast %47 : vector<1x8x8xbf16> to vector<8x8xbf16>
    %cst_26 = arith.constant dense<0.000000e+00> : vector<8x1024xf32>
    %49 = tpu.matmul %48, %46, %cst_26 {dimension_numbers = #tpu.dot_dimension_numbers<[1], [0], [0], [1], [0, 0, 1, 1], [], []>} : vector<8x8xbf16>, vector<8x1024xbf16>, vector<8x1024xf32> -> vector<8x1024xf32>
    %50 = arith.addf %43, %49 : vector<8x1024xf32>
    %51 = vector.extract_strided_slice %16 {offsets = [0, 925], sizes = [8, 99], strides = [1, 1]} : vector<8x1024xbf16> to vector<8x99xbf16>
    %52 = vector.extract_strided_slice %16 {offsets = [0, 0], sizes = [8, 925], strides = [1, 1]} : vector<8x1024xbf16> to vector<8x925xbf16>
    %53 = tpu.concatenate %51, %52 in 1 : vector<8x99xbf16>, vector<8x925xbf16> -> vector<8x1024xbf16>
    %c5 = arith.constant 5 : index
    %c0_27 = arith.constant 0 : index
    %c0_28 = arith.constant 0 : index
    %54 = vector.load %arg6[%c5, %c0_27, %c0_28] : memref<27x8x8xbf16, #tpu.memory_space<vmem>>, vector<1x8x8xbf16>
    %55 = vector.shape_cast %54 : vector<1x8x8xbf16> to vector<8x8xbf16>
    %cst_29 = arith.constant dense<0.000000e+00> : vector<8x1024xf32>
    %56 = tpu.matmul %55, %53, %cst_29 {dimension_numbers = #tpu.dot_dimension_numbers<[1], [0], [0], [1], [0, 0, 1, 1], [], []>} : vector<8x8xbf16>, vector<8x1024xbf16>, vector<8x1024xf32> -> vector<8x1024xf32>
    %57 = arith.addf %50, %56 : vector<8x1024xf32>
    %58 = vector.extract_strided_slice %16 {offsets = [0, 933], sizes = [8, 91], strides = [1, 1]} : vector<8x1024xbf16> to vector<8x91xbf16>
    %59 = vector.extract_strided_slice %16 {offsets = [0, 0], sizes = [8, 933], strides = [1, 1]} : vector<8x1024xbf16> to vector<8x933xbf16>
    %60 = tpu.concatenate %58, %59 in 1 : vector<8x91xbf16>, vector<8x933xbf16> -> vector<8x1024xbf16>
    %c6 = arith.constant 6 : index
    %c0_30 = arith.constant 0 : index
    %c0_31 = arith.constant 0 : index
    %61 = vector.load %arg6[%c6, %c0_30, %c0_31] : memref<27x8x8xbf16, #tpu.memory_space<vmem>>, vector<1x8x8xbf16>
    %62 = vector.shape_cast %61 : vector<1x8x8xbf16> to vector<8x8xbf16>
    %cst_32 = arith.constant dense<0.000000e+00> : vector<8x1024xf32>
    %63 = tpu.matmul %62, %60, %cst_32 {dimension_numbers = #tpu.dot_dimension_numbers<[1], [0], [0], [1], [0, 0, 1, 1], [], []>} : vector<8x8xbf16>, vector<8x1024xbf16>, vector<8x1024xf32> -> vector<8x1024xf32>
    %64 = arith.addf %57, %63 : vector<8x1024xf32>
    %65 = vector.extract_strided_slice %16 {offsets = [0, 934], sizes = [8, 90], strides = [1, 1]} : vector<8x1024xbf16> to vector<8x90xbf16>
    %66 = vector.extract_strided_slice %16 {offsets = [0, 0], sizes = [8, 934], strides = [1, 1]} : vector<8x1024xbf16> to vector<8x934xbf16>
    %67 = tpu.concatenate %65, %66 in 1 : vector<8x90xbf16>, vector<8x934xbf16> -> vector<8x1024xbf16>
    %c7 = arith.constant 7 : index
    %c0_33 = arith.constant 0 : index
    %c0_34 = arith.constant 0 : index
    %68 = vector.load %arg6[%c7, %c0_33, %c0_34] : memref<27x8x8xbf16, #tpu.memory_space<vmem>>, vector<1x8x8xbf16>
    %69 = vector.shape_cast %68 : vector<1x8x8xbf16> to vector<8x8xbf16>
    %cst_35 = arith.constant dense<0.000000e+00> : vector<8x1024xf32>
    %70 = tpu.matmul %69, %67, %cst_35 {dimension_numbers = #tpu.dot_dimension_numbers<[1], [0], [0], [1], [0, 0, 1, 1], [], []>} : vector<8x8xbf16>, vector<8x1024xbf16>, vector<8x1024xf32> -> vector<8x1024xf32>
    %71 = arith.addf %64, %70 : vector<8x1024xf32>
    %72 = vector.extract_strided_slice %16 {offsets = [0, 935], sizes = [8, 89], strides = [1, 1]} : vector<8x1024xbf16> to vector<8x89xbf16>
    %73 = vector.extract_strided_slice %16 {offsets = [0, 0], sizes = [8, 935], strides = [1, 1]} : vector<8x1024xbf16> to vector<8x935xbf16>
    %74 = tpu.concatenate %72, %73 in 1 : vector<8x89xbf16>, vector<8x935xbf16> -> vector<8x1024xbf16>
    %c8 = arith.constant 8 : index
    %c0_36 = arith.constant 0 : index
    %c0_37 = arith.constant 0 : index
    %75 = vector.load %arg6[%c8, %c0_36, %c0_37] : memref<27x8x8xbf16, #tpu.memory_space<vmem>>, vector<1x8x8xbf16>
    %76 = vector.shape_cast %75 : vector<1x8x8xbf16> to vector<8x8xbf16>
    %cst_38 = arith.constant dense<0.000000e+00> : vector<8x1024xf32>
    %77 = tpu.matmul %76, %74, %cst_38 {dimension_numbers = #tpu.dot_dimension_numbers<[1], [0], [0], [1], [0, 0, 1, 1], [], []>} : vector<8x8xbf16>, vector<8x1024xbf16>, vector<8x1024xf32> -> vector<8x1024xf32>
    %78 = arith.addf %71, %77 : vector<8x1024xf32>
    %79 = vector.extract_strided_slice %16 {offsets = [0, 1013], sizes = [8, 11], strides = [1, 1]} : vector<8x1024xbf16> to vector<8x11xbf16>
    %80 = vector.extract_strided_slice %16 {offsets = [0, 0], sizes = [8, 1013], strides = [1, 1]} : vector<8x1024xbf16> to vector<8x1013xbf16>
    %81 = tpu.concatenate %79, %80 in 1 : vector<8x11xbf16>, vector<8x1013xbf16> -> vector<8x1024xbf16>
    %c9 = arith.constant 9 : index
    %c0_39 = arith.constant 0 : index
    %c0_40 = arith.constant 0 : index
    %82 = vector.load %arg6[%c9, %c0_39, %c0_40] : memref<27x8x8xbf16, #tpu.memory_space<vmem>>, vector<1x8x8xbf16>
    %83 = vector.shape_cast %82 : vector<1x8x8xbf16> to vector<8x8xbf16>
    %cst_41 = arith.constant dense<0.000000e+00> : vector<8x1024xf32>
    %84 = tpu.matmul %83, %81, %cst_41 {dimension_numbers = #tpu.dot_dimension_numbers<[1], [0], [0], [1], [0, 0, 1, 1], [], []>} : vector<8x8xbf16>, vector<8x1024xbf16>, vector<8x1024xf32> -> vector<8x1024xf32>
    %85 = arith.addf %78, %84 : vector<8x1024xf32>
    %86 = vector.extract_strided_slice %16 {offsets = [0, 1014], sizes = [8, 10], strides = [1, 1]} : vector<8x1024xbf16> to vector<8x10xbf16>
    %87 = vector.extract_strided_slice %16 {offsets = [0, 0], sizes = [8, 1014], strides = [1, 1]} : vector<8x1024xbf16> to vector<8x1014xbf16>
    %88 = tpu.concatenate %86, %87 in 1 : vector<8x10xbf16>, vector<8x1014xbf16> -> vector<8x1024xbf16>
    %c10 = arith.constant 10 : index
    %c0_42 = arith.constant 0 : index
    %c0_43 = arith.constant 0 : index
    %89 = vector.load %arg6[%c10, %c0_42, %c0_43] : memref<27x8x8xbf16, #tpu.memory_space<vmem>>, vector<1x8x8xbf16>
    %90 = vector.shape_cast %89 : vector<1x8x8xbf16> to vector<8x8xbf16>
    %cst_44 = arith.constant dense<0.000000e+00> : vector<8x1024xf32>
    %91 = tpu.matmul %90, %88, %cst_44 {dimension_numbers = #tpu.dot_dimension_numbers<[1], [0], [0], [1], [0, 0, 1, 1], [], []>} : vector<8x8xbf16>, vector<8x1024xbf16>, vector<8x1024xf32> -> vector<8x1024xf32>
    %92 = arith.addf %85, %91 : vector<8x1024xf32>
    %93 = vector.extract_strided_slice %16 {offsets = [0, 1015], sizes = [8, 9], strides = [1, 1]} : vector<8x1024xbf16> to vector<8x9xbf16>
    %94 = vector.extract_strided_slice %16 {offsets = [0, 0], sizes = [8, 1015], strides = [1, 1]} : vector<8x1024xbf16> to vector<8x1015xbf16>
    %95 = tpu.concatenate %93, %94 in 1 : vector<8x9xbf16>, vector<8x1015xbf16> -> vector<8x1024xbf16>
    %c11 = arith.constant 11 : index
    %c0_45 = arith.constant 0 : index
    %c0_46 = arith.constant 0 : index
    %96 = vector.load %arg6[%c11, %c0_45, %c0_46] : memref<27x8x8xbf16, #tpu.memory_space<vmem>>, vector<1x8x8xbf16>
    %97 = vector.shape_cast %96 : vector<1x8x8xbf16> to vector<8x8xbf16>
    %cst_47 = arith.constant dense<0.000000e+00> : vector<8x1024xf32>
    %98 = tpu.matmul %97, %95, %cst_47 {dimension_numbers = #tpu.dot_dimension_numbers<[1], [0], [0], [1], [0, 0, 1, 1], [], []>} : vector<8x8xbf16>, vector<8x1024xbf16>, vector<8x1024xf32> -> vector<8x1024xf32>
    %99 = arith.addf %92, %98 : vector<8x1024xf32>
    %100 = vector.extract_strided_slice %16 {offsets = [0, 1023], sizes = [8, 1], strides = [1, 1]} : vector<8x1024xbf16> to vector<8x1xbf16>
    %101 = vector.extract_strided_slice %16 {offsets = [0, 0], sizes = [8, 1023], strides = [1, 1]} : vector<8x1024xbf16> to vector<8x1023xbf16>
    %102 = tpu.concatenate %100, %101 in 1 : vector<8x1xbf16>, vector<8x1023xbf16> -> vector<8x1024xbf16>
    %c12 = arith.constant 12 : index
    %c0_48 = arith.constant 0 : index
    %c0_49 = arith.constant 0 : index
    %103 = vector.load %arg6[%c12, %c0_48, %c0_49] : memref<27x8x8xbf16, #tpu.memory_space<vmem>>, vector<1x8x8xbf16>
    %104 = vector.shape_cast %103 : vector<1x8x8xbf16> to vector<8x8xbf16>
    %cst_50 = arith.constant dense<0.000000e+00> : vector<8x1024xf32>
    %105 = tpu.matmul %104, %102, %cst_50 {dimension_numbers = #tpu.dot_dimension_numbers<[1], [0], [0], [1], [0, 0, 1, 1], [], []>} : vector<8x8xbf16>, vector<8x1024xbf16>, vector<8x1024xf32> -> vector<8x1024xf32>
    %106 = arith.addf %99, %105 : vector<8x1024xf32>
    %c13 = arith.constant 13 : index
    %c0_51 = arith.constant 0 : index
    %c0_52 = arith.constant 0 : index
    %107 = vector.load %arg6[%c13, %c0_51, %c0_52] : memref<27x8x8xbf16, #tpu.memory_space<vmem>>, vector<1x8x8xbf16>
    %108 = vector.shape_cast %107 : vector<1x8x8xbf16> to vector<8x8xbf16>
    %cst_53 = arith.constant dense<0.000000e+00> : vector<8x1024xf32>
    %109 = tpu.matmul %108, %16, %cst_53 {dimension_numbers = #tpu.dot_dimension_numbers<[1], [0], [0], [1], [0, 0, 1, 1], [], []>} : vector<8x8xbf16>, vector<8x1024xbf16>, vector<8x1024xf32> -> vector<8x1024xf32>
    %110 = arith.addf %106, %109 : vector<8x1024xf32>
    %111 = vector.extract_strided_slice %16 {offsets = [0, 1], sizes = [8, 1023], strides = [1, 1]} : vector<8x1024xbf16> to vector<8x1023xbf16>
    %112 = vector.extract_strided_slice %16 {offsets = [0, 0], sizes = [8, 1], strides = [1, 1]} : vector<8x1024xbf16> to vector<8x1xbf16>
    %113 = tpu.concatenate %111, %112 in 1 : vector<8x1023xbf16>, vector<8x1xbf16> -> vector<8x1024xbf16>
    %c14 = arith.constant 14 : index
    %c0_54 = arith.constant 0 : index
    %c0_55 = arith.constant 0 : index
    %114 = vector.load %arg6[%c14, %c0_54, %c0_55] : memref<27x8x8xbf16, #tpu.memory_space<vmem>>, vector<1x8x8xbf16>
    %115 = vector.shape_cast %114 : vector<1x8x8xbf16> to vector<8x8xbf16>
    %cst_56 = arith.constant dense<0.000000e+00> : vector<8x1024xf32>
    %116 = tpu.matmul %115, %113, %cst_56 {dimension_numbers = #tpu.dot_dimension_numbers<[1], [0], [0], [1], [0, 0, 1, 1], [], []>} : vector<8x8xbf16>, vector<8x1024xbf16>, vector<8x1024xf32> -> vector<8x1024xf32>
    %117 = arith.addf %110, %116 : vector<8x1024xf32>
    %118 = vector.extract_strided_slice %16 {offsets = [0, 9], sizes = [8, 1015], strides = [1, 1]} : vector<8x1024xbf16> to vector<8x1015xbf16>
    %119 = vector.extract_strided_slice %16 {offsets = [0, 0], sizes = [8, 9], strides = [1, 1]} : vector<8x1024xbf16> to vector<8x9xbf16>
    %120 = tpu.concatenate %118, %119 in 1 : vector<8x1015xbf16>, vector<8x9xbf16> -> vector<8x1024xbf16>
    %c15 = arith.constant 15 : index
    %c0_57 = arith.constant 0 : index
    %c0_58 = arith.constant 0 : index
    %121 = vector.load %arg6[%c15, %c0_57, %c0_58] : memref<27x8x8xbf16, #tpu.memory_space<vmem>>, vector<1x8x8xbf16>
    %122 = vector.shape_cast %121 : vector<1x8x8xbf16> to vector<8x8xbf16>
    %cst_59 = arith.constant dense<0.000000e+00> : vector<8x1024xf32>
    %123 = tpu.matmul %122, %120, %cst_59 {dimension_numbers = #tpu.dot_dimension_numbers<[1], [0], [0], [1], [0, 0, 1, 1], [], []>} : vector<8x8xbf16>, vector<8x1024xbf16>, vector<8x1024xf32> -> vector<8x1024xf32>
    %124 = arith.addf %117, %123 : vector<8x1024xf32>
    %125 = vector.extract_strided_slice %16 {offsets = [0, 10], sizes = [8, 1014], strides = [1, 1]} : vector<8x1024xbf16> to vector<8x1014xbf16>
    %126 = vector.extract_strided_slice %16 {offsets = [0, 0], sizes = [8, 10], strides = [1, 1]} : vector<8x1024xbf16> to vector<8x10xbf16>
    %127 = tpu.concatenate %125, %126 in 1 : vector<8x1014xbf16>, vector<8x10xbf16> -> vector<8x1024xbf16>
    %c16 = arith.constant 16 : index
    %c0_60 = arith.constant 0 : index
    %c0_61 = arith.constant 0 : index
    %128 = vector.load %arg6[%c16, %c0_60, %c0_61] : memref<27x8x8xbf16, #tpu.memory_space<vmem>>, vector<1x8x8xbf16>
    %129 = vector.shape_cast %128 : vector<1x8x8xbf16> to vector<8x8xbf16>
    %cst_62 = arith.constant dense<0.000000e+00> : vector<8x1024xf32>
    %130 = tpu.matmul %129, %127, %cst_62 {dimension_numbers = #tpu.dot_dimension_numbers<[1], [0], [0], [1], [0, 0, 1, 1], [], []>} : vector<8x8xbf16>, vector<8x1024xbf16>, vector<8x1024xf32> -> vector<8x1024xf32>
    %131 = arith.addf %124, %130 : vector<8x1024xf32>
    %132 = vector.extract_strided_slice %16 {offsets = [0, 11], sizes = [8, 1013], strides = [1, 1]} : vector<8x1024xbf16> to vector<8x1013xbf16>
    %133 = vector.extract_strided_slice %16 {offsets = [0, 0], sizes = [8, 11], strides = [1, 1]} : vector<8x1024xbf16> to vector<8x11xbf16>
    %134 = tpu.concatenate %132, %133 in 1 : vector<8x1013xbf16>, vector<8x11xbf16> -> vector<8x1024xbf16>
    %c17 = arith.constant 17 : index
    %c0_63 = arith.constant 0 : index
    %c0_64 = arith.constant 0 : index
    %135 = vector.load %arg6[%c17, %c0_63, %c0_64] : memref<27x8x8xbf16, #tpu.memory_space<vmem>>, vector<1x8x8xbf16>
    %136 = vector.shape_cast %135 : vector<1x8x8xbf16> to vector<8x8xbf16>
    %cst_65 = arith.constant dense<0.000000e+00> : vector<8x1024xf32>
    %137 = tpu.matmul %136, %134, %cst_65 {dimension_numbers = #tpu.dot_dimension_numbers<[1], [0], [0], [1], [0, 0, 1, 1], [], []>} : vector<8x8xbf16>, vector<8x1024xbf16>, vector<8x1024xf32> -> vector<8x1024xf32>
    %138 = arith.addf %131, %137 : vector<8x1024xf32>
    %139 = vector.extract_strided_slice %16 {offsets = [0, 89], sizes = [8, 935], strides = [1, 1]} : vector<8x1024xbf16> to vector<8x935xbf16>
    %140 = vector.extract_strided_slice %16 {offsets = [0, 0], sizes = [8, 89], strides = [1, 1]} : vector<8x1024xbf16> to vector<8x89xbf16>
    %141 = tpu.concatenate %139, %140 in 1 : vector<8x935xbf16>, vector<8x89xbf16> -> vector<8x1024xbf16>
    %c18 = arith.constant 18 : index
    %c0_66 = arith.constant 0 : index
    %c0_67 = arith.constant 0 : index
    %142 = vector.load %arg6[%c18, %c0_66, %c0_67] : memref<27x8x8xbf16, #tpu.memory_space<vmem>>, vector<1x8x8xbf16>
    %143 = vector.shape_cast %142 : vector<1x8x8xbf16> to vector<8x8xbf16>
    %cst_68 = arith.constant dense<0.000000e+00> : vector<8x1024xf32>
    %144 = tpu.matmul %143, %141, %cst_68 {dimension_numbers = #tpu.dot_dimension_numbers<[1], [0], [0], [1], [0, 0, 1, 1], [], []>} : vector<8x8xbf16>, vector<8x1024xbf16>, vector<8x1024xf32> -> vector<8x1024xf32>
    %145 = arith.addf %138, %144 : vector<8x1024xf32>
    %146 = vector.extract_strided_slice %16 {offsets = [0, 90], sizes = [8, 934], strides = [1, 1]} : vector<8x1024xbf16> to vector<8x934xbf16>
    %147 = vector.extract_strided_slice %16 {offsets = [0, 0], sizes = [8, 90], strides = [1, 1]} : vector<8x1024xbf16> to vector<8x90xbf16>
    %148 = tpu.concatenate %146, %147 in 1 : vector<8x934xbf16>, vector<8x90xbf16> -> vector<8x1024xbf16>
    %c19 = arith.constant 19 : index
    %c0_69 = arith.constant 0 : index
    %c0_70 = arith.constant 0 : index
    %149 = vector.load %arg6[%c19, %c0_69, %c0_70] : memref<27x8x8xbf16, #tpu.memory_space<vmem>>, vector<1x8x8xbf16>
    %150 = vector.shape_cast %149 : vector<1x8x8xbf16> to vector<8x8xbf16>
    %cst_71 = arith.constant dense<0.000000e+00> : vector<8x1024xf32>
    %151 = tpu.matmul %150, %148, %cst_71 {dimension_numbers = #tpu.dot_dimension_numbers<[1], [0], [0], [1], [0, 0, 1, 1], [], []>} : vector<8x8xbf16>, vector<8x1024xbf16>, vector<8x1024xf32> -> vector<8x1024xf32>
    %152 = arith.addf %145, %151 : vector<8x1024xf32>
    %153 = vector.extract_strided_slice %16 {offsets = [0, 91], sizes = [8, 933], strides = [1, 1]} : vector<8x1024xbf16> to vector<8x933xbf16>
    %154 = vector.extract_strided_slice %16 {offsets = [0, 0], sizes = [8, 91], strides = [1, 1]} : vector<8x1024xbf16> to vector<8x91xbf16>
    %155 = tpu.concatenate %153, %154 in 1 : vector<8x933xbf16>, vector<8x91xbf16> -> vector<8x1024xbf16>
    %c20 = arith.constant 20 : index
    %c0_72 = arith.constant 0 : index
    %c0_73 = arith.constant 0 : index
    %156 = vector.load %arg6[%c20, %c0_72, %c0_73] : memref<27x8x8xbf16, #tpu.memory_space<vmem>>, vector<1x8x8xbf16>
    %157 = vector.shape_cast %156 : vector<1x8x8xbf16> to vector<8x8xbf16>
    %cst_74 = arith.constant dense<0.000000e+00> : vector<8x1024xf32>
    %158 = tpu.matmul %157, %155, %cst_74 {dimension_numbers = #tpu.dot_dimension_numbers<[1], [0], [0], [1], [0, 0, 1, 1], [], []>} : vector<8x8xbf16>, vector<8x1024xbf16>, vector<8x1024xf32> -> vector<8x1024xf32>
    %159 = arith.addf %152, %158 : vector<8x1024xf32>
    %160 = vector.extract_strided_slice %16 {offsets = [0, 99], sizes = [8, 925], strides = [1, 1]} : vector<8x1024xbf16> to vector<8x925xbf16>
    %161 = vector.extract_strided_slice %16 {offsets = [0, 0], sizes = [8, 99], strides = [1, 1]} : vector<8x1024xbf16> to vector<8x99xbf16>
    %162 = tpu.concatenate %160, %161 in 1 : vector<8x925xbf16>, vector<8x99xbf16> -> vector<8x1024xbf16>
    %c21 = arith.constant 21 : index
    %c0_75 = arith.constant 0 : index
    %c0_76 = arith.constant 0 : index
    %163 = vector.load %arg6[%c21, %c0_75, %c0_76] : memref<27x8x8xbf16, #tpu.memory_space<vmem>>, vector<1x8x8xbf16>
    %164 = vector.shape_cast %163 : vector<1x8x8xbf16> to vector<8x8xbf16>
    %cst_77 = arith.constant dense<0.000000e+00> : vector<8x1024xf32>
    %165 = tpu.matmul %164, %162, %cst_77 {dimension_numbers = #tpu.dot_dimension_numbers<[1], [0], [0], [1], [0, 0, 1, 1], [], []>} : vector<8x8xbf16>, vector<8x1024xbf16>, vector<8x1024xf32> -> vector<8x1024xf32>
    %166 = arith.addf %159, %165 : vector<8x1024xf32>
    %167 = vector.extract_strided_slice %16 {offsets = [0, 100], sizes = [8, 924], strides = [1, 1]} : vector<8x1024xbf16> to vector<8x924xbf16>
    %168 = vector.extract_strided_slice %16 {offsets = [0, 0], sizes = [8, 100], strides = [1, 1]} : vector<8x1024xbf16> to vector<8x100xbf16>
    %169 = tpu.concatenate %167, %168 in 1 : vector<8x924xbf16>, vector<8x100xbf16> -> vector<8x1024xbf16>
    %c22 = arith.constant 22 : index
    %c0_78 = arith.constant 0 : index
    %c0_79 = arith.constant 0 : index
    %170 = vector.load %arg6[%c22, %c0_78, %c0_79] : memref<27x8x8xbf16, #tpu.memory_space<vmem>>, vector<1x8x8xbf16>
    %171 = vector.shape_cast %170 : vector<1x8x8xbf16> to vector<8x8xbf16>
    %cst_80 = arith.constant dense<0.000000e+00> : vector<8x1024xf32>
    %172 = tpu.matmul %171, %169, %cst_80 {dimension_numbers = #tpu.dot_dimension_numbers<[1], [0], [0], [1], [0, 0, 1, 1], [], []>} : vector<8x8xbf16>, vector<8x1024xbf16>, vector<8x1024xf32> -> vector<8x1024xf32>
    %173 = arith.addf %166, %172 : vector<8x1024xf32>
    %174 = vector.extract_strided_slice %16 {offsets = [0, 101], sizes = [8, 923], strides = [1, 1]} : vector<8x1024xbf16> to vector<8x923xbf16>
    %175 = vector.extract_strided_slice %16 {offsets = [0, 0], sizes = [8, 101], strides = [1, 1]} : vector<8x1024xbf16> to vector<8x101xbf16>
    %176 = tpu.concatenate %174, %175 in 1 : vector<8x923xbf16>, vector<8x101xbf16> -> vector<8x1024xbf16>
    %c23 = arith.constant 23 : index
    %c0_81 = arith.constant 0 : index
    %c0_82 = arith.constant 0 : index
    %177 = vector.load %arg6[%c23, %c0_81, %c0_82] : memref<27x8x8xbf16, #tpu.memory_space<vmem>>, vector<1x8x8xbf16>
    %178 = vector.shape_cast %177 : vector<1x8x8xbf16> to vector<8x8xbf16>
    %cst_83 = arith.constant dense<0.000000e+00> : vector<8x1024xf32>
    %179 = tpu.matmul %178, %176, %cst_83 {dimension_numbers = #tpu.dot_dimension_numbers<[1], [0], [0], [1], [0, 0, 1, 1], [], []>} : vector<8x8xbf16>, vector<8x1024xbf16>, vector<8x1024xf32> -> vector<8x1024xf32>
    %180 = arith.addf %173, %179 : vector<8x1024xf32>
    %181 = vector.extract_strided_slice %16 {offsets = [0, 109], sizes = [8, 915], strides = [1, 1]} : vector<8x1024xbf16> to vector<8x915xbf16>
    %182 = vector.extract_strided_slice %16 {offsets = [0, 0], sizes = [8, 109], strides = [1, 1]} : vector<8x1024xbf16> to vector<8x109xbf16>
    %183 = tpu.concatenate %181, %182 in 1 : vector<8x915xbf16>, vector<8x109xbf16> -> vector<8x1024xbf16>
    %c24 = arith.constant 24 : index
    %c0_84 = arith.constant 0 : index
    %c0_85 = arith.constant 0 : index
    %184 = vector.load %arg6[%c24, %c0_84, %c0_85] : memref<27x8x8xbf16, #tpu.memory_space<vmem>>, vector<1x8x8xbf16>
    %185 = vector.shape_cast %184 : vector<1x8x8xbf16> to vector<8x8xbf16>
    %cst_86 = arith.constant dense<0.000000e+00> : vector<8x1024xf32>
    %186 = tpu.matmul %185, %183, %cst_86 {dimension_numbers = #tpu.dot_dimension_numbers<[1], [0], [0], [1], [0, 0, 1, 1], [], []>} : vector<8x8xbf16>, vector<8x1024xbf16>, vector<8x1024xf32> -> vector<8x1024xf32>
    %187 = arith.addf %180, %186 : vector<8x1024xf32>
    %188 = vector.extract_strided_slice %16 {offsets = [0, 110], sizes = [8, 914], strides = [1, 1]} : vector<8x1024xbf16> to vector<8x914xbf16>
    %189 = vector.extract_strided_slice %16 {offsets = [0, 0], sizes = [8, 110], strides = [1, 1]} : vector<8x1024xbf16> to vector<8x110xbf16>
    %190 = tpu.concatenate %188, %189 in 1 : vector<8x914xbf16>, vector<8x110xbf16> -> vector<8x1024xbf16>
    %c25 = arith.constant 25 : index
    %c0_87 = arith.constant 0 : index
    %c0_88 = arith.constant 0 : index
    %191 = vector.load %arg6[%c25, %c0_87, %c0_88] : memref<27x8x8xbf16, #tpu.memory_space<vmem>>, vector<1x8x8xbf16>
    %192 = vector.shape_cast %191 : vector<1x8x8xbf16> to vector<8x8xbf16>
    %cst_89 = arith.constant dense<0.000000e+00> : vector<8x1024xf32>
    %193 = tpu.matmul %192, %190, %cst_89 {dimension_numbers = #tpu.dot_dimension_numbers<[1], [0], [0], [1], [0, 0, 1, 1], [], []>} : vector<8x8xbf16>, vector<8x1024xbf16>, vector<8x1024xf32> -> vector<8x1024xf32>
    %194 = arith.addf %187, %193 : vector<8x1024xf32>
    %195 = vector.extract_strided_slice %16 {offsets = [0, 111], sizes = [8, 913], strides = [1, 1]} : vector<8x1024xbf16> to vector<8x913xbf16>
    %196 = vector.extract_strided_slice %16 {offsets = [0, 0], sizes = [8, 111], strides = [1, 1]} : vector<8x1024xbf16> to vector<8x111xbf16>
    %197 = tpu.concatenate %195, %196 in 1 : vector<8x913xbf16>, vector<8x111xbf16> -> vector<8x1024xbf16>
    %c26 = arith.constant 26 : index
    %c0_90 = arith.constant 0 : index
    %c0_91 = arith.constant 0 : index
    %198 = vector.load %arg6[%c26, %c0_90, %c0_91] : memref<27x8x8xbf16, #tpu.memory_space<vmem>>, vector<1x8x8xbf16>
    %199 = vector.shape_cast %198 : vector<1x8x8xbf16> to vector<8x8xbf16>
    %cst_92 = arith.constant dense<0.000000e+00> : vector<8x1024xf32>
    %200 = tpu.matmul %199, %197, %cst_92 {dimension_numbers = #tpu.dot_dimension_numbers<[1], [0], [0], [1], [0, 0, 1, 1], [], []>} : vector<8x8xbf16>, vector<8x1024xbf16>, vector<8x1024xf32> -> vector<8x1024xf32>
    %201 = arith.addf %194, %200 : vector<8x1024xf32>
    %c0_93 = arith.constant 0 : index
    %c0_94 = arith.constant 0 : index
    %202 = vector.load %arg7[%c0_93, %c0_94] : memref<8x1xf32, #tpu.memory_space<vmem>>, vector<8x1xf32>
    %203 = vector.broadcast %202 : vector<8x1xf32> to vector<8x1024xf32>
    %204 = arith.mulf %201, %203 : vector<8x1024xf32>
    %c0_95 = arith.constant 0 : index
    %c0_96 = arith.constant 0 : index
    %205 = vector.load %arg8[%c0_95, %c0_96] : memref<8x1xf32, #tpu.memory_space<vmem>>, vector<8x1xf32>
    %206 = vector.broadcast %205 : vector<8x1xf32> to vector<8x1024xf32>
    %207 = arith.addf %204, %206 : vector<8x1024xf32>
    %cst_97 = arith.constant 0.000000e+00 : f32
    %208 = vector.broadcast %cst_97 : f32 to vector<8x1024xf32>
    %209 = arith.maximumf %207, %208 : vector<8x1024xf32>
    %c0_98 = arith.constant 0 : index
    %c0_99 = arith.constant 0 : index
    %210 = vector.load %arg9[%c0_98, %c0_99] : memref<32x8xbf16, #tpu.memory_space<vmem>>, vector<32x8xbf16>
    %211 = arith.truncf %209 : vector<8x1024xf32> to vector<8x1024xbf16>
    %cst_100 = arith.constant dense<0.000000e+00> : vector<32x1024xf32>
    %212 = tpu.matmul %210, %211, %cst_100 {dimension_numbers = #tpu.dot_dimension_numbers<[1], [0], [0], [1], [0, 0, 1, 1], [], []>} : vector<32x8xbf16>, vector<8x1024xbf16>, vector<32x1024xf32> -> vector<32x1024xf32>
    %c0_101 = arith.constant 0 : index
    %c0_102 = arith.constant 0 : index
    %213 = vector.load %arg10[%c0_101, %c0_102] : memref<32x1xf32, #tpu.memory_space<vmem>>, vector<32x1xf32>
    %214 = vector.broadcast %213 : vector<32x1xf32> to vector<32x1024xf32>
    %215 = arith.mulf %212, %214 : vector<32x1024xf32>
    %c0_103 = arith.constant 0 : index
    %c0_104 = arith.constant 0 : index
    %216 = vector.load %arg11[%c0_103, %c0_104] : memref<32x1xf32, #tpu.memory_space<vmem>>, vector<32x1xf32>
    %217 = vector.broadcast %216 : vector<32x1xf32> to vector<32x1024xf32>
    %218 = arith.addf %215, %217 : vector<32x1024xf32>
    %c0_105 = arith.constant 0 : index
    %c0_106 = arith.constant 0 : index
    %219 = vector.load %arg12[%c0_105, %c0_106] : memref<32x16xbf16, #tpu.memory_space<vmem>>, vector<32x16xbf16>
    %220 = arith.truncf %1 : vector<16x1024xf32> to vector<16x1024xbf16>
    %cst_107 = arith.constant dense<0.000000e+00> : vector<32x1024xf32>
    %221 = tpu.matmul %219, %220, %cst_107 {dimension_numbers = #tpu.dot_dimension_numbers<[1], [0], [0], [1], [0, 0, 1, 1], [], []>} : vector<32x16xbf16>, vector<16x1024xbf16>, vector<32x1024xf32> -> vector<32x1024xf32>
    %c0_108 = arith.constant 0 : index
    %c0_109 = arith.constant 0 : index
    %222 = vector.load %arg13[%c0_108, %c0_109] : memref<32x1xf32, #tpu.memory_space<vmem>>, vector<32x1xf32>
    %223 = vector.broadcast %222 : vector<32x1xf32> to vector<32x1024xf32>
    %224 = arith.mulf %221, %223 : vector<32x1024xf32>
    %c0_110 = arith.constant 0 : index
    %c0_111 = arith.constant 0 : index
    %225 = vector.load %arg14[%c0_110, %c0_111] : memref<32x1xf32, #tpu.memory_space<vmem>>, vector<32x1xf32>
    %226 = vector.broadcast %225 : vector<32x1xf32> to vector<32x1024xf32>
    %227 = arith.addf %224, %226 : vector<32x1024xf32>
    %228 = arith.addf %218, %227 : vector<32x1024xf32>
    %cst_112 = arith.constant 0.000000e+00 : f32
    %229 = vector.broadcast %cst_112 : f32 to vector<32x1024xf32>
    %230 = arith.maximumf %228, %229 : vector<32x1024xf32>
    %231 = vector.broadcast %2 : vector<1x1024xf32> to vector<32x1024xf32>
    %232 = arith.mulf %230, %231 : vector<32x1024xf32>
    %c0_113 = arith.constant 0 : index
    %c0_114 = arith.constant 0 : index
    %c0_115 = arith.constant 0 : index
    %233 = vector.load %arg15[%c0_113, %c0_114, %c0_115] : memref<1x32x1024xf32, #tpu.memory_space<vmem>>, vector<1x32x1024xf32>
    %234 = vector.shape_cast %233 : vector<1x32x1024xf32> to vector<32x1024xf32>
    %235 = vector.shape_cast %232 : vector<32x1024xf32> to vector<1x32x1024xf32>
    tpu.vector_store %arg15[%c0_113, %c0_114, %c0_115], %235 {strides = array<i32>} : memref<1x32x1024xf32, #tpu.memory_space<vmem>>, vector<1x32x1024xf32>,
    return
  }
  func.func @transform_0(%arg0: i32) -> (i32, i32, i32) {
    %c0_i32 = arith.constant 0 : i32
    %c0_i32_0 = arith.constant 0 : i32
    %c0_i32_1 = arith.constant 0 : i32
    return %arg0, %c0_i32, %c0_i32_0 : i32, i32, i32
  }
  func.func @transform_1(%arg0: i32) -> (i32, i32) {
    %c0_i32 = arith.constant 0 : i32
    %c0_i32_0 = arith.constant 0 : i32
    %c0_i32_1 = arith.constant 0 : i32
    return %c0_i32, %c0_i32_0 : i32, i32
  }
  func.func @transform_2(%arg0: i32) -> (i32, i32) {
    %c0_i32 = arith.constant 0 : i32
    %c0_i32_0 = arith.constant 0 : i32
    %c0_i32_1 = arith.constant 0 : i32
    return %c0_i32, %c0_i32_0 : i32, i32
  }
  func.func @transform_3(%arg0: i32) -> (i32, i32) {
    %c0_i32 = arith.constant 0 : i32
    %c0_i32_0 = arith.constant 0 : i32
    %c0_i32_1 = arith.constant 0 : i32
    return %c0_i32, %c0_i32_0 : i32, i32
  }
  func.func @transform_4(%arg0: i32) -> (i32, i32) {
    %c0_i32 = arith.constant 0 : i32
    %c0_i32_0 = arith.constant 0 : i32
    %c0_i32_1 = arith.constant 0 : i32
    return %c0_i32, %c0_i32_0 : i32, i32
  }
  func.func @transform_5(%arg0: i32) -> (i32, i32, i32) {
    %c0_i32 = arith.constant 0 : i32
    %c0_i32_0 = arith.constant 0 : i32
    %c0_i32_1 = arith.constant 0 : i32
    %c0_i32_2 = arith.constant 0 : i32
    return %c0_i32, %c0_i32_0, %c0_i32_1 : i32, i32, i32
  }
  func.func @transform_6(%arg0: i32) -> (i32, i32) {
    %c0_i32 = arith.constant 0 : i32
    %c0_i32_0 = arith.constant 0 : i32
    %c0_i32_1 = arith.constant 0 : i32
    return %c0_i32, %c0_i32_0 : i32, i32
  }
  func.func @transform_7(%arg0: i32) -> (i32, i32) {
    %c0_i32 = arith.constant 0 : i32
    %c0_i32_0 = arith.constant 0 : i32
    %c0_i32_1 = arith.constant 0 : i32
    return %c0_i32, %c0_i32_0 : i32, i32
  }
  func.func @transform_8(%arg0: i32) -> (i32, i32) {
    %c0_i32 = arith.constant 0 : i32
    %c0_i32_0 = arith.constant 0 : i32
    %c0_i32_1 = arith.constant 0 : i32
    return %c0_i32, %c0_i32_0 : i32, i32
  }
  func.func @transform_9(%arg0: i32) -> (i32, i32) {
    %c0_i32 = arith.constant 0 : i32
    %c0_i32_0 = arith.constant 0 : i32
    %c0_i32_1 = arith.constant 0 : i32
    return %c0_i32, %c0_i32_0 : i32, i32
  }
  func.func @transform_10(%arg0: i32) -> (i32, i32) {
    %c0_i32 = arith.constant 0 : i32
    %c0_i32_0 = arith.constant 0 : i32
    %c0_i32_1 = arith.constant 0 : i32
    return %c0_i32, %c0_i32_0 : i32, i32
  }
  func.func @transform_11(%arg0: i32) -> (i32, i32) {
    %c0_i32 = arith.constant 0 : i32
    %c0_i32_0 = arith.constant 0 : i32
    %c0_i32_1 = arith.constant 0 : i32
    return %c0_i32, %c0_i32_0 : i32, i32
  }
  func.func @transform_12(%arg0: i32) -> (i32, i32) {
    %c0_i32 = arith.constant 0 : i32
    %c0_i32_0 = arith.constant 0 : i32
    %c0_i32_1 = arith.constant 0 : i32
    return %c0_i32, %c0_i32_0 : i32, i32
  }
  func.func @transform_13(%arg0: i32) -> (i32, i32) {
    %c0_i32 = arith.constant 0 : i32
    %c0_i32_0 = arith.constant 0 : i32
    %c0_i32_1 = arith.constant 0 : i32
    return %c0_i32, %c0_i32_0 : i32, i32
  }
  func.func @transform_14(%arg0: i32) -> (i32, i32, i32) {
    %c0_i32 = arith.constant 0 : i32
    %c0_i32_0 = arith.constant 0 : i32
    %c0_i32_1 = arith.constant 0 : i32
    return %arg0, %c0_i32, %c0_i32_0 : i32, i32, i32
  }
}

</mosaic_0001>

<bundles_post_ra>
// kernel: bottleneck_forward.1
= control target key start
LH: loop header
LB: loop body
LE: loop exit
PB: predicated region body
PF: predicated region fallthrough
CT: control target
= control target key end

     0   :  { %s8667_s29 = smov 0   ;;  %s10405_s0 = inlined_call_operand.vmem [shape: f32[2,16,1024], index: 0, kind: input, shape index: {}]   ;;  %s10406_s1 = inlined_call_operand.vmem [shape: f32[1,1024], index: 1, kind: input, shape index: {}]   ;;  %s10407_s2 = inlined_call_operand.vmem [shape: bf16[8,16], index: 2, kind: input, shape index: {}]   ;;  %s10408_s3 = inlined_call_operand.vmem [shape: f32[8,1], index: 3, kind: input, shape index: {}]   ;;  %s10409_s4 = inlined_call_operand.vmem [shape: f32[8,1], index: 4, kind: input, shape index: {}]   ;;  %s10410_s5 = inlined_call_operand.vmem [shape: bf16[27,8,8], index: 5, kind: input, shape index: {}]   ;;  %s10411_s6 = inlined_call_operand.vmem [shape: f32[8,1], index: 6, kind: input, shape index: {}]   ;;  %s10412_s7 = inlined_call_operand.vmem [shape: f32[8,1], index: 7, kind: input, shape index: {}]   ;;  %s10413_s8 = inlined_call_operand.vmem [shape: bf16[32,8], index: 8, kind: input, shape index: {}]   ;;  %s10414_s9 = inlined_call_operand.vmem [shape: f32[32,1], index: 9, kind: input, shape index: {}]   ;;  %s10415_s10 = inlined_call_operand.vmem [shape: f32[32,1], index: 10, kind: input, shape index: {}]   ;;  %s10416_s11 = inlined_call_operand.vmem [shape: bf16[32,16], index: 11, kind: input, shape index: {}]   ;;  %s10417_s12 = inlined_call_operand.vmem [shape: f32[32,1], index: 12, kind: input, shape index: {}]   ;;  %s10418_s13 = inlined_call_operand.vmem [shape: f32[32,1], index: 13, kind: input, shape index: {}]   ;;  %s10419_s14 = inlined_call_operand.vmem [shape: f32[2,32,1024], index: 14, kind: output, shape index: {}]  }
   0x1 LB: > { %s7817_s30 = sadd.s32 4294967295, %s8563_s29   ;;  %p7821_p0 = scmp.ge.s32.totalorder %s8563_s29, 1  ;;  %s8563_s29 = sphi %s8667_s29, %s24_s29  }
   0x2   : > { %p412_p1 = scmp.lt.s32.totalorder %s8563_s29, 3 }
   0x4   : > { %p413_p2 = pnand %p7821_p0, %p412_p1 }
   0x6   : > { %416 = sbr.rel (%p413_p2) target bundleno = 1310 (0x51e), region = 76 }
   0xd   : > { %p458_p3 = scmp.lt.s32.totalorder %s7817_s30, 1  ;;  %v663_v0 = vld [vmem:[%s10408_s3] sm:$0xff]  ;;  %v8565_v1 = vmov 0   ;;  %vm495_vm0 = vcmask 130048   ;;  %v700_v28 = vlaneseq  ;;  %s8566_s27 = smov 110   ;;  %vm809_vm1 = vcmask 900096  }
   0xe   : > { %531 = vmatprep.mubr.bf16.mxu0 %v8565_v1  ;;  %572 = vmatprep.mubr.bf16.mxu1 %v8565_v1  ;;  %v677_v2 = vld [vmem:[%s10409_s4] sm:$0xff]  ;;  %s8567_s28 = smov 111   ;;  %s8568_s15 = smov 109   ;;  %vm827_vm2 = vcmask 1043456   ;;  %vm823_vm3 = vcmask 64512   ;;  %vm780_vm4 = vcmask 908288  }
   0xf   : > { %s10423_s30 = smov (!%p458_p3, %s7817_s30), 1  ;;  %8551 = vset.pattern.permute.xlu0 %v8565_v1  ;;  %8552 = vset.pattern.permute.xlu1 %v8565_v1  ;;  %v486_v14 = vld [vmem:[%s10407_s2] sm:$0xf]  ;;  %v8726_v30 = vshrl.u32 %v700_v28, 7  ;;  %s8569_s16 = smov 101   ;;  %vm1221_vm5 = vcmask 891904  }
  0x10   : > { %666 = vperm.xlu0 %8551, %v663_v0   ;;  %s8098_s17 = sshll.u32 %s10423_s30, 7  ;;  %v8734_v33 = vld [vmem:[%s10406_s1] sm:$0xff]  ;;  %s8571_s18 = smov 99   ;;  %vm1449_vm6 = vcmask 826368   ;;  %vm1677_vm7 = vcmask 818176   ;;  %vm1905_vm8 = vcmask 809984  }
  0x11   : > { %s462_s22 = scalar_lea.vmem %s10405_s0, %s8098_s17  ;;  %v702_v31 = vsub.s32 0, %v8726_v30  ;;  %v706_v35 = vsub.s32 1, %v8726_v30  ;;  %v710_v38 = vsub.s32 2, %v8726_v30  ;;  %v714_v43 = vsub.s32 3, %v8726_v30  ;;  %s8570_s17 = smov 100  }
  0x12   : > { %v470_v3 = vld [vmem:[%s462_s22 + $0x8] sm:$0xff]  ;;  %v472_v5 = vld [vmem:[%s462_s22 + $0x18] sm:$0xff]  ;;  %v469_v8 = vld [vmem:[%s462_s22] sm:$0xff]  ;;  %s8572_s19 = smov 91   ;;  %s8573_s20 = smov 90   ;;  %vm2133_vm9 = vcmask 744448  }
  0x13   : > { %v478_v4 = vld [vmem:[%s462_s22 + $0x48] sm:$0xff]  ;;  %v480_v7 = vld [vmem:[%s462_s22 + $0x58] sm:$0xff]  ;;  %v477_v9 = vld [vmem:[%s462_s22 + $0x40] sm:$0xff]  ;;  %v8741_v46 = vrot.slane %v8734_v33, %v702_v31  ;;  %v8746_v52 = vrot.slane %v8734_v33, %v706_v35  ;;  %v8749_v55 = vrot.slane %v8734_v33, %v710_v38  ;;  %v8753_v59 = vrot.slane %v8734_v33, %v714_v43  ;;  %s8574_s21 = smov 89   ;;  %s8575_s24 = smov 11  }
  0x14   : > { %v8691_v6 = vpack.c.bf16 %v478_v4, %v470_v3  ;;  %680 = vperm.xlu0 %8551, %v677_v2   ;;  %v8693_v10 = vpack.c.bf16 %v480_v7, %v472_v5  ;;  %v8695_v11 = vpack.c.bf16 %v477_v9, %v469_v8  ;;  %v471_v12 = vld [vmem:[%s462_s22 + $0x10] sm:$0xff]  ;;  %v474_v15 = vld [vmem:[%s462_s22 + $0x28] sm:$0xff]  ;;  %v476_v18 = vld [vmem:[%s462_s22 + $0x38] sm:$0xff]  ;;  %v730_v7 = vsub.s32 7, %v8726_v30  ;;  %s8580_s25 = smov 119   ;;  %s8584_s23 = smov 38  }
  0x15   : > { %v479_v13 = vld [vmem:[%s462_s22 + $0x50] sm:$0xff]  ;;  %v482_v17 = vld [vmem:[%s462_s22 + $0x68] sm:$0xff]  ;;  %v484_v19 = vld [vmem:[%s462_s22 + $0x78] sm:$0xff]  ;;  %vm2361_vm10 = vcmask 736256   ;;  %vm2589_vm11 = vcmask 728064   ;;  %vm2817_vm12 = vcmask 89088  }
  0x16   : > { %499 = vmatprep.subr.bf16.mxu0 %v8691_v6  ;;  %v8701_v16 = vpack.c.bf16 %v479_v13, %v471_v12  ;;  %540 = vmatprep.subr.bf16.mxu1 %v8693_v10  ;;  %v8705_v20 = vpack.c.bf16 %v482_v17, %v474_v15  ;;  %v8707_v21 = vpack.c.bf16 %v484_v19, %v476_v18  ;;  %v473_v22 = vld [vmem:[%s462_s22 + $0x20] sm:$0xff]  ;;  %v475_v24 = vld [vmem:[%s462_s22 + $0x30] sm:$0xff]  ;;  %v722_v13 = vsub.s32 5, %v8726_v30  ;;  %s8585_s26 = smov 37  }
  0x17   : > { %500 = vmatpush1.bf16.msra.mxu0 %v8695_v11  ;;  %v481_v23 = vld [vmem:[%s462_s22 + $0x60] sm:$0xff]  ;;  %v483_v26 = vld [vmem:[%s462_s22 + $0x70] sm:$0xff]  ;;  %v718_v18 = vsub.s32 4, %v8726_v30  ;;  %v8776_v35 = vrot.slane %v8734_v33, %v730_v7  ;;  %s8579_s22 = smov 127   ;;  %vm3045_vm13 = vcmask 80896   ;;  %vm3273_vm14 = vcmask 72704  }
  0x18   : > { %541 = vmatpush1.bf16.msra.mxu1 %v8701_v16  ;;  %v8710_v25 = vpack.c.bf16 %v481_v23, %v473_v22  ;;  %581 = vmatprep.subr.bf16.mxu0 %v8705_v20  ;;  %v8714_v27 = vpack.c.bf16 %v483_v26, %v475_v24  ;;  %v8782_v38 = vrot.slane %v8734_v33, %v722_v13  ;;  %vm3501_vm15 = vcmask 7168  }
  0x19   : > { %622 = vmatprep.subr.bf16.mxu1 %v8707_v21 }
  0x1a   : > { %7826 = vmatmul.mubr.msk.bf16.vlgmr.msra.gmra.mrb[0].mxu0 %vm495_vm0, %v486_v14 }
  0x1b   : > { %7827 = vmatmul.mubr.msk.bf16.vlgmr.msra.gmra.mrb[0].mxu1 %vm495_vm0, %v486_v14  ;;  %582 = vmatpush1.bf16.msra.mxu0 %v8710_v25 }
  0x1c   : > { %623 = vmatpush1.bf16.msra.mxu1 %v8714_v27  ;;  %613 = vmatprep.mubr.bf16.mxu0 %v8565_v1 }
  0x1d   : > { %654 = vmatprep.mubr.bf16.mxu1 %v8565_v1 }
  0x22   : > { %7828 = vmatmul.mubr.msk.bf16.vlgmr.msra.gmra.mrb[4].mxu0 %vm495_vm0, %v486_v14 }
  0x23   : > { %7829 = vmatmul.mubr.msk.bf16.vlgmr.msra.gmra.mrb[4].mxu1 %vm495_vm0, %v486_v14  ;;  %883 = vmatprep.mubr.bf16.mxu0 %v8565_v1 }
  0x24   : > { %924 = vmatprep.mubr.bf16.mxu1 %v8565_v1 }
  0x8f   : > { %v667_v29 = vpop.permute.xlu0 %666 }
  0x93   : > { %v8729_v32 = vpop.permute.xlu0 %680 }
  0xed   : > { %v533_v34 = vpop.f32.mrb[0].mxu0 }
  0xee   : > { %v669_v36 = vmul.f32 %v667_v29, %v533_v34  ;;  %v574_v37 = vpop.f32.mrb[0].mxu1  ;;  %v535_v39 = vpop.f32.mrb[1].mxu0 }
  0xef   : > { %v671_v40 = vmul.f32 %v667_v29, %v574_v37  ;;  %v670_v41 = vmul.f32 %v667_v29, %v535_v39  ;;  %v576_v42 = vpop.f32.mrb[1].mxu1  ;;  %v537_v44 = vpop.f32.mrb[2].mxu0 }
  0xf0   : > { %v683_v45 = vadd.f32 %v8729_v32, %v669_v36  ;;  %v672_v47 = vmul.f32 %v667_v29, %v576_v42  ;;  %v578_v48 = vpop.f32.mrb[2].mxu1  ;;  %v538_v49 = vpop.f32.mrb[3].mxu0  ;;  %v726_v36 = vsub.s32 6, %v8726_v30 }
  0xf1   : > { %v685_v50 = vadd.f32 %v8729_v32, %v671_v40  ;;  %v684_v51 = vadd.f32 %v8729_v32, %v670_v41  ;;  %v579_v53 = vpop.f32.mrb[3].mxu1  ;;  %v8785_v40 = vrot.slane %v8734_v33, %v718_v18 }
  0xf2   : > { %v691_v54 = vmax.f32 %v683_v45, 0.0  ;;  %v686_v56 = vadd.f32 %v8729_v32, %v672_v47  ;;  %v8796_v47 = vrot.slane %v8734_v33, %v726_v36 }
  0xf3   : > { %v693_v57 = vmax.f32 %v685_v50, 0.0  ;;  %v692_v58 = vmax.f32 %v684_v51, 0.0 }
  0xf4   : > { %v740_v60 = vmul.f32 %v8741_v46, %v691_v54  ;;  %v694_v61 = vmax.f32 %v686_v56, 0.0 }
  0xf5   : > { %v741_v62 = vmul.f32 %v8746_v52, %v692_v58  ;;  %v615_v63 = vpop.f32.mrb[4].mxu0  ;;  %v742_v2 = vmul.f32 %v8749_v55, %v693_v57 }
  0xf6   : > { %v8757_v0 = vpack.c.bf16 %v740_v60, %v740_v60  ;;  %v673_v3 = vmul.f32 %v667_v29, %v615_v63  ;;  %v656_v4 = vpop.f32.mrb[4].mxu1  ;;  %v617_v5 = vpop.f32.mrb[5].mxu0  ;;  %v743_v9 = vmul.f32 %v8753_v59, %v694_v61 }
  0xf7   : > { %v8761_v8 = vpack.c.bf16 %v741_v62, %v741_v62  ;;  %v674_v12 = vmul.f32 %v667_v29, %v617_v5  ;;  %v658_v14 = vpop.f32.mrb[5].mxu1  ;;  %v619_v15 = vpop.f32.mrb[6].mxu0  ;;  %v675_v19 = vmul.f32 %v667_v29, %v656_v4  ;;  %v8772_v31 = vpack.c.bf16 %v742_v2, %v742_v2  ;;  %v7830_v62 = vld [vmem:[%s10410_s5 + $0x4] sm:$0xf] }
  0xf8   : > { %v687_v17 = vadd.f32 %v8729_v32, %v673_v3  ;;  %v676_v22 = vmul.f32 %v667_v29, %v658_v14  ;;  %v660_v23 = vpop.f32.mrb[6].mxu1  ;;  %795 = vrot.lane.b32.xlu1 %v8757_v0, %s8566_s27  ;;  %v620_v24 = vpop.f32.mrb[7].mxu0  ;;  %v8778_v29 = vpack.c.bf16 %v743_v9, %v743_v9 }
  0xf9   : > { %v688_v26 = vadd.f32 %v8729_v32, %v674_v12  ;;  %v661_v28 = vpop.f32.mrb[7].mxu1  ;;  %797 = vrot.lane.b32.xlu0 %v8761_v8, %s8566_s27  ;;  %v689_v41 = vadd.f32 %v8729_v32, %v675_v19 }
  0xfa   : > { %v690_v34 = vadd.f32 %v8729_v32, %v676_v22  ;;  %v695_v39 = vmax.f32 %v687_v17, 0.0 }
  0xfb   : > { %v696_v37 = vmax.f32 %v688_v26, 0.0  ;;  %v697_v45 = vmax.f32 %v689_v41, 0.0 }
  0xfc   : > { %v698_v42 = vmax.f32 %v690_v34, 0.0  ;;  %799 = vrot.lane.b32.xlu1 %v8772_v31, %s8566_s27  ;;  %v744_v44 = vmul.f32 %v8785_v40, %v695_v39 }
  0xfd   : > { %801 = vrot.lane.b32.xlu0 %v8778_v29, %s8566_s27  ;;  %v745_v30 = vmul.f32 %v8782_v38, %v696_v37  ;;  %v746_v50 = vmul.f32 %v8796_v47, %v697_v45 }
  0xfe   : > { %v747_v43 = vmul.f32 %v8776_v35, %v698_v42  ;;  %v8805_v49 = vpack.c.bf16 %v744_v44, %v744_v44 }
  0xff   : > { %v8803_v32 = vpack.c.bf16 %v745_v30, %v745_v30  ;;  %v8812_v33 = vpack.c.bf16 %v746_v50, %v746_v50 }
 0x100   : > { %v8798_v48 = vpack.c.bf16 %v747_v43, %v747_v43  ;;  %v792_v43 = vld [vmem:[%s10410_s5] sm:$0xf] }
 0x101   : > { %768 = vrot.lane.b32.xlu0 %v8761_v8, %s8567_s28 }
 0x102   : > { %793 = vrot.lane.b32.xlu1 %v8798_v48, %s8566_s27 }
 0x105   : > { %805 = vrot.lane.b32.xlu0 %v8803_v32, %s8566_s27 }
 0x106   : > { %803 = vrot.lane.b32.xlu1 %v8805_v49, %s8566_s27 }
 0x109   : > { %772 = vrot.lane.b32.xlu0 %v8778_v29, %s8567_s28 }
 0x10a   : > { %807 = vrot.lane.b32.xlu1 %v8812_v33, %s8566_s27  ;;  %s8576_s27 = smov 10  }
 0x10d   : > { %757 = vrot.lane.b32.xlu0 %v8798_v48, %s8567_s28 }
 0x10e   : > { %766 = vrot.lane.b32.xlu1 %v8757_v0, %s8567_s28 }
 0x111   : > { %1209 = vrot.lane.b32.xlu0 %v8761_v8, %s8568_s15 }
 0x112   : > { %770 = vrot.lane.b32.xlu1 %v8772_v31, %s8567_s28 }
 0x115   : > { %776 = vrot.lane.b32.xlu0 %v8803_v32, %s8567_s28 }
 0x116   : > { %774 = vrot.lane.b32.xlu1 %v8805_v49, %s8567_s28 }
 0x119   : > { %1213 = vrot.lane.b32.xlu0 %v8778_v29, %s8568_s15 }
 0x11a   : > { %778 = vrot.lane.b32.xlu1 %v8812_v33, %s8567_s28  ;;  %s8581_s28 = smov 118  }
 0x11d   : > { %1205 = vrot.lane.b32.xlu0 %v8798_v48, %s8568_s15 }
 0x11e   : > { %1207 = vrot.lane.b32.xlu1 %v8757_v0, %s8568_s15 }
 0x121   : > { %1437 = vrot.lane.b32.xlu0 %v8761_v8, %s8569_s16 }
 0x122   : > { %1211 = vrot.lane.b32.xlu1 %v8772_v31, %s8568_s15 }
 0x125   : > { %1217 = vrot.lane.b32.xlu0 %v8803_v32, %s8568_s15 }
 0x126   : > { %1215 = vrot.lane.b32.xlu1 %v8805_v49, %s8568_s15 }
 0x129   : > { %1441 = vrot.lane.b32.xlu0 %v8778_v29, %s8569_s16 }
 0x12a   : > { %1219 = vrot.lane.b32.xlu1 %v8812_v33, %s8568_s15  ;;  %s8586_s15 = smov 29  }
 0x12d   : > { %1433 = vrot.lane.b32.xlu0 %v8798_v48, %s8569_s16 }
 0x12e   : > { %1435 = vrot.lane.b32.xlu1 %v8757_v0, %s8569_s16 }
 0x131   : > { %1665 = vrot.lane.b32.xlu0 %v8761_v8, %s8570_s17 }
 0x132   : > { %1439 = vrot.lane.b32.xlu1 %v8772_v31, %s8569_s16 }
 0x135   : > { %1445 = vrot.lane.b32.xlu0 %v8803_v32, %s8569_s16 }
 0x136   : > { %1443 = vrot.lane.b32.xlu1 %v8805_v49, %s8569_s16 }
 0x139   : > { %1669 = vrot.lane.b32.xlu0 %v8778_v29, %s8570_s17 }
 0x13a   : > { %1447 = vrot.lane.b32.xlu1 %v8812_v33, %s8569_s16  ;;  %s8577_s16 = smov 9  }
 0x13d   : > { %1661 = vrot.lane.b32.xlu0 %v8798_v48, %s8570_s17 }
 0x13e   : > { %1663 = vrot.lane.b32.xlu1 %v8757_v0, %s8570_s17 }
 0x141   : > { %1893 = vrot.lane.b32.xlu0 %v8761_v8, %s8571_s18 }
 0x142   : > { %1667 = vrot.lane.b32.xlu1 %v8772_v31, %s8570_s17 }
 0x145   : > { %1673 = vrot.lane.b32.xlu0 %v8803_v32, %s8570_s17 }
 0x146   : > { %1671 = vrot.lane.b32.xlu1 %v8805_v49, %s8570_s17 }
 0x149   : > { %1897 = vrot.lane.b32.xlu0 %v8778_v29, %s8571_s18 }
 0x14a   : > { %1675 = vrot.lane.b32.xlu1 %v8812_v33, %s8570_s17  ;;  %s8582_s17 = smov 117  }
 0x14d   : > { %1889 = vrot.lane.b32.xlu0 %v8798_v48, %s8571_s18 }
 0x14e   : > { %1891 = vrot.lane.b32.xlu1 %v8757_v0, %s8571_s18 }
 0x151   : > { %2121 = vrot.lane.b32.xlu0 %v8761_v8, %s8572_s19 }
 0x152   : > { %1895 = vrot.lane.b32.xlu1 %v8772_v31, %s8571_s18 }
 0x155   : > { %1901 = vrot.lane.b32.xlu0 %v8803_v32, %s8571_s18 }
 0x156   : > { %1899 = vrot.lane.b32.xlu1 %v8805_v49, %s8571_s18 }
 0x159   : > { %2125 = vrot.lane.b32.xlu0 %v8778_v29, %s8572_s19 }
 0x15a   : > { %1903 = vrot.lane.b32.xlu1 %v8812_v33, %s8571_s18  ;;  %s8587_s18 = smov 28  }
 0x15d   : > { %2117 = vrot.lane.b32.xlu0 %v8798_v48, %s8572_s19 }
 0x15e   : > { %2119 = vrot.lane.b32.xlu1 %v8757_v0, %s8572_s19 }
 0x161   : > { %2349 = vrot.lane.b32.xlu0 %v8761_v8, %s8573_s20 }
 0x162   : > { %2123 = vrot.lane.b32.xlu1 %v8772_v31, %s8572_s19 }
 0x165   : > { %2129 = vrot.lane.b32.xlu0 %v8803_v32, %s8572_s19 }
 0x166   : > { %2127 = vrot.lane.b32.xlu1 %v8805_v49, %s8572_s19 }
 0x169   : > { %2353 = vrot.lane.b32.xlu0 %v8778_v29, %s8573_s20 }
 0x16a   : > { %2131 = vrot.lane.b32.xlu1 %v8812_v33, %s8572_s19  ;;  %v796_v51 = vpop.permute.xlu1 %795  ;;  %s8578_s19 = smov 1  }
 0x16b   : > { %v798_v53 = vpop.permute.xlu0 %797 }
 0x16c   : > { %v810_v54 = vsel %vm809_vm1, %v796_v51, %v798_v53 }
 0x16d   : > { %7831 = vmatprep.subr.msk.bf16.mxu0 %vm827_vm2, %v810_v54  ;;  %2345 = vrot.lane.b32.xlu0 %v8798_v48, %s8573_s20 }
 0x16e   : > { %2347 = vrot.lane.b32.xlu1 %v8757_v0, %s8573_s20  ;;  %v800_v56 = vpop.permute.xlu1 %799 }
 0x16f   : > { %v811_v57 = vsel %vm809_vm1, %v798_v53, %v800_v56  ;;  %v802_v58 = vpop.permute.xlu0 %801 }
 0x170   : > { %v812_v60 = vsel %vm809_vm1, %v800_v56, %v802_v58  ;;  %v834_v61 = vsel %vm827_vm2, %v811_v57, 0 }
 0x171   : > { %7833 = vmatprep.subr.msk.bf16.mxu1 %vm827_vm2, %v812_v60  ;;  %2577 = vrot.lane.b32.xlu0 %v8761_v8, %s8574_s21 }
 0x172   : > { %2351 = vrot.lane.b32.xlu1 %v8772_v31, %s8573_s20  ;;  %893 = vmatpush1.bf16.msra.mxu1 %v834_v61 }
 0x173   : > { %v769_v63 = vpop.permute.xlu0 %768 }
 0x174   : > { %v794_v2 = vpop.permute.xlu1 %793 }
 0x175   : > { %v820_v3 = vsel %vm809_vm1, %v794_v2, %v796_v51  ;;  %2357 = vrot.lane.b32.xlu0 %v8803_v32, %s8573_s20  ;;  %7834 = vmatmul.mubr.msk.bf16.vlgmr.msra.gmra.mrb[8].mxu1 %vm823_vm3, %v7830_v62 }
 0x176   : > { %2355 = vrot.lane.b32.xlu1 %v8805_v49, %s8573_s20  ;;  %v828_v4 = vsel %vm827_vm2, %v820_v3, 0  ;;  %1006 = vmatprep.mubr.bf16.mxu1 %v8565_v1 }
 0x177   : > { %852 = vmatpush1.bf16.msra.mxu0 %v828_v4  ;;  %v806_v5 = vpop.permute.xlu0 %805 }
 0x178   : > { %v804_v7 = vpop.permute.xlu1 %803 }
 0x179   : > { %v813_v9 = vsel %vm809_vm1, %v802_v58, %v804_v7  ;;  %2581 = vrot.lane.b32.xlu0 %v8778_v29, %s8574_s21  ;;  %v814_v12 = vsel %vm809_vm1, %v804_v7, %v806_v5 }
 0x17a   : > { %7832 = vmatmul.mubr.msk.bf16.vlgmr.msra.gmra.mrb[8].mxu0 %vm823_vm3, %v7830_v62  ;;  %2359 = vrot.lane.b32.xlu1 %v8812_v33, %s8573_s20  ;;  %v840_v13 = vsel %vm827_vm2, %v813_v9, 0  ;;  %s8583_s20 = smov 39  }
 0x17b   : > { %7835 = vmatprep.subr.msk.bf16.mxu0 %vm827_vm2, %v814_v12  ;;  %v773_v14 = vpop.permute.xlu0 %772  ;;  %965 = vmatprep.mubr.bf16.mxu0 %v8565_v1  ;;  %v7847_v12 = vld [vmem:[%s10410_s5 + $0x8] sm:$0xf] }
 0x17c   : > { %934 = vmatpush1.bf16.msra.mxu0 %v840_v13  ;;  %v808_v15 = vpop.permute.xlu1 %807 }
 0x17d   : > { %v815_v17 = vsel %vm809_vm1, %v806_v5, %v808_v15  ;;  %v816_v18 = vsel %vm809_vm1, %v808_v15, %v794_v2  ;;  %2573 = vrot.lane.b32.xlu0 %v8798_v48, %s8574_s21  ;;  %vm3930_vm1 = vcmask 1039360  }
 0x17e   : > { %2575 = vrot.lane.b32.xlu1 %v8757_v0, %s8574_s21  ;;  %7837 = vmatprep.subr.msk.bf16.mxu1 %vm827_vm2, %v816_v18  ;;  %v846_v19 = vsel %vm827_vm2, %v815_v17, 0 }
 0x17f   : > { %975 = vmatpush1.bf16.msra.mxu1 %v846_v19  ;;  %v758_v22 = vpop.permute.xlu0 %757 }
 0x180   : > { %v767_v23 = vpop.permute.xlu1 %766 }
 0x181   : > { %v791_v24 = vsel %vm780_vm4, %v758_v22, %v767_v23  ;;  %2805 = vrot.lane.b32.xlu0 %v8761_v8, %s8575_s24  ;;  %v781_v26 = vsel %vm780_vm4, %v767_v23, %v769_v63 }
 0x182   : > { %2579 = vrot.lane.b32.xlu1 %v8772_v31, %s8574_s21  ;;  %7836 = vmatmul.mubr.msk.bf16.vlgmr.msra.gmra.mrb[12].mxu0 %vm823_vm3, %v7830_v62  ;;  %v1018_v28 = vsel %vm827_vm2, %v791_v24, 0 }
 0x183   : > { %7838 = vmatmul.mubr.msk.bf16.vlgmr.msra.gmra.mrb[12].mxu1 %vm823_vm3, %v7830_v62  ;;  %7839 = vmatprep.subr.msk.bf16.mxu0 %vm827_vm2, %v781_v26  ;;  %v1210_v34 = vpop.permute.xlu0 %1209 }
 0x184   : > { %1042 = vmatpush1.bf16.msra.mxu0 %v1018_v28  ;;  %v771_v36 = vpop.permute.xlu1 %770  ;;  %1073 = vmatprep.mubr.bf16.mxu0 %v8565_v1 }
 0x185   : > { %v782_v37 = vsel %vm780_vm4, %v769_v63, %v771_v36  ;;  %2585 = vrot.lane.b32.xlu0 %v8803_v32, %s8574_s21  ;;  %v783_v39 = vsel %vm780_vm4, %v771_v36, %v773_v14  ;;  %1114 = vmatprep.mubr.bf16.mxu1 %v8565_v1 }
 0x186   : > { %2583 = vrot.lane.b32.xlu1 %v8805_v49, %s8574_s21  ;;  %7841 = vmatprep.subr.msk.bf16.mxu1 %vm827_vm2, %v783_v39  ;;  %v1024_v41 = vsel %vm827_vm2, %v782_v37, 0 }
 0x187   : > { %1083 = vmatpush1.bf16.msra.mxu1 %v1024_v41  ;;  %v777_v42 = vpop.permute.xlu0 %776 }
 0x188   : > { %v775_v30 = vpop.permute.xlu1 %774 }
 0x189   : > { %v784_v44 = vsel %vm780_vm4, %v773_v14, %v775_v30  ;;  %2809 = vrot.lane.b32.xlu0 %v8778_v29, %s8575_s24  ;;  %v785_v45 = vsel %vm780_vm4, %v775_v30, %v777_v42 }
 0x18a   : > { %2587 = vrot.lane.b32.xlu1 %v8812_v33, %s8574_s21  ;;  %7840 = vmatmul.mubr.msk.bf16.vlgmr.msra.gmra.mrb[8].mxu0 %vm823_vm3, %v792_v43  ;;  %v1030_v50 = vsel %vm827_vm2, %v784_v44, 0  ;;  %s8588_s21 = smov 27  }
 0x18b   : > { %7842 = vmatmul.mubr.msk.bf16.vlgmr.msra.gmra.mrb[8].mxu1 %vm823_vm3, %v792_v43  ;;  %7843 = vmatprep.subr.msk.bf16.mxu0 %vm827_vm2, %v785_v45  ;;  %v1214_v51 = vpop.permute.xlu0 %1213  ;;  %v7856_v45 = vld [vmem:[%s10410_s5 + $0xc] sm:$0xf] }
 0x18c   : > { %1124 = vmatpush1.bf16.msra.mxu0 %v1030_v50  ;;  %v779_v53 = vpop.permute.xlu1 %778  ;;  %1155 = vmatprep.mubr.bf16.mxu0 %v8565_v1 }
 0x18d   : > { %v786_v54 = vsel %vm780_vm4, %v777_v42, %v779_v53  ;;  %2801 = vrot.lane.b32.xlu0 %v8798_v48, %s8575_s24  ;;  %v787_v56 = vsel %vm780_vm4, %v779_v53, %v758_v22  ;;  %1196 = vmatprep.mubr.bf16.mxu1 %v8565_v1  ;;  %vm4158_vm4 = vcmask 973824  }
 0x18e   : > { %2803 = vrot.lane.b32.xlu1 %v8757_v0, %s8575_s24  ;;  %7845 = vmatprep.subr.msk.bf16.mxu1 %vm827_vm2, %v787_v56  ;;  %v1036_v57 = vsel %vm827_vm2, %v786_v54, 0 }
 0x18f   : > { %1165 = vmatpush1.bf16.msra.mxu1 %v1036_v57  ;;  %v1206_v58 = vpop.permute.xlu0 %1205 }
 0x190   : > { %v1208_v60 = vpop.permute.xlu1 %1207 }
 0x191   : > { %v1232_v61 = vsel %vm1221_vm5, %v1206_v58, %v1208_v60  ;;  %3033 = vrot.lane.b32.xlu0 %v8761_v8, %s8576_s27  ;;  %v1222_v62 = vsel %vm1221_vm5, %v1208_v60, %v1210_v34 }
 0x192   : > { %2807 = vrot.lane.b32.xlu1 %v8772_v31, %s8575_s24  ;;  %7844 = vmatmul.mubr.msk.bf16.vlgmr.msra.gmra.mrb[12].mxu0 %vm823_vm3, %v792_v43  ;;  %v1238_v63 = vsel %vm827_vm2, %v1232_v61, 0 }
 0x193   : > { %7846 = vmatmul.mubr.msk.bf16.vlgmr.msra.gmra.mrb[12].mxu1 %vm823_vm3, %v792_v43  ;;  %7848 = vmatprep.subr.msk.bf16.mxu0 %vm827_vm2, %v1222_v62  ;;  %v1438_v2 = vpop.permute.xlu0 %1437 }
 0x194   : > { %1262 = vmatpush1.bf16.msra.mxu0 %v1238_v63  ;;  %v1212_v3 = vpop.permute.xlu1 %1211  ;;  %1293 = vmatprep.mubr.bf16.mxu0 %v8565_v1 }
 0x195   : > { %v1223_v4 = vsel %vm1221_vm5, %v1210_v34, %v1212_v3  ;;  %2813 = vrot.lane.b32.xlu0 %v8803_v32, %s8575_s24  ;;  %v1224_v5 = vsel %vm1221_vm5, %v1212_v3, %v1214_v51  ;;  %1334 = vmatprep.mubr.bf16.mxu1 %v8565_v1 }
 0x196   : > { %2811 = vrot.lane.b32.xlu1 %v8805_v49, %s8575_s24  ;;  %7850 = vmatprep.subr.msk.bf16.mxu1 %vm827_vm2, %v1224_v5  ;;  %v1244_v7 = vsel %vm827_vm2, %v1223_v4, 0 }
 0x197   : > { %1303 = vmatpush1.bf16.msra.mxu1 %v1244_v7  ;;  %v1218_v9 = vpop.permute.xlu0 %1217 }
 0x198   : > { %v1216_v13 = vpop.permute.xlu1 %1215 }
 0x199   : > { %v1225_v14 = vsel %vm1221_vm5, %v1214_v51, %v1216_v13  ;;  %3037 = vrot.lane.b32.xlu0 %v8778_v29, %s8576_s27  ;;  %v1226_v15 = vsel %vm1221_vm5, %v1216_v13, %v1218_v9 }
 0x19a   : > { %2815 = vrot.lane.b32.xlu1 %v8812_v33, %s8575_s24  ;;  %7849 = vmatmul.mubr.msk.bf16.vlgmr.msra.gmra.mrb[8].mxu0 %vm823_vm3, %v7847_v12  ;;  %v1250_v17 = vsel %vm827_vm2, %v1225_v14, 0  ;;  %s8589_s24 = smov 19  }
 0x19b   : > { %7851 = vmatmul.mubr.msk.bf16.vlgmr.msra.gmra.mrb[8].mxu1 %vm823_vm3, %v7847_v12  ;;  %7852 = vmatprep.subr.msk.bf16.mxu0 %vm827_vm2, %v1226_v15  ;;  %v1442_v18 = vpop.permute.xlu0 %1441  ;;  %v7865_v15 = vld [vmem:[%s10410_s5 + $0x10] sm:$0xf] }
 0x19c   : > { %1344 = vmatpush1.bf16.msra.mxu0 %v1250_v17  ;;  %v1220_v19 = vpop.permute.xlu1 %1219  ;;  %1375 = vmatprep.mubr.bf16.mxu0 %v8565_v1 }
 0x19d   : > { %v1227_v22 = vsel %vm1221_vm5, %v1218_v9, %v1220_v19  ;;  %3029 = vrot.lane.b32.xlu0 %v8798_v48, %s8576_s27  ;;  %v1228_v23 = vsel %vm1221_vm5, %v1220_v19, %v1206_v58  ;;  %1416 = vmatprep.mubr.bf16.mxu1 %v8565_v1  ;;  %vm4386_vm5 = vcmask 965632  }
 0x19e   : > { %3031 = vrot.lane.b32.xlu1 %v8757_v0, %s8576_s27  ;;  %7854 = vmatprep.subr.msk.bf16.mxu1 %vm827_vm2, %v1228_v23  ;;  %v1256_v24 = vsel %vm827_vm2, %v1227_v22, 0 }
 0x19f   : > { %1385 = vmatpush1.bf16.msra.mxu1 %v1256_v24  ;;  %v1434_v26 = vpop.permute.xlu0 %1433 }
 0x1a0   : > { %v1436_v28 = vpop.permute.xlu1 %1435 }
 0x1a1   : > { %v1460_v34 = vsel %vm1449_vm6, %v1434_v26, %v1436_v28  ;;  %3261 = vrot.lane.b32.xlu0 %v8761_v8, %s8577_s16  ;;  %v1450_v36 = vsel %vm1449_vm6, %v1436_v28, %v1438_v2 }
 0x1a2   : > { %3035 = vrot.lane.b32.xlu1 %v8772_v31, %s8576_s27  ;;  %7853 = vmatmul.mubr.msk.bf16.vlgmr.msra.gmra.mrb[12].mxu0 %vm823_vm3, %v7847_v12  ;;  %v1466_v37 = vsel %vm827_vm2, %v1460_v34, 0 }
 0x1a3   : > { %7855 = vmatmul.mubr.msk.bf16.vlgmr.msra.gmra.mrb[12].mxu1 %vm823_vm3, %v7847_v12  ;;  %7857 = vmatprep.subr.msk.bf16.mxu0 %vm827_vm2, %v1450_v36  ;;  %v1666_v39 = vpop.permute.xlu0 %1665 }
 0x1a4   : > { %1490 = vmatpush1.bf16.msra.mxu0 %v1466_v37  ;;  %v1440_v41 = vpop.permute.xlu1 %1439  ;;  %1521 = vmatprep.mubr.bf16.mxu0 %v8565_v1 }
 0x1a5   : > { %v1451_v42 = vsel %vm1449_vm6, %v1438_v2, %v1440_v41  ;;  %3041 = vrot.lane.b32.xlu0 %v8803_v32, %s8576_s27  ;;  %v1452_v43 = vsel %vm1449_vm6, %v1440_v41, %v1442_v18  ;;  %1562 = vmatprep.mubr.bf16.mxu1 %v8565_v1 }
 0x1a6   : > { %3039 = vrot.lane.b32.xlu1 %v8805_v49, %s8576_s27  ;;  %7859 = vmatprep.subr.msk.bf16.mxu1 %vm827_vm2, %v1452_v43  ;;  %v1472_v30 = vsel %vm827_vm2, %v1451_v42, 0 }
 0x1a7   : > { %1531 = vmatpush1.bf16.msra.mxu1 %v1472_v30  ;;  %v1446_v44 = vpop.permute.xlu0 %1445 }
 0x1a8   : > { %v1444_v50 = vpop.permute.xlu1 %1443 }
 0x1a9   : > { %v1453_v51 = vsel %vm1449_vm6, %v1442_v18, %v1444_v50  ;;  %3265 = vrot.lane.b32.xlu0 %v8778_v29, %s8577_s16  ;;  %v1454_v53 = vsel %vm1449_vm6, %v1444_v50, %v1446_v44 }
 0x1aa   : > { %3043 = vrot.lane.b32.xlu1 %v8812_v33, %s8576_s27  ;;  %7858 = vmatmul.mubr.msk.bf16.vlgmr.msra.gmra.mrb[8].mxu0 %vm823_vm3, %v7856_v45  ;;  %v1478_v54 = vsel %vm827_vm2, %v1453_v51, 0  ;;  %s8590_s27 = smov 18  }
 0x1ab   : > { %7860 = vmatmul.mubr.msk.bf16.vlgmr.msra.gmra.mrb[8].mxu1 %vm823_vm3, %v7856_v45  ;;  %7861 = vmatprep.subr.msk.bf16.mxu0 %vm827_vm2, %v1454_v53  ;;  %v1670_v56 = vpop.permute.xlu0 %1669  ;;  %v7874_v53 = vld [vmem:[%s10410_s5 + $0x14] sm:$0xf] }
 0x1ac   : > { %1572 = vmatpush1.bf16.msra.mxu0 %v1478_v54  ;;  %v1448_v57 = vpop.permute.xlu1 %1447  ;;  %1603 = vmatprep.mubr.bf16.mxu0 %v8565_v1 }
 0x1ad   : > { %v1455_v58 = vsel %vm1449_vm6, %v1446_v44, %v1448_v57  ;;  %3257 = vrot.lane.b32.xlu0 %v8798_v48, %s8577_s16  ;;  %v1456_v60 = vsel %vm1449_vm6, %v1448_v57, %v1434_v26  ;;  %1644 = vmatprep.mubr.bf16.mxu1 %v8565_v1  ;;  %vm4614_vm6 = vcmask 957440  }
 0x1ae   : > { %3259 = vrot.lane.b32.xlu1 %v8757_v0, %s8577_s16  ;;  %7863 = vmatprep.subr.msk.bf16.mxu1 %vm827_vm2, %v1456_v60  ;;  %v1484_v61 = vsel %vm827_vm2, %v1455_v58, 0 }
 0x1af   : > { %1613 = vmatpush1.bf16.msra.mxu1 %v1484_v61  ;;  %v1662_v62 = vpop.permute.xlu0 %1661 }
 0x1b0   : > { %v1664_v63 = vpop.permute.xlu1 %1663 }
 0x1b1   : > { %v1688_v2 = vsel %vm1677_vm7, %v1662_v62, %v1664_v63  ;;  %3489 = vrot.lane.b32.xlu0 %v8761_v8, %s8578_s19  ;;  %v1678_v3 = vsel %vm1677_vm7, %v1664_v63, %v1666_v39 }
 0x1b2   : > { %3263 = vrot.lane.b32.xlu1 %v8772_v31, %s8577_s16  ;;  %7862 = vmatmul.mubr.msk.bf16.vlgmr.msra.gmra.mrb[12].mxu0 %vm823_vm3, %v7856_v45  ;;  %v1694_v4 = vsel %vm827_vm2, %v1688_v2, 0 }
 0x1b3   : > { %7864 = vmatmul.mubr.msk.bf16.vlgmr.msra.gmra.mrb[12].mxu1 %vm823_vm3, %v7856_v45  ;;  %7866 = vmatprep.subr.msk.bf16.mxu0 %vm827_vm2, %v1678_v3  ;;  %v1894_v5 = vpop.permute.xlu0 %1893 }
 0x1b4   : > { %1718 = vmatpush1.bf16.msra.mxu0 %v1694_v4  ;;  %v1668_v7 = vpop.permute.xlu1 %1667  ;;  %1749 = vmatprep.mubr.bf16.mxu0 %v8565_v1 }
 0x1b5   : > { %v1679_v9 = vsel %vm1677_vm7, %v1666_v39, %v1668_v7  ;;  %3269 = vrot.lane.b32.xlu0 %v8803_v32, %s8577_s16  ;;  %v1680_v12 = vsel %vm1677_vm7, %v1668_v7, %v1670_v56  ;;  %1790 = vmatprep.mubr.bf16.mxu1 %v8565_v1 }
 0x1b6   : > { %3267 = vrot.lane.b32.xlu1 %v8805_v49, %s8577_s16  ;;  %7868 = vmatprep.subr.msk.bf16.mxu1 %vm827_vm2, %v1680_v12  ;;  %v1700_v13 = vsel %vm827_vm2, %v1679_v9, 0 }
 0x1b7   : > { %1759 = vmatpush1.bf16.msra.mxu1 %v1700_v13  ;;  %v1674_v14 = vpop.permute.xlu0 %1673 }
 0x1b8   : > { %v1672_v17 = vpop.permute.xlu1 %1671 }
 0x1b9   : > { %v1681_v18 = vsel %vm1677_vm7, %v1670_v56, %v1672_v17  ;;  %3485 = vrot.lane.b32.xlu0 %v8798_v48, %s8578_s19  ;;  %v1682_v19 = vsel %vm1677_vm7, %v1672_v17, %v1674_v14 }
 0x1ba   : > { %3271 = vrot.lane.b32.xlu1 %v8812_v33, %s8577_s16  ;;  %7867 = vmatmul.mubr.msk.bf16.vlgmr.msra.gmra.mrb[8].mxu0 %vm823_vm3, %v7865_v15  ;;  %v1706_v22 = vsel %vm827_vm2, %v1681_v18, 0  ;;  %s8591_s16 = smov 17  }
 0x1bb   : > { %7869 = vmatmul.mubr.msk.bf16.vlgmr.msra.gmra.mrb[8].mxu1 %vm823_vm3, %v7865_v15  ;;  %7870 = vmatprep.subr.msk.bf16.mxu0 %vm827_vm2, %v1682_v19  ;;  %v1898_v23 = vpop.permute.xlu0 %1897  ;;  %v7883_v19 = vld [vmem:[%s10410_s5 + $0x18] sm:$0xf] }
 0x1bc   : > { %1800 = vmatpush1.bf16.msra.mxu0 %v1706_v22  ;;  %v1676_v24 = vpop.permute.xlu1 %1675  ;;  %1831 = vmatprep.mubr.bf16.mxu0 %v8565_v1 }
 0x1bd   : > { %v1683_v26 = vsel %vm1677_vm7, %v1674_v14, %v1676_v24  ;;  %3493 = vrot.lane.b32.xlu0 %v8778_v29, %s8578_s19  ;;  %v1684_v28 = vsel %vm1677_vm7, %v1676_v24, %v1662_v62  ;;  %1872 = vmatprep.mubr.bf16.mxu1 %v8565_v1  ;;  %vm4842_vm7 = vcmask 318464  }
 0x1be   : > { %3487 = vrot.lane.b32.xlu1 %v8757_v0, %s8578_s19  ;;  %7872 = vmatprep.subr.msk.bf16.mxu1 %vm827_vm2, %v1684_v28  ;;  %v1712_v34 = vsel %vm827_vm2, %v1683_v26, 0 }
 0x1bf   : > { %1841 = vmatpush1.bf16.msra.mxu1 %v1712_v34  ;;  %v1890_v36 = vpop.permute.xlu0 %1889 }
 0x1c0   : > { %v1892_v37 = vpop.permute.xlu1 %1891 }
 0x1c1   : > { %v1916_v39 = vsel %vm1905_vm8, %v1890_v36, %v1892_v37  ;;  %3497 = vrot.lane.b32.xlu0 %v8803_v32, %s8578_s19  ;;  %v1906_v41 = vsel %vm1905_vm8, %v1892_v37, %v1894_v5 }
 0x1c2   : > { %3491 = vrot.lane.b32.xlu1 %v8772_v31, %s8578_s19  ;;  %7871 = vmatmul.mubr.msk.bf16.vlgmr.msra.gmra.mrb[12].mxu0 %vm823_vm3, %v7865_v15  ;;  %v1922_v42 = vsel %vm827_vm2, %v1916_v39, 0 }
 0x1c3   : > { %7873 = vmatmul.mubr.msk.bf16.vlgmr.msra.gmra.mrb[12].mxu1 %vm823_vm3, %v7865_v15  ;;  %7875 = vmatprep.subr.msk.bf16.mxu0 %vm827_vm2, %v1906_v41  ;;  %v2122_v43 = vpop.permute.xlu0 %2121 }
 0x1c4   : > { %1946 = vmatpush1.bf16.msra.mxu0 %v1922_v42  ;;  %v1896_v30 = vpop.permute.xlu1 %1895  ;;  %1977 = vmatprep.mubr.bf16.mxu0 %v8565_v1 }
 0x1c5   : > { %v1907_v44 = vsel %vm1905_vm8, %v1894_v5, %v1896_v30  ;;  %3914 = vrot.lane.b32.xlu0 %v8757_v0, %s8579_s22  ;;  %v1908_v45 = vsel %vm1905_vm8, %v1896_v30, %v1898_v23  ;;  %2018 = vmatprep.mubr.bf16.mxu1 %v8565_v1 }
 0x1c6   : > { %3495 = vrot.lane.b32.xlu1 %v8805_v49, %s8578_s19  ;;  %7877 = vmatprep.subr.msk.bf16.mxu1 %vm827_vm2, %v1908_v45  ;;  %v1928_v50 = vsel %vm827_vm2, %v1907_v44, 0 }
 0x1c7   : > { %1987 = vmatpush1.bf16.msra.mxu1 %v1928_v50  ;;  %v1902_v51 = vpop.permute.xlu0 %1901 }
 0x1c8   : > { %v1900_v54 = vpop.permute.xlu1 %1899 }
 0x1c9   : > { %v1909_v56 = vsel %vm1905_vm8, %v1898_v23, %v1900_v54  ;;  %3918 = vrot.lane.b32.xlu0 %v8772_v31, %s8579_s22  ;;  %v1910_v57 = vsel %vm1905_vm8, %v1900_v54, %v1902_v51 }
 0x1ca   : > { %3499 = vrot.lane.b32.xlu1 %v8812_v33, %s8578_s19  ;;  %7876 = vmatmul.mubr.msk.bf16.vlgmr.msra.gmra.mrb[8].mxu0 %vm823_vm3, %v7874_v53  ;;  %v1934_v58 = vsel %vm827_vm2, %v1909_v56, 0 }
 0x1cb   : > { %7878 = vmatmul.mubr.msk.bf16.vlgmr.msra.gmra.mrb[8].mxu1 %vm823_vm3, %v7874_v53  ;;  %7879 = vmatprep.subr.msk.bf16.mxu0 %vm827_vm2, %v1910_v57  ;;  %v2126_v60 = vpop.permute.xlu0 %2125  ;;  %v7892_v57 = vld [vmem:[%s10410_s5 + $0x1c] sm:$0xf] }
 0x1cc   : > { %2028 = vmatpush1.bf16.msra.mxu0 %v1934_v58  ;;  %v1904_v61 = vpop.permute.xlu1 %1903  ;;  %2059 = vmatprep.mubr.bf16.mxu0 %v8565_v1 }
 0x1cd   : > { %v1911_v62 = vsel %vm1905_vm8, %v1902_v51, %v1904_v61  ;;  %3922 = vrot.lane.b32.xlu0 %v8805_v49, %s8579_s22  ;;  %v1912_v63 = vsel %vm1905_vm8, %v1904_v61, %v1890_v36  ;;  %2100 = vmatprep.mubr.bf16.mxu1 %v8565_v1  ;;  %vm5070_vm8 = vcmask 310272  }
 0x1ce   : > { %3916 = vrot.lane.b32.xlu1 %v8761_v8, %s8579_s22  ;;  %7881 = vmatprep.subr.msk.bf16.mxu1 %vm827_vm2, %v1912_v63  ;;  %v1940_v2 = vsel %vm827_vm2, %v1911_v62, 0 }
 0x1cf   : > { %2069 = vmatpush1.bf16.msra.mxu1 %v1940_v2  ;;  %v2118_v3 = vpop.permute.xlu0 %2117 }
 0x1d0   : > { %v2120_v4 = vpop.permute.xlu1 %2119 }
 0x1d1   : > { %v2144_v5 = vsel %vm2133_vm9, %v2118_v3, %v2120_v4  ;;  %3926 = vrot.lane.b32.xlu0 %v8812_v33, %s8579_s22  ;;  %v2134_v7 = vsel %vm2133_vm9, %v2120_v4, %v2122_v43 }
 0x1d2   : > { %3920 = vrot.lane.b32.xlu1 %v8778_v29, %s8579_s22  ;;  %7880 = vmatmul.mubr.msk.bf16.vlgmr.msra.gmra.mrb[12].mxu0 %vm823_vm3, %v7874_v53  ;;  %v2150_v9 = vsel %vm827_vm2, %v2144_v5, 0 }
 0x1d3   : > { %7882 = vmatmul.mubr.msk.bf16.vlgmr.msra.gmra.mrb[12].mxu1 %vm823_vm3, %v7874_v53  ;;  %7884 = vmatprep.subr.msk.bf16.mxu0 %vm827_vm2, %v2134_v7  ;;  %v2350_v12 = vpop.permute.xlu0 %2349 }
 0x1d4   : > { %2174 = vmatpush1.bf16.msra.mxu0 %v2150_v9  ;;  %v2124_v13 = vpop.permute.xlu1 %2123  ;;  %2205 = vmatprep.mubr.bf16.mxu0 %v8565_v1 }
 0x1d5   : > { %v2135_v14 = vsel %vm2133_vm9, %v2122_v43, %v2124_v13  ;;  %4142 = vrot.lane.b32.xlu0 %v8757_v0, %s8580_s25  ;;  %v2136_v15 = vsel %vm2133_vm9, %v2124_v13, %v2126_v60  ;;  %2246 = vmatprep.mubr.bf16.mxu1 %v8565_v1 }
 0x1d6   : > { %3924 = vrot.lane.b32.xlu1 %v8803_v32, %s8579_s22  ;;  %7886 = vmatprep.subr.msk.bf16.mxu1 %vm827_vm2, %v2136_v15  ;;  %v2156_v17 = vsel %vm827_vm2, %v2135_v14, 0 }
 0x1d7   : > { %2215 = vmatpush1.bf16.msra.mxu1 %v2156_v17  ;;  %v2130_v18 = vpop.permute.xlu0 %2129 }
 0x1d8   : > { %v2128_v22 = vpop.permute.xlu1 %2127 }
 0x1d9   : > { %v2137_v23 = vsel %vm2133_vm9, %v2126_v60, %v2128_v22  ;;  %4146 = vrot.lane.b32.xlu0 %v8772_v31, %s8580_s25  ;;  %v2138_v24 = vsel %vm2133_vm9, %v2128_v22, %v2130_v18 }
 0x1da   : > { %3928 = vrot.lane.b32.xlu1 %v8798_v48, %s8579_s22  ;;  %7885 = vmatmul.mubr.msk.bf16.vlgmr.msra.gmra.mrb[8].mxu0 %vm823_vm3, %v7883_v19  ;;  %v2162_v26 = vsel %vm827_vm2, %v2137_v23, 0 }
 0x1db   : > { %7887 = vmatmul.mubr.msk.bf16.vlgmr.msra.gmra.mrb[8].mxu1 %vm823_vm3, %v7883_v19  ;;  %7888 = vmatprep.subr.msk.bf16.mxu0 %vm827_vm2, %v2138_v24  ;;  %v2354_v28 = vpop.permute.xlu0 %2353  ;;  %v7901_v24 = vld [vmem:[%s10410_s5 + $0x20] sm:$0xf] }
 0x1dc   : > { %2256 = vmatpush1.bf16.msra.mxu0 %v2162_v26  ;;  %v2132_v34 = vpop.permute.xlu1 %2131  ;;  %2287 = vmatprep.mubr.bf16.mxu0 %v8565_v1 }
 0x1dd   : > { %v2139_v36 = vsel %vm2133_vm9, %v2130_v18, %v2132_v34  ;;  %4150 = vrot.lane.b32.xlu0 %v8805_v49, %s8580_s25  ;;  %v2140_v37 = vsel %vm2133_vm9, %v2132_v34, %v2118_v3  ;;  %2328 = vmatprep.mubr.bf16.mxu1 %v8565_v1  ;;  %vm5298_vm9 = vcmask 302080  }
 0x1de   : > { %4144 = vrot.lane.b32.xlu1 %v8761_v8, %s8580_s25  ;;  %7890 = vmatprep.subr.msk.bf16.mxu1 %vm827_vm2, %v2140_v37  ;;  %v2168_v39 = vsel %vm827_vm2, %v2139_v36, 0 }
 0x1df   : > { %2297 = vmatpush1.bf16.msra.mxu1 %v2168_v39  ;;  %v2346_v41 = vpop.permute.xlu0 %2345 }
 0x1e0   : > { %v2348_v42 = vpop.permute.xlu1 %2347 }
 0x1e1   : > { %v2372_v43 = vsel %vm2361_vm10, %v2346_v41, %v2348_v42  ;;  %4154 = vrot.lane.b32.xlu0 %v8812_v33, %s8580_s25  ;;  %v2362_v30 = vsel %vm2361_vm10, %v2348_v42, %v2350_v12 }
 0x1e2   : > { %4148 = vrot.lane.b32.xlu1 %v8778_v29, %s8580_s25  ;;  %7889 = vmatmul.mubr.msk.bf16.vlgmr.msra.gmra.mrb[12].mxu0 %vm823_vm3, %v7883_v19  ;;  %v2378_v44 = vsel %vm827_vm2, %v2372_v43, 0 }
 0x1e3   : > { %7891 = vmatmul.mubr.msk.bf16.vlgmr.msra.gmra.mrb[12].mxu1 %vm823_vm3, %v7883_v19  ;;  %7893 = vmatprep.subr.msk.bf16.mxu0 %vm827_vm2, %v2362_v30  ;;  %v2578_v45 = vpop.permute.xlu0 %2577 }
 0x1e4   : > { %2402 = vmatpush1.bf16.msra.mxu0 %v2378_v44  ;;  %v2352_v50 = vpop.permute.xlu1 %2351  ;;  %2433 = vmatprep.mubr.bf16.mxu0 %v8565_v1 }
 0x1e5   : > { %v2363_v51 = vsel %vm2361_vm10, %v2350_v12, %v2352_v50  ;;  %4370 = vrot.lane.b32.xlu0 %v8757_v0, %s8581_s28  ;;  %v2364_v53 = vsel %vm2361_vm10, %v2352_v50, %v2354_v28  ;;  %2474 = vmatprep.mubr.bf16.mxu1 %v8565_v1 }
 0x1e6   : > { %4152 = vrot.lane.b32.xlu1 %v8803_v32, %s8580_s25  ;;  %7895 = vmatprep.subr.msk.bf16.mxu1 %vm827_vm2, %v2364_v53  ;;  %v2384_v54 = vsel %vm827_vm2, %v2363_v51, 0 }
 0x1e7   : > { %2443 = vmatpush1.bf16.msra.mxu1 %v2384_v54  ;;  %v2358_v56 = vpop.permute.xlu0 %2357 }
 0x1e8   : > { %v2356_v58 = vpop.permute.xlu1 %2355 }
 0x1e9   : > { %v2365_v60 = vsel %vm2361_vm10, %v2354_v28, %v2356_v58  ;;  %4374 = vrot.lane.b32.xlu0 %v8772_v31, %s8581_s28  ;;  %v2366_v61 = vsel %vm2361_vm10, %v2356_v58, %v2358_v56 }
 0x1ea   : > { %4156 = vrot.lane.b32.xlu1 %v8798_v48, %s8580_s25  ;;  %7894 = vmatmul.mubr.msk.bf16.vlgmr.msra.gmra.mrb[8].mxu0 %vm823_vm3, %v7892_v57  ;;  %v2390_v62 = vsel %vm827_vm2, %v2365_v60, 0  ;;  %s8099_s25 = sshll.u32 %s10423_s30, 8 }
 0x1eb   : > { %7896 = vmatmul.mubr.msk.bf16.vlgmr.msra.gmra.mrb[8].mxu1 %vm823_vm3, %v7892_v57  ;;  %7897 = vmatprep.subr.msk.bf16.mxu0 %vm827_vm2, %v2366_v61  ;;  %v2582_v63 = vpop.permute.xlu0 %2581  ;;  %v7910_v61 = vld [vmem:[%s10410_s5 + $0x24] sm:$0xf] }
 0x1ec   : > { %2484 = vmatpush1.bf16.msra.mxu0 %v2390_v62  ;;  %v2360_v2 = vpop.permute.xlu1 %2359  ;;  %2515 = vmatprep.mubr.bf16.mxu0 %v8565_v1 }
 0x1ed   : > { %v2367_v3 = vsel %vm2361_vm10, %v2358_v56, %v2360_v2  ;;  %4378 = vrot.lane.b32.xlu0 %v8805_v49, %s8581_s28  ;;  %v2368_v4 = vsel %vm2361_vm10, %v2360_v2, %v2346_v41  ;;  %2556 = vmatprep.mubr.bf16.mxu1 %v8565_v1  ;;  %vm5526_vm10 = vcmask 236544  }
 0x1ee   : > { %4372 = vrot.lane.b32.xlu1 %v8761_v8, %s8581_s28  ;;  %7899 = vmatprep.subr.msk.bf16.mxu1 %vm827_vm2, %v2368_v4  ;;  %v2396_v5 = vsel %vm827_vm2, %v2367_v3, 0 }
 0x1ef   : > { %2525 = vmatpush1.bf16.msra.mxu1 %v2396_v5  ;;  %v2574_v7 = vpop.permute.xlu0 %2573 }
 0x1f0   : > { %v2576_v9 = vpop.permute.xlu1 %2575 }
 0x1f1   : > { %v2600_v12 = vsel %vm2589_vm11, %v2574_v7, %v2576_v9  ;;  %4382 = vrot.lane.b32.xlu0 %v8812_v33, %s8581_s28  ;;  %v2590_v13 = vsel %vm2589_vm11, %v2576_v9, %v2578_v45 }
 0x1f2   : > { %4376 = vrot.lane.b32.xlu1 %v8778_v29, %s8581_s28  ;;  %7898 = vmatmul.mubr.msk.bf16.vlgmr.msra.gmra.mrb[12].mxu0 %vm823_vm3, %v7892_v57  ;;  %v2606_v14 = vsel %vm827_vm2, %v2600_v12, 0 }
 0x1f3   : > { %7900 = vmatmul.mubr.msk.bf16.vlgmr.msra.gmra.mrb[12].mxu1 %vm823_vm3, %v7892_v57  ;;  %7902 = vmatprep.subr.msk.bf16.mxu0 %vm827_vm2, %v2590_v13  ;;  %v2806_v15 = vpop.permute.xlu0 %2805 }
 0x1f4   : > { %2630 = vmatpush1.bf16.msra.mxu0 %v2606_v14  ;;  %v2580_v17 = vpop.permute.xlu1 %2579  ;;  %2661 = vmatprep.mubr.bf16.mxu0 %v8565_v1 }
 0x1f5   : > { %v2591_v18 = vsel %vm2589_vm11, %v2578_v45, %v2580_v17  ;;  %4598 = vrot.lane.b32.xlu0 %v8757_v0, %s8582_s17  ;;  %v2592_v19 = vsel %vm2589_vm11, %v2580_v17, %v2582_v63  ;;  %2702 = vmatprep.mubr.bf16.mxu1 %v8565_v1 }
 0x1f6   : > { %4380 = vrot.lane.b32.xlu1 %v8803_v32, %s8581_s28  ;;  %7904 = vmatprep.subr.msk.bf16.mxu1 %vm827_vm2, %v2592_v19  ;;  %v2612_v22 = vsel %vm827_vm2, %v2591_v18, 0 }
 0x1f7   : > { %2671 = vmatpush1.bf16.msra.mxu1 %v2612_v22  ;;  %v2586_v23 = vpop.permute.xlu0 %2585 }
 0x1f8   : > { %v2584_v26 = vpop.permute.xlu1 %2583 }
 0x1f9   : > { %v2593_v28 = vsel %vm2589_vm11, %v2582_v63, %v2584_v26  ;;  %4602 = vrot.lane.b32.xlu0 %v8772_v31, %s8582_s17  ;;  %v2594_v34 = vsel %vm2589_vm11, %v2584_v26, %v2586_v23 }
 0x1fa   : > { %4384 = vrot.lane.b32.xlu1 %v8798_v48, %s8581_s28  ;;  %7903 = vmatmul.mubr.msk.bf16.vlgmr.msra.gmra.mrb[8].mxu0 %vm823_vm3, %v7901_v24  ;;  %v2618_v36 = vsel %vm827_vm2, %v2593_v28, 0 }
 0x1fb   : > { %7905 = vmatmul.mubr.msk.bf16.vlgmr.msra.gmra.mrb[8].mxu1 %vm823_vm3, %v7901_v24  ;;  %7906 = vmatprep.subr.msk.bf16.mxu0 %vm827_vm2, %v2594_v34  ;;  %v2810_v37 = vpop.permute.xlu0 %2809  ;;  %v7919_v34 = vld [vmem:[%s10410_s5 + $0x28] sm:$0xf] }
 0x1fc   : > { %2712 = vmatpush1.bf16.msra.mxu0 %v2618_v36  ;;  %v2588_v39 = vpop.permute.xlu1 %2587  ;;  %2743 = vmatprep.mubr.bf16.mxu0 %v8565_v1 }
 0x1fd   : > { %v2595_v41 = vsel %vm2589_vm11, %v2586_v23, %v2588_v39  ;;  %4606 = vrot.lane.b32.xlu0 %v8805_v49, %s8582_s17  ;;  %v2596_v42 = vsel %vm2589_vm11, %v2588_v39, %v2574_v7  ;;  %2784 = vmatprep.mubr.bf16.mxu1 %v8565_v1  ;;  %vm5754_vm11 = vcmask 228352  }
 0x1fe   : > { %4600 = vrot.lane.b32.xlu1 %v8761_v8, %s8582_s17  ;;  %7908 = vmatprep.subr.msk.bf16.mxu1 %vm827_vm2, %v2596_v42  ;;  %v2624_v43 = vsel %vm827_vm2, %v2595_v41, 0 }
 0x1ff   : > { %2753 = vmatpush1.bf16.msra.mxu1 %v2624_v43  ;;  %v2802_v30 = vpop.permute.xlu0 %2801 }
 0x200   : > { %v2804_v44 = vpop.permute.xlu1 %2803 }
 0x201   : > { %v2828_v45 = vsel %vm2817_vm12, %v2802_v30, %v2804_v44  ;;  %4610 = vrot.lane.b32.xlu0 %v8812_v33, %s8582_s17  ;;  %v2818_v50 = vsel %vm2817_vm12, %v2804_v44, %v2806_v15 }
 0x202   : > { %4604 = vrot.lane.b32.xlu1 %v8778_v29, %s8582_s17  ;;  %7907 = vmatmul.mubr.msk.bf16.vlgmr.msra.gmra.mrb[12].mxu0 %vm823_vm3, %v7901_v24  ;;  %v2834_v51 = vsel %vm827_vm2, %v2828_v45, 0 }
 0x203   : > { %7909 = vmatmul.mubr.msk.bf16.vlgmr.msra.gmra.mrb[12].mxu1 %vm823_vm3, %v7901_v24  ;;  %7911 = vmatprep.subr.msk.bf16.mxu0 %vm827_vm2, %v2818_v50  ;;  %v3034_v53 = vpop.permute.xlu0 %3033 }
 0x204   : > { %2858 = vmatpush1.bf16.msra.mxu0 %v2834_v51  ;;  %v2808_v54 = vpop.permute.xlu1 %2807  ;;  %2889 = vmatprep.mubr.bf16.mxu0 %v8565_v1 }
 0x205   : > { %v2819_v56 = vsel %vm2817_vm12, %v2806_v15, %v2808_v54  ;;  %4826 = vrot.lane.b32.xlu0 %v8757_v0, %s8583_s20  ;;  %v2820_v57 = vsel %vm2817_vm12, %v2808_v54, %v2810_v37  ;;  %2930 = vmatprep.mubr.bf16.mxu1 %v8565_v1 }
 0x206   : > { %4608 = vrot.lane.b32.xlu1 %v8803_v32, %s8582_s17  ;;  %7913 = vmatprep.subr.msk.bf16.mxu1 %vm827_vm2, %v2820_v57  ;;  %v2840_v58 = vsel %vm827_vm2, %v2819_v56, 0 }
 0x207   : > { %2899 = vmatpush1.bf16.msra.mxu1 %v2840_v58  ;;  %v2814_v60 = vpop.permute.xlu0 %2813 }
 0x208   : > { %v2812_v62 = vpop.permute.xlu1 %2811 }
 0x209   : > { %v2821_v63 = vsel %vm2817_vm12, %v2810_v37, %v2812_v62  ;;  %4830 = vrot.lane.b32.xlu0 %v8772_v31, %s8583_s20  ;;  %v2822_v2 = vsel %vm2817_vm12, %v2812_v62, %v2814_v60 }
 0x20a   : > { %4612 = vrot.lane.b32.xlu1 %v8798_v48, %s8582_s17  ;;  %7912 = vmatmul.mubr.msk.bf16.vlgmr.msra.gmra.mrb[8].mxu0 %vm823_vm3, %v7910_v61  ;;  %v2846_v3 = vsel %vm827_vm2, %v2821_v63, 0 }
 0x20b   : > { %7914 = vmatmul.mubr.msk.bf16.vlgmr.msra.gmra.mrb[8].mxu1 %vm823_vm3, %v7910_v61  ;;  %7915 = vmatprep.subr.msk.bf16.mxu0 %vm827_vm2, %v2822_v2  ;;  %v3038_v4 = vpop.permute.xlu0 %3037  ;;  %v7928_v2 = vld [vmem:[%s10410_s5 + $0x2c] sm:$0xf] }
 0x20c   : > { %2940 = vmatpush1.bf16.msra.mxu0 %v2846_v3  ;;  %v2816_v5 = vpop.permute.xlu1 %2815  ;;  %2971 = vmatprep.mubr.bf16.mxu0 %v8565_v1 }
 0x20d   : > { %v2823_v7 = vsel %vm2817_vm12, %v2814_v60, %v2816_v5  ;;  %4834 = vrot.lane.b32.xlu0 %v8805_v49, %s8583_s20  ;;  %v2824_v9 = vsel %vm2817_vm12, %v2816_v5, %v2802_v30  ;;  %3012 = vmatprep.mubr.bf16.mxu1 %v8565_v1  ;;  %vm5982_vm12 = vcmask 220160  }
 0x20e   : > { %4828 = vrot.lane.b32.xlu1 %v8761_v8, %s8583_s20  ;;  %7917 = vmatprep.subr.msk.bf16.mxu1 %vm827_vm2, %v2824_v9  ;;  %v2852_v12 = vsel %vm827_vm2, %v2823_v7, 0 }
 0x20f   : > { %2981 = vmatpush1.bf16.msra.mxu1 %v2852_v12  ;;  %v3030_v13 = vpop.permute.xlu0 %3029 }
 0x210   : > { %v3032_v14 = vpop.permute.xlu1 %3031 }
 0x211   : > { %v3056_v15 = vsel %vm3045_vm13, %v3030_v13, %v3032_v14  ;;  %4838 = vrot.lane.b32.xlu0 %v8812_v33, %s8583_s20  ;;  %v3046_v17 = vsel %vm3045_vm13, %v3032_v14, %v3034_v53 }
 0x212   : > { %4832 = vrot.lane.b32.xlu1 %v8778_v29, %s8583_s20  ;;  %7916 = vmatmul.mubr.msk.bf16.vlgmr.msra.gmra.mrb[12].mxu0 %vm823_vm3, %v7910_v61  ;;  %v3062_v18 = vsel %vm827_vm2, %v3056_v15, 0 }
 0x213   : > { %7918 = vmatmul.mubr.msk.bf16.vlgmr.msra.gmra.mrb[12].mxu1 %vm823_vm3, %v7910_v61  ;;  %7920 = vmatprep.subr.msk.bf16.mxu0 %vm827_vm2, %v3046_v17  ;;  %v3262_v19 = vpop.permute.xlu0 %3261 }
 0x214   : > { %3086 = vmatpush1.bf16.msra.mxu0 %v3062_v18  ;;  %v3036_v22 = vpop.permute.xlu1 %3035  ;;  %3117 = vmatprep.mubr.bf16.mxu0 %v8565_v1 }
 0x215   : > { %v3047_v23 = vsel %vm3045_vm13, %v3034_v53, %v3036_v22  ;;  %5054 = vrot.lane.b32.xlu0 %v8757_v0, %s8584_s23  ;;  %v3048_v24 = vsel %vm3045_vm13, %v3036_v22, %v3038_v4  ;;  %3158 = vmatprep.mubr.bf16.mxu1 %v8565_v1 }
 0x216   : > { %4836 = vrot.lane.b32.xlu1 %v8803_v32, %s8583_s20  ;;  %7922 = vmatprep.subr.msk.bf16.mxu1 %vm827_vm2, %v3048_v24  ;;  %v3068_v26 = vsel %vm827_vm2, %v3047_v23, 0 }
 0x217   : > { %3127 = vmatpush1.bf16.msra.mxu1 %v3068_v26  ;;  %v3042_v28 = vpop.permute.xlu0 %3041 }
 0x218   : > { %v3040_v36 = vpop.permute.xlu1 %3039 }
 0x219   : > { %v3049_v37 = vsel %vm3045_vm13, %v3038_v4, %v3040_v36  ;;  %5058 = vrot.lane.b32.xlu0 %v8772_v31, %s8584_s23  ;;  %v3050_v39 = vsel %vm3045_vm13, %v3040_v36, %v3042_v28 }
 0x21a   : > { %4840 = vrot.lane.b32.xlu1 %v8798_v48, %s8583_s20  ;;  %7921 = vmatmul.mubr.msk.bf16.vlgmr.msra.gmra.mrb[8].mxu0 %vm823_vm3, %v7919_v34  ;;  %v3074_v41 = vsel %vm827_vm2, %v3049_v37, 0 }
 0x21b   : > { %7923 = vmatmul.mubr.msk.bf16.vlgmr.msra.gmra.mrb[8].mxu1 %vm823_vm3, %v7919_v34  ;;  %7924 = vmatprep.subr.msk.bf16.mxu0 %vm827_vm2, %v3050_v39  ;;  %v3266_v42 = vpop.permute.xlu0 %3265  ;;  %v7937_v39 = vld [vmem:[%s10410_s5 + $0x30] sm:$0xf] }
 0x21c   : > { %3168 = vmatpush1.bf16.msra.mxu0 %v3074_v41  ;;  %v3044_v43 = vpop.permute.xlu1 %3043  ;;  %3199 = vmatprep.mubr.bf16.mxu0 %v8565_v1 }
 0x21d   : > { %v3051_v30 = vsel %vm3045_vm13, %v3042_v28, %v3044_v43  ;;  %5062 = vrot.lane.b32.xlu0 %v8805_v49, %s8584_s23  ;;  %v3052_v44 = vsel %vm3045_vm13, %v3044_v43, %v3030_v13  ;;  %3240 = vmatprep.mubr.bf16.mxu1 %v8565_v1  ;;  %vm6210_vm13 = vcmask 154624  }
 0x21e   : > { %5056 = vrot.lane.b32.xlu1 %v8761_v8, %s8584_s23  ;;  %7926 = vmatprep.subr.msk.bf16.mxu1 %vm827_vm2, %v3052_v44  ;;  %v3080_v45 = vsel %vm827_vm2, %v3051_v30, 0 }
 0x21f   : > { %3209 = vmatpush1.bf16.msra.mxu1 %v3080_v45  ;;  %v3258_v50 = vpop.permute.xlu0 %3257 }
 0x220   : > { %v3260_v51 = vpop.permute.xlu1 %3259 }
 0x221   : > { %v3284_v53 = vsel %vm3273_vm14, %v3258_v50, %v3260_v51  ;;  %5066 = vrot.lane.b32.xlu0 %v8812_v33, %s8584_s23  ;;  %v3274_v54 = vsel %vm3273_vm14, %v3260_v51, %v3262_v19 }
 0x222   : > { %5060 = vrot.lane.b32.xlu1 %v8778_v29, %s8584_s23  ;;  %7925 = vmatmul.mubr.msk.bf16.vlgmr.msra.gmra.mrb[12].mxu0 %vm823_vm3, %v7919_v34  ;;  %v3290_v56 = vsel %vm827_vm2, %v3284_v53, 0 }
 0x223   : > { %7927 = vmatmul.mubr.msk.bf16.vlgmr.msra.gmra.mrb[12].mxu1 %vm823_vm3, %v7919_v34  ;;  %7929 = vmatprep.subr.msk.bf16.mxu0 %vm827_vm2, %v3274_v54  ;;  %v3490_v57 = vpop.permute.xlu0 %3489 }
 0x224   : > { %3314 = vmatpush1.bf16.msra.mxu0 %v3290_v56  ;;  %v3264_v58 = vpop.permute.xlu1 %3263  ;;  %3345 = vmatprep.mubr.bf16.mxu0 %v8565_v1 }
 0x225   : > { %v3275_v60 = vsel %vm3273_vm14, %v3262_v19, %v3264_v58  ;;  %5282 = vrot.lane.b32.xlu0 %v8757_v0, %s8585_s26  ;;  %v3276_v61 = vsel %vm3273_vm14, %v3264_v58, %v3266_v42  ;;  %3386 = vmatprep.mubr.bf16.mxu1 %v8565_v1  ;;  %v3725_v58 = vsel %vm827_vm2, %v8772_v31, 0 }
 0x226   : > { %5064 = vrot.lane.b32.xlu1 %v8803_v32, %s8584_s23  ;;  %7931 = vmatprep.subr.msk.bf16.mxu1 %vm827_vm2, %v3276_v61  ;;  %v3296_v62 = vsel %vm827_vm2, %v3275_v60, 0 }
 0x227   : > { %3355 = vmatpush1.bf16.msra.mxu1 %v3296_v62  ;;  %v3270_v63 = vpop.permute.xlu0 %3269 }
 0x228   : > { %v3268_v3 = vpop.permute.xlu1 %3267 }
 0x229   : > { %v3277_v4 = vsel %vm3273_vm14, %v3266_v42, %v3268_v3  ;;  %5286 = vrot.lane.b32.xlu0 %v8772_v31, %s8585_s26  ;;  %v3278_v5 = vsel %vm3273_vm14, %v3268_v3, %v3270_v63  ;;  %v3731_v3 = vsel %vm827_vm2, %v8805_v49, 0 }
 0x22a   : > { %5068 = vrot.lane.b32.xlu1 %v8798_v48, %s8584_s23  ;;  %7930 = vmatmul.mubr.msk.bf16.vlgmr.msra.gmra.mrb[8].mxu0 %vm823_vm3, %v7928_v2  ;;  %v3302_v7 = vsel %vm827_vm2, %v3277_v4, 0  ;;  %v3737_v4 = vsel %vm827_vm2, %v8812_v33, 0 }
 0x22b   : > { %7932 = vmatmul.mubr.msk.bf16.vlgmr.msra.gmra.mrb[8].mxu1 %vm823_vm3, %v7928_v2  ;;  %7933 = vmatprep.subr.msk.bf16.mxu0 %vm827_vm2, %v3278_v5  ;;  %v3486_v9 = vpop.permute.xlu0 %3485 }
 0x22c   : > { %3396 = vmatpush1.bf16.msra.mxu0 %v3302_v7  ;;  %v3272_v12 = vpop.permute.xlu1 %3271  ;;  %3427 = vmatprep.mubr.bf16.mxu0 %v8565_v1 }
 0x22d   : > { %v3279_v13 = vsel %vm3273_vm14, %v3270_v63, %v3272_v12  ;;  %5290 = vrot.lane.b32.xlu0 %v8805_v49, %s8585_s26  ;;  %v3280_v14 = vsel %vm3273_vm14, %v3272_v12, %v3258_v50  ;;  %3468 = vmatprep.mubr.bf16.mxu1 %v8565_v1  ;;  %v7946_v63 = vld [vmem:[%s10410_s5 + $0x34] sm:$0xf]  ;;  %vm6438_vm14 = vcmask 146432  }
 0x22e   : > { %5284 = vrot.lane.b32.xlu1 %v8761_v8, %s8585_s26  ;;  %7935 = vmatprep.subr.msk.bf16.mxu1 %vm827_vm2, %v3280_v14  ;;  %v3308_v15 = vsel %vm827_vm2, %v3279_v13, 0 }
 0x22f   : > { %3437 = vmatpush1.bf16.msra.mxu1 %v3308_v15  ;;  %v3494_v17 = vpop.permute.xlu0 %3493 }
 0x230   : > { %v3488_v18 = vpop.permute.xlu1 %3487 }
 0x231   : > { %v3512_v19 = vsel %vm3501_vm15, %v3486_v9, %v3488_v18  ;;  %5294 = vrot.lane.b32.xlu0 %v8812_v33, %s8585_s26  ;;  %v3502_v22 = vsel %vm3501_vm15, %v3488_v18, %v3490_v57 }
 0x232   : > { %5288 = vrot.lane.b32.xlu1 %v8778_v29, %s8585_s26  ;;  %7934 = vmatmul.mubr.msk.bf16.vlgmr.msra.gmra.mrb[12].mxu0 %vm823_vm3, %v7928_v2  ;;  %v3518_v23 = vsel %vm827_vm2, %v3512_v19, 0 }
 0x233   : > { %7936 = vmatmul.mubr.msk.bf16.vlgmr.msra.gmra.mrb[12].mxu1 %vm823_vm3, %v7928_v2  ;;  %7938 = vmatprep.subr.msk.bf16.mxu0 %vm827_vm2, %v3502_v22  ;;  %v3498_v24 = vpop.permute.xlu0 %3497 }
 0x234   : > { %3542 = vmatpush1.bf16.msra.mxu0 %v3518_v23  ;;  %v3492_v26 = vpop.permute.xlu1 %3491  ;;  %3573 = vmatprep.mubr.bf16.mxu0 %v8565_v1 }
 0x235   : > { %v3503_v28 = vsel %vm3501_vm15, %v3490_v57, %v3492_v26  ;;  %5510 = vrot.lane.b32.xlu0 %v8757_v0, %s8586_s15  ;;  %v3504_v34 = vsel %vm3501_vm15, %v3492_v26, %v3494_v17  ;;  %3614 = vmatprep.mubr.bf16.mxu1 %v8565_v1  ;;  %v3719_v57 = vsel %vm827_vm2, %v8757_v0, 0 }
 0x236   : > { %5292 = vrot.lane.b32.xlu1 %v8803_v32, %s8585_s26  ;;  %7940 = vmatprep.subr.msk.bf16.mxu1 %vm827_vm2, %v3504_v34  ;;  %v3524_v36 = vsel %vm827_vm2, %v3503_v28, 0 }
 0x237   : > { %3583 = vmatpush1.bf16.msra.mxu1 %v3524_v36  ;;  %v9403_v37 = vpop.permute.xlu0 %3914  ;;  %v7955_v36 = vld [vmem:[%s10410_s5 + $0x38] sm:$0xf] }
 0x238   : > { %v3496_v41 = vpop.permute.xlu1 %3495 }
 0x239   : > { %v3505_v42 = vsel %vm3501_vm15, %v3494_v17, %v3496_v41  ;;  %5514 = vrot.lane.b32.xlu0 %v8772_v31, %s8586_s15  ;;  %v3506_v43 = vsel %vm3501_vm15, %v3496_v41, %v3498_v24 }
 0x23a   : > { %5296 = vrot.lane.b32.xlu1 %v8798_v48, %s8585_s26  ;;  %7939 = vmatmul.mubr.msk.bf16.vlgmr.msra.gmra.mrb[8].mxu0 %vm823_vm3, %v7937_v39  ;;  %v3530_v30 = vsel %vm827_vm2, %v3505_v42, 0 }
 0x23b   : > { %7941 = vmatmul.mubr.msk.bf16.vlgmr.msra.gmra.mrb[8].mxu1 %vm823_vm3, %v7937_v39  ;;  %7942 = vmatprep.subr.msk.bf16.mxu0 %vm827_vm2, %v3506_v43  ;;  %v3919_v44 = vpop.permute.xlu0 %3918 }
 0x23c   : > { %3624 = vmatpush1.bf16.msra.mxu0 %v3530_v30  ;;  %v3500_v45 = vpop.permute.xlu1 %3499  ;;  %3655 = vmatprep.mubr.bf16.mxu0 %v8565_v1 }
 0x23d   : > { %v3507_v50 = vsel %vm3501_vm15, %v3498_v24, %v3500_v45  ;;  %7947 = vmatprep.subr.msk.bf16.mxu0 %vm827_vm2, %v8761_v8  ;;  %5518 = vrot.lane.b32.xlu0 %v8805_v49, %s8586_s15  ;;  %v3508_v51 = vsel %vm3501_vm15, %v3500_v45, %v3486_v9  ;;  %vm6666_vm15 = vcmask 138240  }
 0x23e   : > { %5512 = vrot.lane.b32.xlu1 %v8761_v8, %s8586_s15  ;;  %7944 = vmatprep.subr.msk.bf16.mxu1 %vm827_vm2, %v3508_v51  ;;  %v3536_v53 = vsel %vm827_vm2, %v3507_v50, 0 }
 0x23f   : > { %3665 = vmatpush1.bf16.msra.mxu1 %v3536_v53  ;;  %v9429_v54 = vpop.permute.xlu0 %3922  ;;  %3696 = vmatprep.mubr.bf16.mxu1 %v8565_v1 }
 0x240   : > { %v3917_v56 = vpop.permute.xlu1 %3916  ;;  %7949 = vmatprep.subr.msk.bf16.mxu1 %vm827_vm2, %v8778_v29 }
 0x241   : > { %5522 = vrot.lane.b32.xlu0 %v8812_v33, %s8586_s15  ;;  %v3932_v5 = vsel %vm3930_vm1, %v3917_v56, %v3919_v44  ;;  %v3931_v13 = vsel %vm3930_vm1, %v9403_v37, %v3917_v56 }
 0x242   : > { %5516 = vrot.lane.b32.xlu1 %v8778_v29, %s8586_s15  ;;  %7943 = vmatmul.mubr.msk.bf16.vlgmr.msra.gmra.mrb[12].mxu0 %vm823_vm3, %v7937_v39  ;;  %v3948_v18 = vsel %vm827_vm2, %v3931_v13, 0 }
 0x243   : > { %7945 = vmatmul.mubr.msk.bf16.vlgmr.msra.gmra.mrb[12].mxu1 %vm823_vm3, %v7937_v39  ;;  %3743 = vmatpush1.bf16.msra.mxu0 %v3719_v57  ;;  %v3927_v60 = vpop.permute.xlu0 %3926 }
 0x244   : > { %3784 = vmatpush1.bf16.msra.mxu1 %v3725_v58  ;;  %7951 = vmatprep.subr.msk.bf16.mxu0 %vm827_vm2, %v8803_v32  ;;  %v3921_v61 = vpop.permute.xlu1 %3920 }
 0x245   : > { %7953 = vmatprep.subr.msk.bf16.mxu1 %vm827_vm2, %v8798_v48  ;;  %5738 = vrot.lane.b32.xlu0 %v8757_v0, %s8587_s18  ;;  %v3934_v9 = vsel %vm3930_vm1, %v3921_v61, %v9429_v54  ;;  %v3933_v15 = vsel %vm3930_vm1, %v3919_v44, %v3921_v61 }
 0x246   : > { %5520 = vrot.lane.b32.xlu1 %v8803_v32, %s8586_s15  ;;  %3774 = vmatprep.mubr.bf16.mxu0 %v8565_v1  ;;  %v3954_v19 = vsel %vm827_vm2, %v3933_v15, 0 }
 0x247   : > { %v9453_v62 = vpop.permute.xlu0 %4142  ;;  %3815 = vmatprep.mubr.bf16.mxu1 %v8565_v1 }
 0x248   : > { %v3925_v2 = vpop.permute.xlu1 %3924 }
 0x249   : > { %5742 = vrot.lane.b32.xlu0 %v8772_v31, %s8587_s18  ;;  %v3936_v22 = vsel %vm3930_vm1, %v3925_v2, %v3927_v60  ;;  %v3935_v28 = vsel %vm3930_vm1, %v9429_v54, %v3925_v2 }
 0x24a   : > { %5524 = vrot.lane.b32.xlu1 %v8798_v48, %s8586_s15  ;;  %7948 = vmatmul.mubr.msk.bf16.vlgmr.msra.gmra.mrb[8].mxu0 %vm823_vm3, %v7946_v63  ;;  %v3960_v41 = vsel %vm827_vm2, %v3935_v28, 0 }
 0x24b   : > { %7950 = vmatmul.mubr.msk.bf16.vlgmr.msra.gmra.mrb[8].mxu1 %vm823_vm3, %v7946_v63  ;;  %3825 = vmatpush1.bf16.msra.mxu0 %v3731_v3  ;;  %v4147_v7 = vpop.permute.xlu0 %4146 }
 0x24c   : > { %3866 = vmatpush1.bf16.msra.mxu1 %v3737_v4  ;;  %7956 = vmatprep.subr.msk.bf16.mxu0 %vm827_vm2, %v3932_v5  ;;  %v3929_v12 = vpop.permute.xlu1 %3928 }
 0x24d   : > { %7958 = vmatprep.subr.msk.bf16.mxu1 %vm827_vm2, %v3934_v9  ;;  %5746 = vrot.lane.b32.xlu0 %v8805_v49, %s8587_s18  ;;  %v3941_v24 = vsel %vm3930_vm1, %v3929_v12, %v9403_v37  ;;  %v3937_v37 = vsel %vm3930_vm1, %v3927_v60, %v3929_v12 }
 0x24e   : > { %5740 = vrot.lane.b32.xlu1 %v8761_v8, %s8587_s18  ;;  %3856 = vmatprep.mubr.bf16.mxu0 %v8565_v1  ;;  %v3966_v42 = vsel %vm827_vm2, %v3937_v37, 0 }
 0x24f   : > { %v9481_v14 = vpop.permute.xlu0 %4150  ;;  %3897 = vmatprep.mubr.bf16.mxu1 %v8565_v1 }
 0x250   : > { %v4145_v17 = vpop.permute.xlu1 %4144 }
 0x251   : > { %5750 = vrot.lane.b32.xlu0 %v8812_v33, %s8587_s18  ;;  %v4160_v43 = vsel %vm4158_vm4, %v4145_v17, %v4147_v7  ;;  %v4159_v50 = vsel %vm4158_vm4, %v9453_v62, %v4145_v17 }
 0x252   : > { %5744 = vrot.lane.b32.xlu1 %v8778_v29, %s8587_s18  ;;  %7952 = vmatmul.mubr.msk.bf16.vlgmr.msra.gmra.mrb[12].mxu0 %vm823_vm3, %v7946_v63  ;;  %v4176_v56 = vsel %vm827_vm2, %v4159_v50, 0 }
 0x253   : > { %7954 = vmatmul.mubr.msk.bf16.vlgmr.msra.gmra.mrb[12].mxu1 %vm823_vm3, %v7946_v63  ;;  %3971 = vmatpush1.bf16.msra.mxu0 %v3948_v18  ;;  %v4155_v23 = vpop.permute.xlu0 %4154 }
 0x254   : > { %4012 = vmatpush1.bf16.msra.mxu1 %v3954_v19  ;;  %7960 = vmatprep.subr.msk.bf16.mxu0 %vm827_vm2, %v3936_v22  ;;  %v4149_v26 = vpop.permute.xlu1 %4148 }
 0x255   : > { %7962 = vmatprep.subr.msk.bf16.mxu1 %vm827_vm2, %v3941_v24  ;;  %5966 = vrot.lane.b32.xlu0 %v8757_v0, %s8588_s21  ;;  %v4162_v44 = vsel %vm4158_vm4, %v4149_v26, %v9481_v14  ;;  %v4161_v53 = vsel %vm4158_vm4, %v4147_v7, %v4149_v26 }
 0x256   : > { %5748 = vrot.lane.b32.xlu1 %v8803_v32, %s8587_s18  ;;  %4002 = vmatprep.mubr.bf16.mxu0 %v8565_v1  ;;  %v4182_v57 = vsel %vm827_vm2, %v4161_v53, 0 }
 0x257   : > { %v9505_v34 = vpop.permute.xlu0 %4370  ;;  %4043 = vmatprep.mubr.bf16.mxu1 %v8565_v1 }
 0x258   : > { %v4153_v39 = vpop.permute.xlu1 %4152 }
 0x259   : > { %5970 = vrot.lane.b32.xlu0 %v8772_v31, %s8588_s21  ;;  %v4164_v58 = vsel %vm4158_vm4, %v4153_v39, %v4155_v23  ;;  %v4163_v2 = vsel %vm4158_vm4, %v9481_v14, %v4153_v39 }
 0x25a   : > { %5752 = vrot.lane.b32.xlu1 %v8798_v48, %s8587_s18  ;;  %7957 = vmatmul.mubr.msk.bf16.vlgmr.msra.gmra.mrb[8].mxu0 %vm823_vm3, %v7955_v36  ;;  %v4188_v7 = vsel %vm827_vm2, %v4163_v2, 0 }
 0x25b   : > { %7959 = vmatmul.mubr.msk.bf16.vlgmr.msra.gmra.mrb[8].mxu1 %vm823_vm3, %v7955_v36  ;;  %4053 = vmatpush1.bf16.msra.mxu0 %v3960_v41  ;;  %v4375_v30 = vpop.permute.xlu0 %4374 }
 0x25c   : > { %4094 = vmatpush1.bf16.msra.mxu1 %v3966_v42  ;;  %7965 = vmatprep.subr.msk.bf16.mxu0 %vm827_vm2, %v4160_v43  ;;  %v4157_v45 = vpop.permute.xlu1 %4156 }
 0x25d   : > { %7967 = vmatprep.subr.msk.bf16.mxu1 %vm827_vm2, %v4162_v44  ;;  %5974 = vrot.lane.b32.xlu0 %v8805_v49, %s8588_s21  ;;  %v4169_v61 = vsel %vm4158_vm4, %v4157_v45, %v9453_v62  ;;  %v7964_v62 = vld [vmem:[%s10410_s5 + $0x3c] sm:$0xf]  ;;  %v4165_v4 = vsel %vm4158_vm4, %v4155_v23, %v4157_v45 }
 0x25e   : > { %5968 = vrot.lane.b32.xlu1 %v8761_v8, %s8588_s21  ;;  %4084 = vmatprep.mubr.bf16.mxu0 %v8565_v1  ;;  %v4194_v9 = vsel %vm827_vm2, %v4165_v4, 0 }
 0x25f   : > { %v9532_v51 = vpop.permute.xlu0 %4378  ;;  %4125 = vmatprep.mubr.bf16.mxu1 %v8565_v1 }
 0x260   : > { %v4373_v54 = vpop.permute.xlu1 %4372 }
 0x261   : > { %5978 = vrot.lane.b32.xlu0 %v8812_v33, %s8588_s21  ;;  %v4388_v12 = vsel %vm4386_vm5, %v4373_v54, %v4375_v30  ;;  %v4387_v17 = vsel %vm4386_vm5, %v9505_v34, %v4373_v54 }
 0x262   : > { %5972 = vrot.lane.b32.xlu1 %v8778_v29, %s8588_s21  ;;  %7961 = vmatmul.mubr.msk.bf16.vlgmr.msra.gmra.mrb[12].mxu0 %vm823_vm3, %v7955_v36  ;;  %v4404_v23 = vsel %vm827_vm2, %v4387_v17, 0 }
 0x263   : > { %7963 = vmatmul.mubr.msk.bf16.vlgmr.msra.gmra.mrb[12].mxu1 %vm823_vm3, %v7955_v36  ;;  %4199 = vmatpush1.bf16.msra.mxu0 %v4176_v56  ;;  %v4383_v60 = vpop.permute.xlu0 %4382 }
 0x264   : > { %4240 = vmatpush1.bf16.msra.mxu1 %v4182_v57  ;;  %7969 = vmatprep.subr.msk.bf16.mxu0 %vm827_vm2, %v4164_v58  ;;  %v4377_v63 = vpop.permute.xlu1 %4376 }
 0x265   : > { %7971 = vmatprep.subr.msk.bf16.mxu1 %vm827_vm2, %v4169_v61  ;;  %6194 = vrot.lane.b32.xlu0 %v8757_v0, %s8589_s24  ;;  %v4390_v14 = vsel %vm4386_vm5, %v4377_v63, %v9532_v51  ;;  %v4389_v19 = vsel %vm4386_vm5, %v4375_v30, %v4377_v63 }
 0x266   : > { %5976 = vrot.lane.b32.xlu1 %v8803_v32, %s8588_s21  ;;  %4230 = vmatprep.mubr.bf16.mxu0 %v8565_v1  ;;  %v4410_v24 = vsel %vm827_vm2, %v4389_v19, 0 }
 0x267   : > { %v9556_v3 = vpop.permute.xlu0 %4598  ;;  %4271 = vmatprep.mubr.bf16.mxu1 %v8565_v1 }
 0x268   : > { %v4381_v5 = vpop.permute.xlu1 %4380 }
 0x269   : > { %6198 = vrot.lane.b32.xlu0 %v8772_v31, %s8589_s24  ;;  %v4392_v26 = vsel %vm4386_vm5, %v4381_v5, %v4383_v60  ;;  %v4391_v39 = vsel %vm4386_vm5, %v9532_v51, %v4381_v5 }
 0x26a   : > { %5980 = vrot.lane.b32.xlu1 %v8798_v48, %s8588_s21  ;;  %7966 = vmatmul.mubr.msk.bf16.vlgmr.msra.gmra.mrb[8].mxu0 %vm823_vm3, %v7964_v62  ;;  %v4416_v30 = vsel %vm827_vm2, %v4391_v39, 0 }
 0x26b   : > { %7968 = vmatmul.mubr.msk.bf16.vlgmr.msra.gmra.mrb[8].mxu1 %vm823_vm3, %v7964_v62  ;;  %4281 = vmatpush1.bf16.msra.mxu0 %v4188_v7  ;;  %v4603_v13 = vpop.permute.xlu0 %4602 }
 0x26c   : > { %4322 = vmatpush1.bf16.msra.mxu1 %v4194_v9  ;;  %7974 = vmatprep.subr.msk.bf16.mxu0 %vm827_vm2, %v4388_v12  ;;  %v4385_v15 = vpop.permute.xlu1 %4384 }
 0x26d   : > { %7976 = vmatprep.subr.msk.bf16.mxu1 %vm827_vm2, %v4390_v14  ;;  %6202 = vrot.lane.b32.xlu0 %v8805_v49, %s8589_s24  ;;  %v4397_v36 = vsel %vm4386_vm5, %v4385_v15, %v9505_v34  ;;  %v7973_v34 = vld [vmem:[%s10410_s5 + $0x40] sm:$0xf]  ;;  %v4393_v42 = vsel %vm4386_vm5, %v4383_v60, %v4385_v15 }
 0x26e   : > { %6196 = vrot.lane.b32.xlu1 %v8761_v8, %s8589_s24  ;;  %4312 = vmatprep.mubr.bf16.mxu0 %v8565_v1  ;;  %v4422_v45 = vsel %vm827_vm2, %v4393_v42, 0 }
 0x26f   : > { %v9583_v18 = vpop.permute.xlu0 %4606  ;;  %4353 = vmatprep.mubr.bf16.mxu1 %v8565_v1 }
 0x270   : > { %v4601_v22 = vpop.permute.xlu1 %4600 }
 0x271   : > { %6206 = vrot.lane.b32.xlu0 %v8812_v33, %s8589_s24  ;;  %v4616_v44 = vsel %vm4614_vm6, %v4601_v22, %v4603_v13  ;;  %v4615_v54 = vsel %vm4614_vm6, %v9556_v3, %v4601_v22 }
 0x272   : > { %6200 = vrot.lane.b32.xlu1 %v8778_v29, %s8589_s24  ;;  %7970 = vmatmul.mubr.msk.bf16.vlgmr.msra.gmra.mrb[12].mxu0 %vm823_vm3, %v7964_v62  ;;  %v4632_v60 = vsel %vm827_vm2, %v4615_v54, 0 }
 0x273   : > { %7972 = vmatmul.mubr.msk.bf16.vlgmr.msra.gmra.mrb[12].mxu1 %vm823_vm3, %v7964_v62  ;;  %4427 = vmatpush1.bf16.msra.mxu0 %v4404_v23  ;;  %v4611_v28 = vpop.permute.xlu0 %4610 }
 0x274   : > { %4468 = vmatpush1.bf16.msra.mxu1 %v4410_v24  ;;  %7978 = vmatprep.subr.msk.bf16.mxu0 %vm827_vm2, %v4392_v26  ;;  %v4605_v37 = vpop.permute.xlu1 %4604 }
 0x275   : > { %7980 = vmatprep.subr.msk.bf16.mxu1 %vm827_vm2, %v4397_v36  ;;  %6422 = vrot.lane.b32.xlu0 %v8757_v0, %s8590_s27  ;;  %v4618_v51 = vsel %vm4614_vm6, %v4605_v37, %v9583_v18  ;;  %v4617_v57 = vsel %vm4614_vm6, %v4603_v13, %v4605_v37  ;;  %v7178_v36 = vld [vmem:[%s10414_s9] sm:$0xff] }
 0x276   : > { %6204 = vrot.lane.b32.xlu1 %v8803_v32, %s8589_s24  ;;  %4458 = vmatprep.mubr.bf16.mxu0 %v8565_v1  ;;  %v4638_v61 = vsel %vm827_vm2, %v4617_v57, 0 }
 0x277   : > { %v9607_v41 = vpop.permute.xlu0 %4826  ;;  %4499 = vmatprep.mubr.bf16.mxu1 %v8565_v1 }
 0x278   : > { %v4609_v43 = vpop.permute.xlu1 %4608 }
 0x279   : > { %6426 = vrot.lane.b32.xlu0 %v8772_v31, %s8590_s27  ;;  %v4620_v63 = vsel %vm4614_vm6, %v4609_v43, %v4611_v28  ;;  %v4619_v5 = vsel %vm4614_vm6, %v9583_v18, %v4609_v43  ;;  %v7180_v43 = vld [vmem:[%s10414_s9 + $0x10] sm:$0xff] }
 0x27a   : > { %6208 = vrot.lane.b32.xlu1 %v8798_v48, %s8589_s24  ;;  %7975 = vmatmul.mubr.msk.bf16.vlgmr.msra.gmra.mrb[8].mxu0 %vm823_vm3, %v7973_v34  ;;  %v4644_v12 = vsel %vm827_vm2, %v4619_v5, 0  ;;  %v7234_v5 = vld [vmem:[%s10415_s10] sm:$0xff] }
 0x27b   : > { %7977 = vmatmul.mubr.msk.bf16.vlgmr.msra.gmra.mrb[8].mxu1 %vm823_vm3, %v7973_v34  ;;  %4509 = vmatpush1.bf16.msra.mxu0 %v4416_v30  ;;  %v4831_v50 = vpop.permute.xlu0 %4830 }
 0x27c   : > { %4550 = vmatpush1.bf16.msra.mxu1 %v4422_v45  ;;  %7983 = vmatprep.subr.msk.bf16.mxu0 %vm827_vm2, %v4616_v44  ;;  %v4613_v53 = vpop.permute.xlu1 %4612 }
 0x27d   : > { %7985 = vmatprep.subr.msk.bf16.mxu1 %vm827_vm2, %v4618_v51  ;;  %6430 = vrot.lane.b32.xlu0 %v8805_v49, %s8590_s27  ;;  %v4625_v62 = vsel %vm4614_vm6, %v4613_v53, %v9556_v3  ;;  %v7982_v3 = vld [vmem:[%s10410_s5 + $0x44] sm:$0xf]  ;;  %v4621_v9 = vsel %vm4614_vm6, %v4611_v28, %v4613_v53 }
 0x27e   : > { %6424 = vrot.lane.b32.xlu1 %v8761_v8, %s8590_s27  ;;  %4540 = vmatprep.mubr.bf16.mxu0 %v8565_v1  ;;  %v4650_v13 = vsel %vm827_vm2, %v4621_v9, 0  ;;  %v7522_v51 = vld [vmem:[%s10417_s12] sm:$0xff] }
 0x27f   : > { %v9634_v56 = vpop.permute.xlu0 %4834  ;;  %4581 = vmatprep.mubr.bf16.mxu1 %v8565_v1 }
 0x280   : > { %v4829_v58 = vpop.permute.xlu1 %4828 }
 0x281   : > { %6434 = vrot.lane.b32.xlu0 %v8812_v33, %s8590_s27  ;;  %v4844_v14 = vsel %vm4842_vm7, %v4829_v58, %v4831_v50  ;;  %v4843_v18 = vsel %vm4842_vm7, %v9607_v41, %v4829_v58 }
 0x282   : > { %6428 = vrot.lane.b32.xlu1 %v8778_v29, %s8590_s27  ;;  %7979 = vmatmul.mubr.msk.bf16.vlgmr.msra.gmra.mrb[12].mxu0 %vm823_vm3, %v7973_v34 }
 0x283   : > { %7981 = vmatmul.mubr.msk.bf16.vlgmr.msra.gmra.mrb[12].mxu1 %vm823_vm3, %v7973_v34  ;;  %4655 = vmatpush1.bf16.msra.mxu0 %v4632_v60  ;;  %v9647_v2 = vpop.permute.xlu0 %4838  ;;  %v7524_v60 = vld [vmem:[%s10417_s12 + $0x10] sm:$0xff] }
 0x284   : > { %4696 = vmatpush1.bf16.msra.mxu1 %v4638_v61  ;;  %7987 = vmatprep.subr.msk.bf16.mxu0 %vm827_vm2, %v4620_v63  ;;  %v4833_v4 = vpop.permute.xlu1 %4832 }
 0x285   : > { %7989 = vmatprep.subr.msk.bf16.mxu1 %vm827_vm2, %v4625_v62  ;;  %6650 = vrot.lane.b32.xlu0 %v8757_v0, %s8591_s16  ;;  %v4846_v17 = vsel %vm4842_vm7, %v4833_v4, %v9634_v56  ;;  %v4845_v22 = vsel %vm4842_vm7, %v4831_v50, %v4833_v4 }
 0x286   : > { %6432 = vrot.lane.b32.xlu1 %v8803_v32, %s8590_s27  ;;  %4686 = vmatprep.mubr.bf16.mxu0 %v8565_v1  ;;  %v4866_v24 = vsel %vm827_vm2, %v4845_v22, 0  ;;  %v7578_v22 = vld [vmem:[%s10418_s13] sm:$0xff] }
 0x287   : > { %v9660_v7 = vpop.permute.xlu0 %5054  ;;  %4727 = vmatprep.mubr.bf16.mxu1 %v8565_v1 }
 0x288   : > { %v4837_v0 = vpop.permute.xlu1 %4836 }
 0x289   : > { %6654 = vrot.lane.b32.xlu0 %v8772_v31, %s8591_s16  ;;  %v4848_v26 = vsel %vm4842_vm7, %v4837_v0, %v9647_v2  ;;  %v4847_v37 = vsel %vm4842_vm7, %v9634_v56, %v4837_v0 }
 0x28a   : > { %6436 = vrot.lane.b32.xlu1 %v8798_v48, %s8590_s27  ;;  %7984 = vmatmul.mubr.msk.bf16.vlgmr.msra.gmra.mrb[8].mxu0 %vm823_vm3, %v7982_v3  ;;  %v4872_v42 = vsel %vm827_vm2, %v4847_v37, 0  ;;  %s10257_s27 = scalar_lea.vmem %s10419_s14, %s8099_s25 }
 0x28b   : > { %7986 = vmatmul.mubr.msk.bf16.vlgmr.msra.gmra.mrb[8].mxu1 %vm823_vm3, %v7982_v3  ;;  %4737 = vmatpush1.bf16.msra.mxu0 %v4644_v12  ;;  %v5059_v15 = vpop.permute.xlu0 %5058 }
 0x28c   : > { %4778 = vmatpush1.bf16.msra.mxu1 %v4650_v13  ;;  %7992 = vmatprep.subr.msk.bf16.mxu0 %vm827_vm2, %v4844_v14  ;;  %v4841_v31 = vpop.permute.xlu1 %4840  ;;  %v7236_v14 = vld [vmem:[%s10415_s10 + $0x10] sm:$0xff] }
 0x28d   : > { %7994 = vmatprep.subr.msk.bf16.mxu1 %vm827_vm2, %v4846_v17  ;;  %6658 = vrot.lane.b32.xlu0 %v8805_v49, %s8591_s16  ;;  %v4860_v49 = vsel %vm827_vm2, %v4843_v18, 0  ;;  %v4853_v28 = vsel %vm4842_vm7, %v4841_v31, %v9607_v41  ;;  %v7991_v41 = vld [vmem:[%s10410_s5 + $0x48] sm:$0xf] }
 0x28e   : > { %6652 = vrot.lane.b32.xlu1 %v8761_v8, %s8591_s16  ;;  %4768 = vmatprep.mubr.bf16.mxu0 %v8565_v1  ;;  %v6878_v8 = vld [vmem:[%s10411_s6] sm:$0xff] }
 0x28f   : > { %v9687_v19 = vpop.permute.xlu0 %5062  ;;  %4809 = vmatprep.mubr.bf16.mxu1 %v8565_v1 }
 0x290   : > { %v5057_v23 = vpop.permute.xlu1 %5056 }
 0x291   : > { %6662 = vrot.lane.b32.xlu0 %v8812_v33, %s8591_s16  ;;  %v5072_v44 = vsel %vm5070_vm8, %v5057_v23, %v5059_v15  ;;  %v5071_v53 = vsel %vm5070_vm8, %v9660_v7, %v5057_v23 }
 0x292   : > { %6656 = vrot.lane.b32.xlu1 %v8778_v29, %s8591_s16  ;;  %7988 = vmatmul.mubr.msk.bf16.vlgmr.msra.gmra.mrb[12].mxu0 %vm823_vm3, %v7982_v3  ;;  %v5088_v58 = vsel %vm827_vm2, %v5071_v53, 0 }
 0x293   : > { %7990 = vmatmul.mubr.msk.bf16.vlgmr.msra.gmra.mrb[12].mxu1 %vm823_vm3, %v7982_v3  ;;  %4883 = vmatpush1.bf16.msra.mxu0 %v4860_v49  ;;  %v5067_v33 = vpop.permute.xlu0 %5066 }
 0x294   : > { %4924 = vmatpush1.bf16.msra.mxu1 %v4866_v24  ;;  %7996 = vmatprep.subr.msk.bf16.mxu0 %vm827_vm2, %v4848_v26  ;;  %v5061_v29 = vpop.permute.xlu1 %5060 }
 0x295   : > { %7998 = vmatprep.subr.msk.bf16.mxu1 %vm827_vm2, %v4853_v28  ;;  %6881 = vperm.xlu0 %8551, %v6878_v8   ;;  %v5074_v50 = vsel %vm5070_vm8, %v5061_v29, %v9687_v19  ;;  %v5073_v56 = vsel %vm5070_vm8, %v5059_v15, %v5061_v29 }
 0x296   : > { %6660 = vrot.lane.b32.xlu1 %v8803_v32, %s8591_s16  ;;  %4914 = vmatprep.mubr.bf16.mxu0 %v8565_v1  ;;  %v4849_v32 = vsel %vm4842_vm7, %v9647_v2, %v4841_v31  ;;  %v5094_v61 = vsel %vm827_vm2, %v5073_v56, 0 }
 0x297   : > { %v9716_v39 = vpop.permute.xlu0 %5282  ;;  %4955 = vmatprep.mubr.bf16.mxu1 %v8565_v1  ;;  %v4878_v30 = vsel %vm827_vm2, %v4849_v32, 0  ;;  %v6892_v32 = vld [vmem:[%s10412_s7] sm:$0xff] }
 0x298   : > { %v5065_v34 = vpop.permute.xlu1 %5064 }
 0x299   : > { %7184 = vperm.xlu0 %8551, %v7178_v36   ;;  %v5076_v63 = vsel %vm5070_vm8, %v5065_v34, %v5067_v33  ;;  %v5075_v3 = vsel %vm5070_vm8, %v9687_v19, %v5065_v34 }
 0x29a   : > { %6664 = vrot.lane.b32.xlu1 %v8798_v48, %s8591_s16  ;;  %7993 = vmatmul.mubr.msk.bf16.vlgmr.msra.gmra.mrb[8].mxu0 %vm823_vm3, %v7991_v41  ;;  %v5100_v13 = vsel %vm827_vm2, %v5075_v3, 0 }
 0x29b   : > { %7995 = vmatmul.mubr.msk.bf16.vlgmr.msra.gmra.mrb[8].mxu1 %vm823_vm3, %v7991_v41  ;;  %4965 = vmatpush1.bf16.msra.mxu0 %v4872_v42  ;;  %v5287_v45 = vpop.permute.xlu0 %5286 }
 0x29c   : > { %5006 = vmatpush1.bf16.msra.mxu1 %v4878_v30  ;;  %8001 = vmatprep.subr.msk.bf16.mxu0 %vm827_vm2, %v5072_v44  ;;  %v5069_v48 = vpop.permute.xlu1 %5068 }
 0x29d   : > { %8003 = vmatprep.subr.msk.bf16.mxu1 %vm827_vm2, %v5074_v50  ;;  %7194 = vperm.xlu0 %8551, %v7180_v43   ;;  %v5081_v62 = vsel %vm5070_vm8, %v5069_v48, %v9660_v7  ;;  %v8000_v7 = vld [vmem:[%s10410_s5 + $0x4c] sm:$0xf]  ;;  %v5077_v0 = vsel %vm5070_vm8, %v5067_v33, %v5069_v48  ;;  %v7580_v33 = vld [vmem:[%s10418_s13 + $0x10] sm:$0xff] }
 0x29e   : > { %4996 = vmatprep.mubr.bf16.mxu0 %v8565_v1  ;;  %5037 = vmatprep.mubr.bf16.mxu1 %v8565_v1  ;;  %v5106_v15 = vsel %vm827_vm2, %v5077_v0, 0 }
 0x29f   : > { %v9745_v54 = vpop.permute.xlu0 %5290  ;;  %6895 = vperm.xlu1 %8552, %v6892_v32   ;;  %v7579_v32 = vld [vmem:[%s10418_s13 + $0x8] sm:$0xff] }
 0x2a0   : > { %v5285_v57 = vpop.permute.xlu1 %5284 }
 0x2a1   : > { %7528 = vperm.xlu0 %8551, %v7522_v51   ;;  %v5300_v17 = vsel %vm5298_vm9, %v5285_v57, %v5287_v45  ;;  %v5299_v23 = vsel %vm5298_vm9, %v9716_v39, %v5285_v57  ;;  %v7179_v51 = vld [vmem:[%s10414_s9 + $0x8] sm:$0xff] }
 0x2a2   : > { %7997 = vmatmul.mubr.msk.bf16.vlgmr.msra.gmra.mrb[12].mxu0 %vm823_vm3, %v7991_v41  ;;  %v5316_v26 = vsel %vm827_vm2, %v5299_v23, 0 }
 0x2a3   : > { %7999 = vmatmul.mubr.msk.bf16.vlgmr.msra.gmra.mrb[12].mxu1 %vm823_vm3, %v7991_v41  ;;  %5111 = vmatpush1.bf16.msra.mxu0 %v5088_v58  ;;  %v5295_v2 = vpop.permute.xlu0 %5294  ;;  %v7181_v58 = vld [vmem:[%s10414_s9 + $0x18] sm:$0xff] }
 0x2a4   : > { %5152 = vmatpush1.bf16.msra.mxu1 %v5094_v61  ;;  %8005 = vmatprep.subr.msk.bf16.mxu0 %vm827_vm2, %v5076_v63  ;;  %v5289_v4 = vpop.permute.xlu1 %5288 }
 0x2a5   : > { %8007 = vmatprep.subr.msk.bf16.mxu1 %vm827_vm2, %v5081_v62  ;;  %7538 = vperm.xlu0 %8551, %v7524_v60   ;;  %v5302_v18 = vsel %vm5298_vm9, %v5289_v4, %v9745_v54  ;;  %v5301_v8 = vsel %vm5298_vm9, %v5287_v45, %v5289_v4 }
 0x2a6   : > { %5142 = vmatprep.mubr.bf16.mxu0 %v8565_v1  ;;  %5183 = vmatprep.mubr.bf16.mxu1 %v8565_v1  ;;  %v5322_v28 = vsel %vm827_vm2, %v5301_v8, 0 }
 0x2a7   : > { %v9767_v9 = vpop.permute.xlu0 %5510  ;;  %7189 = vperm.xlu1 %8552, %v7179_v51  }
 0x2a8   : > { %v5293_v12 = vpop.permute.xlu1 %5292 }
 0x2a9   : > { %7240 = vperm.xlu0 %8551, %v7234_v5   ;;  %v5304_v29 = vsel %vm5298_vm9, %v5293_v12, %v5295_v2  ;;  %v5303_v34 = vsel %vm5298_vm9, %v9745_v54, %v5293_v12  ;;  %v7523_v5 = vld [vmem:[%s10417_s12 + $0x8] sm:$0xff] }
 0x2aa   : > { %8002 = vmatmul.mubr.msk.bf16.vlgmr.msra.gmra.mrb[8].mxu0 %vm823_vm3, %v8000_v7  ;;  %v5328_v44 = vsel %vm827_vm2, %v5303_v34, 0 }
 0x2ab   : > { %8004 = vmatmul.mubr.msk.bf16.vlgmr.msra.gmra.mrb[8].mxu1 %vm823_vm3, %v8000_v7  ;;  %5193 = vmatpush1.bf16.msra.mxu0 %v5100_v13  ;;  %v5515_v31 = vpop.permute.xlu0 %5514  ;;  %v7525_v13 = vld [vmem:[%s10417_s12 + $0x18] sm:$0xff] }
 0x2ac   : > { %5234 = vmatpush1.bf16.msra.mxu1 %v5106_v15  ;;  %8010 = vmatprep.subr.msk.bf16.mxu0 %vm827_vm2, %v5300_v17  ;;  %v5297_v19 = vpop.permute.xlu1 %5296 }
 0x2ad   : > { %8012 = vmatprep.subr.msk.bf16.mxu1 %vm827_vm2, %v5302_v18  ;;  %7250 = vperm.xlu0 %8551, %v7236_v14   ;;  %v5309_v37 = vsel %vm5298_vm9, %v5297_v19, %v9716_v39  ;;  %v8009_v39 = vld [vmem:[%s10410_s5 + $0x50] sm:$0xf]  ;;  %v5305_v43 = vsel %vm5298_vm9, %v5295_v2, %v5297_v19 }
 0x2ae   : > { %5224 = vmatprep.mubr.bf16.mxu0 %v8565_v1  ;;  %5265 = vmatprep.mubr.bf16.mxu1 %v8565_v1  ;;  %v5334_v45 = vsel %vm827_vm2, %v5305_v43, 0 }
 0x2af   : > { %v9792_v49 = vpop.permute.xlu0 %5518  ;;  %7199 = vperm.xlu1 %8552, %v7181_v58  }
 0x2b0   : > { %v5513_v24 = vpop.permute.xlu1 %5512 }
 0x2b1   : > { %7584 = vperm.xlu0 %8551, %v7578_v22   ;;  %v5528_v50 = vsel %vm5526_vm10, %v5513_v24, %v5515_v31  ;;  %v5527_v56 = vsel %vm5526_vm10, %v9767_v9, %v5513_v24  ;;  %v7235_v22 = vld [vmem:[%s10415_s10 + $0x8] sm:$0xff] }
 0x2b2   : > { %8006 = vmatmul.mubr.msk.bf16.vlgmr.msra.gmra.mrb[12].mxu0 %vm823_vm3, %v8000_v7  ;;  %v5544_v63 = vsel %vm827_vm2, %v5527_v56, 0 }
 0x2b3   : > { %8008 = vmatmul.mubr.msk.bf16.vlgmr.msra.gmra.mrb[12].mxu1 %vm823_vm3, %v8000_v7  ;;  %5339 = vmatpush1.bf16.msra.mxu0 %v5316_v26  ;;  %v5523_v36 = vpop.permute.xlu0 %5522  ;;  %v7237_v26 = vld [vmem:[%s10415_s10 + $0x18] sm:$0xff] }
 0x2b4   : > { %5380 = vmatpush1.bf16.msra.mxu1 %v5322_v28  ;;  %8014 = vmatprep.subr.msk.bf16.mxu0 %vm827_vm2, %v5304_v29  ;;  %v5517_v41 = vpop.permute.xlu1 %5516 }
 0x2b5   : > { %8016 = vmatprep.subr.msk.bf16.mxu1 %vm827_vm2, %v5309_v37  ;;  %7594 = vperm.xlu0 %8551, %v7580_v33   ;;  %v5530_v53 = vsel %vm5526_vm10, %v5517_v41, %v9792_v49  ;;  %v5529_v60 = vsel %vm5526_vm10, %v5515_v31, %v5517_v41 }
 0x2b6   : > { %5370 = vmatprep.mubr.bf16.mxu0 %v8565_v1  ;;  %5411 = vmatprep.mubr.bf16.mxu1 %v8565_v1  ;;  %v5550_v2 = vsel %vm827_vm2, %v5529_v60, 0 }
 0x2b7   : > { %v9814_v42 = vpop.permute.xlu0 %5738  ;;  %7533 = vperm.xlu1 %8552, %v7523_v5  }
 0x2b8   : > { %v5521_v30 = vpop.permute.xlu1 %5520 }
 0x2b9   : > { %v5532_v62 = vsel %vm5526_vm10, %v5521_v30, %v5523_v36  ;;  %v5531_v0 = vsel %vm5526_vm10, %v9792_v49, %v5521_v30 }
 0x2ba   : > { %8011 = vmatmul.mubr.msk.bf16.vlgmr.msra.gmra.mrb[8].mxu0 %vm823_vm3, %v8009_v39  ;;  %v5556_v17 = vsel %vm827_vm2, %v5531_v0, 0 }
 0x2bb   : > { %8013 = vmatmul.mubr.msk.bf16.vlgmr.msra.gmra.mrb[8].mxu1 %vm823_vm3, %v8009_v39  ;;  %5421 = vmatpush1.bf16.msra.mxu0 %v5328_v44  ;;  %v5743_v48 = vpop.permute.xlu0 %5742  ;;  %v7581_v44 = vld [vmem:[%s10418_s13 + $0x18] sm:$0xff] }
 0x2bc   : > { %5462 = vmatpush1.bf16.msra.mxu1 %v5334_v45  ;;  %8019 = vmatprep.subr.msk.bf16.mxu0 %vm827_vm2, %v5528_v50  ;;  %v5525_v54 = vpop.permute.xlu1 %5524 }
 0x2bd   : > { %8021 = vmatprep.subr.msk.bf16.mxu1 %vm827_vm2, %v5530_v53  ;;  %5452 = vmatprep.mubr.bf16.mxu0 %v8565_v1  ;;  %v5537_v3 = vsel %vm5526_vm10, %v5525_v54, %v9767_v9  ;;  %v8018_v9 = vld [vmem:[%s10410_s5 + $0x54] sm:$0xf]  ;;  %v5533_v14 = vsel %vm5526_vm10, %v5523_v36, %v5525_v54 }
 0x2be   : > { %5493 = vmatprep.mubr.bf16.mxu1 %v8565_v1  ;;  %7543 = vperm.xlu1 %8552, %v7525_v13   ;;  %v5562_v31 = vsel %vm827_vm2, %v5533_v14, 0  ;;  %v8036_v13 = vld [vmem:[%s10410_s5 + $0x5c] sm:$0xf] }
 0x2bf   : > { %v9836_v57 = vpop.permute.xlu0 %5746 }
 0x2c0   : > { %v5741_v61 = vpop.permute.xlu1 %5740 }
 0x2c1   : > { %v5756_v18 = vsel %vm5754_vm11, %v5741_v61, %v5743_v48  ;;  %v5755_v8 = vsel %vm5754_vm11, %v9814_v42, %v5741_v61 }
 0x2c2   : > { %8015 = vmatmul.mubr.msk.bf16.vlgmr.msra.gmra.mrb[12].mxu0 %vm823_vm3, %v8009_v39  ;;  %7245 = vperm.xlu1 %8552, %v7235_v22   ;;  %v5772_v29 = vsel %vm827_vm2, %v5755_v8, 0 }
 0x2c3   : > { %8017 = vmatmul.mubr.msk.bf16.vlgmr.msra.gmra.mrb[12].mxu1 %vm823_vm3, %v8009_v39  ;;  %5567 = vmatpush1.bf16.msra.mxu0 %v5544_v63  ;;  %v5751_v4 = vpop.permute.xlu0 %5750 }
 0x2c4   : > { %5608 = vmatpush1.bf16.msra.mxu1 %v5550_v2  ;;  %8023 = vmatprep.subr.msk.bf16.mxu0 %vm827_vm2, %v5532_v62  ;;  %v5745_v7 = vpop.permute.xlu1 %5744 }
 0x2c5   : > { %8025 = vmatprep.subr.msk.bf16.mxu1 %vm827_vm2, %v5537_v3  ;;  %5598 = vmatprep.mubr.bf16.mxu0 %v8565_v1  ;;  %v5758_v23 = vsel %vm5754_vm11, %v5745_v7, %v9836_v57  ;;  %v5757_v33 = vsel %vm5754_vm11, %v5743_v48, %v5745_v7 }
 0x2c6   : > { %5639 = vmatprep.mubr.bf16.mxu1 %v8565_v1  ;;  %7255 = vperm.xlu1 %8552, %v7237_v26   ;;  %v5778_v36 = vsel %vm827_vm2, %v5757_v33, 0 }
 0x2c7   : > { %v9858_v12 = vpop.permute.xlu0 %5966 }
 0x2c8   : > { %v5749_v15 = vpop.permute.xlu1 %5748 }
 0x2c9   : > { %v5760_v37 = vsel %vm5754_vm11, %v5749_v15, %v5751_v4  ;;  %v5759_v43 = vsel %vm5754_vm11, %v9836_v57, %v5749_v15 }
 0x2ca   : > { %8020 = vmatmul.mubr.msk.bf16.vlgmr.msra.gmra.mrb[8].mxu0 %vm823_vm3, %v8018_v9  ;;  %7589 = vperm.xlu1 %8552, %v7579_v32   ;;  %v5784_v48 = vsel %vm827_vm2, %v5759_v43, 0 }
 0x2cb   : > { %8022 = vmatmul.mubr.msk.bf16.vlgmr.msra.gmra.mrb[8].mxu1 %vm823_vm3, %v8018_v9  ;;  %5649 = vmatpush1.bf16.msra.mxu0 %v5556_v17  ;;  %v5971_v19 = vpop.permute.xlu0 %5970 }
 0x2cc   : > { %5690 = vmatpush1.bf16.msra.mxu1 %v5562_v31  ;;  %8028 = vmatprep.subr.msk.bf16.mxu0 %vm827_vm2, %v5756_v18  ;;  %v5753_v49 = vpop.permute.xlu1 %5752 }
 0x2cd   : > { %8030 = vmatprep.subr.msk.bf16.mxu1 %vm827_vm2, %v5758_v23  ;;  %5680 = vmatprep.mubr.bf16.mxu0 %v8565_v1  ;;  %v5765_v34 = vsel %vm5754_vm11, %v5753_v49, %v9814_v42  ;;  %v8027_v42 = vld [vmem:[%s10410_s5 + $0x58] sm:$0xf]  ;;  %v5761_v45 = vsel %vm5754_vm11, %v5751_v4, %v5753_v49 }
 0x2ce   : > { %5721 = vmatprep.mubr.bf16.mxu1 %v8565_v1  ;;  %7599 = vperm.xlu1 %8552, %v7581_v44   ;;  %v5790_v51 = vsel %vm827_vm2, %v5761_v45, 0 }
 0x2cf   : > { %v5975_v24 = vpop.permute.xlu0 %5974 }
 0x2d0   : > { %v5969_v28 = vpop.permute.xlu1 %5968 }
 0x2d1   : > { %v5984_v53 = vsel %vm5982_vm12, %v5969_v28, %v5971_v19  ;;  %v5983_v58 = vsel %vm5982_vm12, %v9858_v12, %v5969_v28 }
 0x2d2   : > { %8024 = vmatmul.mubr.msk.bf16.vlgmr.msra.gmra.mrb[12].mxu0 %vm823_vm3, %v8018_v9  ;;  %v6000_v2 = vsel %vm827_vm2, %v5983_v58, 0 }
 0x2d3   : > { %8026 = vmatmul.mubr.msk.bf16.vlgmr.msra.gmra.mrb[12].mxu1 %vm823_vm3, %v8018_v9  ;;  %5795 = vmatpush1.bf16.msra.mxu0 %v5772_v29  ;;  %v5979_v41 = vpop.permute.xlu0 %5978 }
 0x2d4   : > { %5836 = vmatpush1.bf16.msra.mxu1 %v5778_v36  ;;  %8032 = vmatprep.subr.msk.bf16.mxu0 %vm827_vm2, %v5760_v37  ;;  %v5973_v39 = vpop.permute.xlu1 %5972 }
 0x2d5   : > { %8034 = vmatprep.subr.msk.bf16.mxu1 %vm827_vm2, %v5765_v34  ;;  %5826 = vmatprep.mubr.bf16.mxu0 %v8565_v1  ;;  %v5986_v56 = vsel %vm5982_vm12, %v5973_v39, %v5975_v24  ;;  %v5985_v61 = vsel %vm5982_vm12, %v5971_v19, %v5973_v39 }
 0x2d6   : > { %5867 = vmatprep.mubr.bf16.mxu1 %v8565_v1  ;;  %v6006_v62 = vsel %vm827_vm2, %v5985_v61, 0 }
 0x2d7   : > { %v9903_v30 = vpop.permute.xlu0 %6194 }
 0x2d8   : > { %v5977_v50 = vpop.permute.xlu1 %5976 }
 0x2d9   : > { %v5988_v4 = vsel %vm5982_vm12, %v5977_v50, %v5979_v41  ;;  %v5987_v0 = vsel %vm5982_vm12, %v5975_v24, %v5977_v50 }
 0x2da   : > { %8029 = vmatmul.mubr.msk.bf16.vlgmr.msra.gmra.mrb[8].mxu0 %vm823_vm3, %v8027_v42  ;;  %v6012_v15 = vsel %vm827_vm2, %v5987_v0, 0 }
 0x2db   : > { %8031 = vmatmul.mubr.msk.bf16.vlgmr.msra.gmra.mrb[8].mxu1 %vm823_vm3, %v8027_v42  ;;  %5877 = vmatpush1.bf16.msra.mxu0 %v5784_v48  ;;  %v6199_v54 = vpop.permute.xlu0 %6198 }
 0x2dc   : > { %5918 = vmatpush1.bf16.msra.mxu1 %v5790_v51  ;;  %8037 = vmatprep.subr.msk.bf16.mxu0 %vm827_vm2, %v5984_v53  ;;  %v5981_v57 = vpop.permute.xlu1 %5980 }
 0x2dd   : > { %8039 = vmatprep.subr.msk.bf16.mxu1 %vm827_vm2, %v5986_v56  ;;  %5908 = vmatprep.mubr.bf16.mxu0 %v8565_v1  ;;  %v5993_v3 = vsel %vm5982_vm12, %v5981_v57, %v9858_v12  ;;  %v5989_v12 = vsel %vm5982_vm12, %v5979_v41, %v5981_v57  ;;  %v8045_v41 = vld [vmem:[%s10410_s5 + $0x60] sm:$0xf] }
 0x2de   : > { %5949 = vmatprep.mubr.bf16.mxu1 %v8565_v1  ;;  %v6018_v17 = vsel %vm827_vm2, %v5989_v12, 0 }
 0x2df   : > { %v6203_v60 = vpop.permute.xlu0 %6202 }
 0x2e0   : > { %v6197_v63 = vpop.permute.xlu1 %6196 }
 0x2e1   : > { %v6212_v31 = vsel %vm6210_vm13, %v6197_v63, %v6199_v54  ;;  %v6211_v23 = vsel %vm6210_vm13, %v9903_v30, %v6197_v63 }
 0x2e2   : > { %8033 = vmatmul.mubr.msk.bf16.vlgmr.msra.gmra.mrb[12].mxu0 %vm823_vm3, %v8027_v42  ;;  %v6228_v24 = vsel %vm827_vm2, %v6211_v23, 0  ;;  %v8063_v23 = vld [vmem:[%s10410_s5 + $0x68] sm:$0xf] }
 0x2e3   : > { %8035 = vmatmul.mubr.msk.bf16.vlgmr.msra.gmra.mrb[12].mxu1 %vm823_vm3, %v8027_v42  ;;  %6023 = vmatpush1.bf16.msra.mxu0 %v6000_v2  ;;  %v6207_v5 = vpop.permute.xlu0 %6206  ;;  %v8054_v2 = vld [vmem:[%s10410_s5 + $0x64] sm:$0xf] }
 0x2e4   : > { %6064 = vmatpush1.bf16.msra.mxu1 %v6006_v62  ;;  %8041 = vmatprep.subr.msk.bf16.mxu0 %vm827_vm2, %v5988_v4  ;;  %v6201_v7 = vpop.permute.xlu1 %6200 }
 0x2e5   : > { %8043 = vmatprep.subr.msk.bf16.mxu1 %vm827_vm2, %v5993_v3  ;;  %6054 = vmatprep.mubr.bf16.mxu0 %v8565_v1  ;;  %v6214_v18 = vsel %vm6210_vm13, %v6201_v7, %v6203_v60  ;;  %v6213_v49 = vsel %vm6210_vm13, %v6199_v54, %v6201_v7 }
 0x2e6   : > { %6095 = vmatprep.mubr.bf16.mxu1 %v8565_v1  ;;  %v6234_v26 = vsel %vm827_vm2, %v6213_v49, 0 }
 0x2e7   : > { %v9937_v9 = vpop.permute.xlu0 %6422 }
 0x2e8   : > { %v6205_v14 = vpop.permute.xlu1 %6204 }
 0x2e9   : > { %v6216_v33 = vsel %vm6210_vm13, %v6205_v14, %v6207_v5  ;;  %v6215_v37 = vsel %vm6210_vm13, %v6203_v60, %v6205_v14 }
 0x2ea   : > { %8038 = vmatmul.mubr.msk.bf16.vlgmr.msra.gmra.mrb[8].mxu0 %vm823_vm3, %v8036_v13  ;;  %v6240_v43 = vsel %vm827_vm2, %v6215_v37, 0 }
 0x2eb   : > { %8040 = vmatmul.mubr.msk.bf16.vlgmr.msra.gmra.mrb[8].mxu1 %vm823_vm3, %v8036_v13  ;;  %6105 = vmatpush1.bf16.msra.mxu0 %v6012_v15  ;;  %v6427_v22 = vpop.permute.xlu0 %6426 }
 0x2ec   : > { %6146 = vmatpush1.bf16.msra.mxu1 %v6018_v17  ;;  %8046 = vmatprep.subr.msk.bf16.mxu0 %vm827_vm2, %v6212_v31  ;;  %v6209_v19 = vpop.permute.xlu1 %6208 }
 0x2ed   : > { %8048 = vmatprep.subr.msk.bf16.mxu1 %vm827_vm2, %v6214_v18  ;;  %6136 = vmatprep.mubr.bf16.mxu0 %v8565_v1  ;;  %v6221_v29 = vsel %vm6210_vm13, %v6209_v19, %v9903_v30  ;;  %v6217_v32 = vsel %vm6210_vm13, %v6207_v5, %v6209_v19 }
 0x2ee   : > { %6177 = vmatprep.mubr.bf16.mxu1 %v8565_v1  ;;  %v6246_v30 = vsel %vm827_vm2, %v6217_v32, 0 }
 0x2ef   : > { %v6431_v28 = vpop.permute.xlu0 %6430 }
 0x2f0   : > { %v6425_v8 = vpop.permute.xlu1 %6424 }
 0x2f1   : > { %v6440_v42 = vsel %vm6438_vm14, %v6425_v8, %v6427_v22  ;;  %v6439_v50 = vsel %vm6438_vm14, %v9937_v9, %v6425_v8 }
 0x2f2   : > { %8042 = vmatmul.mubr.msk.bf16.vlgmr.msra.gmra.mrb[12].mxu0 %vm823_vm3, %v8036_v13  ;;  %v6456_v54 = vsel %vm827_vm2, %v6439_v50, 0 }
 0x2f3   : > { %8044 = vmatmul.mubr.msk.bf16.vlgmr.msra.gmra.mrb[12].mxu1 %vm823_vm3, %v8036_v13  ;;  %6251 = vmatpush1.bf16.msra.mxu0 %v6228_v24  ;;  %v6435_v39 = vpop.permute.xlu0 %6434 }
 0x2f4   : > { %6292 = vmatpush1.bf16.msra.mxu1 %v6234_v26  ;;  %8050 = vmatprep.subr.msk.bf16.mxu0 %vm827_vm2, %v6216_v33  ;;  %v6429_v36 = vpop.permute.xlu1 %6428 }
 0x2f5   : > { %8052 = vmatprep.subr.msk.bf16.mxu1 %vm827_vm2, %v6221_v29  ;;  %6282 = vmatprep.mubr.bf16.mxu0 %v8565_v1  ;;  %v6442_v44 = vsel %vm6438_vm14, %v6429_v36, %v6431_v28  ;;  %v6441_v51 = vsel %vm6438_vm14, %v6427_v22, %v6429_v36 }
 0x2f6   : > { %6323 = vmatprep.mubr.bf16.mxu1 %v8565_v1  ;;  %v6462_v56 = vsel %vm827_vm2, %v6441_v51, 0 }
 0x2f7   : > { %v6651_v48 = vpop.permute.xlu0 %6650 }
 0x2f8   : > { %v6433_v34 = vpop.permute.xlu1 %6432 }
 0x2f9   : > { %v6444_v57 = vsel %vm6438_vm14, %v6433_v34, %v6435_v39  ;;  %v6443_v63 = vsel %vm6438_vm14, %v6431_v28, %v6433_v34 }
 0x2fa   : > { %8047 = vmatmul.mubr.msk.bf16.vlgmr.msra.gmra.mrb[8].mxu0 %vm823_vm3, %v8045_v41  ;;  %v6468_v4 = vsel %vm827_vm2, %v6443_v63, 0 }
 0x2fb   : > { %8049 = vmatmul.mubr.msk.bf16.vlgmr.msra.gmra.mrb[8].mxu1 %vm823_vm3, %v8045_v41  ;;  %6333 = vmatpush1.bf16.msra.mxu0 %v6240_v43  ;;  %v6655_v60 = vpop.permute.xlu0 %6654 }
 0x2fc   : > { %6374 = vmatpush1.bf16.msra.mxu1 %v6246_v30  ;;  %8055 = vmatprep.subr.msk.bf16.mxu0 %vm827_vm2, %v6440_v42  ;;  %v6437_v45 = vpop.permute.xlu1 %6436 }
 0x2fd   : > { %8057 = vmatprep.subr.msk.bf16.mxu1 %vm827_vm2, %v6442_v44  ;;  %6364 = vmatprep.mubr.bf16.mxu0 %v8565_v1  ;;  %v6449_v58 = vsel %vm6438_vm14, %v6437_v45, %v9937_v9  ;;  %v6445_v62 = vsel %vm6438_vm14, %v6435_v39, %v6437_v45 }
 0x2fe   : > { %6405 = vmatprep.mubr.bf16.mxu1 %v8565_v1  ;;  %v6474_v5 = vsel %vm827_vm2, %v6445_v62, 0 }
 0x2ff   : > { %v6659_v7 = vpop.permute.xlu0 %6658 }
 0x300   : > { %v6653_v53 = vpop.permute.xlu1 %6652 }
 0x301   : > { %v6668_v3 = vsel %vm6666_vm15, %v6653_v53, %v6655_v60  ;;  %v6667_v13 = vsel %vm6666_vm15, %v6651_v48, %v6653_v53 }
 0x302   : > { %8051 = vmatmul.mubr.msk.bf16.vlgmr.msra.gmra.mrb[12].mxu0 %vm823_vm3, %v8045_v41  ;;  %v6684_v15 = vsel %vm827_vm2, %v6667_v13, 0 }
 0x303   : > { %8053 = vmatmul.mubr.msk.bf16.vlgmr.msra.gmra.mrb[12].mxu1 %vm823_vm3, %v8045_v41  ;;  %6479 = vmatpush1.bf16.msra.mxu0 %v6456_v54  ;;  %v6663_v17 = vpop.permute.xlu0 %6662 }
 0x304   : > { %6520 = vmatpush1.bf16.msra.mxu1 %v6462_v56  ;;  %8059 = vmatprep.subr.msk.bf16.mxu0 %vm827_vm2, %v6444_v57  ;;  %v6657_v61 = vpop.permute.xlu1 %6656 }
 0x305   : > { %8061 = vmatprep.subr.msk.bf16.mxu1 %vm827_vm2, %v6449_v58  ;;  %6510 = vmatprep.mubr.bf16.mxu0 %v8565_v1  ;;  %v6670_v9 = vsel %vm6666_vm15, %v6657_v61, %v6659_v7  ;;  %v6669_v12 = vsel %vm6666_vm15, %v6655_v60, %v6657_v61 }
 0x306   : > { %6551 = vmatprep.mubr.bf16.mxu1 %v8565_v1  ;;  %v6690_v31 = vsel %vm827_vm2, %v6669_v12, 0 }
 0x308   : > { %v6661_v0 = vpop.permute.xlu1 %6660 }
 0x309   : > { %v6672_v18 = vsel %vm6666_vm15, %v6661_v0, %v6663_v17  ;;  %v6671_v22 = vsel %vm6666_vm15, %v6659_v7, %v6661_v0 }
 0x30a   : > { %8056 = vmatmul.mubr.msk.bf16.vlgmr.msra.gmra.mrb[8].mxu0 %vm823_vm3, %v8054_v2  ;;  %v6696_v8 = vsel %vm827_vm2, %v6671_v22, 0 }
 0x30b   : > { %8058 = vmatmul.mubr.msk.bf16.vlgmr.msra.gmra.mrb[8].mxu1 %vm823_vm3, %v8054_v2  ;;  %6561 = vmatpush1.bf16.msra.mxu0 %v6468_v4 }
 0x30c   : > { %6602 = vmatpush1.bf16.msra.mxu1 %v6474_v5  ;;  %8064 = vmatprep.subr.msk.bf16.mxu0 %vm827_vm2, %v6668_v3  ;;  %v6665_v14 = vpop.permute.xlu1 %6664 }
 0x30d   : > { %8066 = vmatprep.subr.msk.bf16.mxu1 %vm827_vm2, %v6670_v9  ;;  %6592 = vmatprep.mubr.bf16.mxu0 %v8565_v1  ;;  %v6677_v19 = vsel %vm6666_vm15, %v6665_v14, %v6651_v48  ;;  %v6673_v49 = vsel %vm6666_vm15, %v6663_v17, %v6665_v14  ;;  %v8553_v14 = vld [vmem:[%s10413_s8] sm:$0xff]  }
 0x30e   : > { %6633 = vmatprep.mubr.bf16.mxu1 %v8565_v1  ;;  %v6702_v24 = vsel %vm827_vm2, %v6673_v49, 0 }
 0x312   : > { %8060 = vmatmul.mubr.msk.bf16.vlgmr.msra.gmra.mrb[12].mxu0 %vm823_vm3, %v8054_v2 }
 0x313   : > { %8062 = vmatmul.mubr.msk.bf16.vlgmr.msra.gmra.mrb[12].mxu1 %vm823_vm3, %v8054_v2  ;;  %6707 = vmatpush1.bf16.msra.mxu0 %v6684_v15 }
 0x314   : > { %6748 = vmatpush1.bf16.msra.mxu1 %v6690_v31  ;;  %8068 = vmatprep.subr.msk.bf16.mxu0 %vm827_vm2, %v6672_v18  ;;  %v6882_v26 = vpop.permute.xlu0 %6881 }
 0x315   : > { %8070 = vmatprep.subr.msk.bf16.mxu1 %vm827_vm2, %v6677_v19  ;;  %6738 = vmatprep.mubr.bf16.mxu0 %v8565_v1 }
 0x316   : > { %6779 = vmatprep.mubr.bf16.mxu1 %v8565_v1 }
 0x31a   : > { %8065 = vmatmul.mubr.msk.bf16.vlgmr.msra.gmra.mrb[8].mxu0 %vm823_vm3, %v8063_v23 }
 0x31b   : > { %8067 = vmatmul.mubr.msk.bf16.vlgmr.msra.gmra.mrb[8].mxu1 %vm823_vm3, %v8063_v23  ;;  %6789 = vmatpush1.bf16.msra.mxu0 %v6696_v8 }
 0x31c   : > { %6830 = vmatpush1.bf16.msra.mxu1 %v6702_v24  ;;  %6820 = vmatprep.mubr.bf16.mxu0 %v8565_v1 }
 0x31d   : > { %6861 = vmatprep.mubr.bf16.mxu1 %v8565_v1 }
 0x31e   : > { %v6896_v33 = vpop.permute.xlu1 %6895 }
 0x322   : > { %8069 = vmatmul.mubr.msk.bf16.vlgmr.msra.gmra.mrb[12].mxu0 %vm823_vm3, %v8063_v23 }
 0x323   : > { %8071 = vmatmul.mubr.msk.bf16.vlgmr.msra.gmra.mrb[12].mxu1 %vm823_vm3, %v8063_v23  ;;  %6998 = vmatprep.mubr.bf16.mxu0 %v8565_v1 }
 0x324   : > { %7051 = vmatprep.mubr.bf16.mxu1 %v8565_v1 }
 0x3ed   : > { %v6740_v28 = vpop.f32.mrb[8].mxu0 }
 0x3ee   : > { %v6884_v29 = vmul.f32 %v6882_v26, %v6740_v28  ;;  %v6781_v36 = vpop.f32.mrb[8].mxu1  ;;  %v6742_v37 = vpop.f32.mrb[9].mxu0 }
 0x3ef   : > { %v6886_v41 = vmul.f32 %v6882_v26, %v6781_v36  ;;  %v6885_v32 = vmul.f32 %v6882_v26, %v6742_v37  ;;  %v6783_v34 = vpop.f32.mrb[9].mxu1  ;;  %v6744_v39 = vpop.f32.mrb[10].mxu0 }
 0x3f0   : > { %v6898_v43 = vadd.f32 %v6896_v33, %v6884_v29  ;;  %v6887_v30 = vmul.f32 %v6882_v26, %v6783_v34  ;;  %v6785_v42 = vpop.f32.mrb[10].mxu1  ;;  %v6745_v44 = vpop.f32.mrb[11].mxu0  ;;  %v8554_v34 = vld [vmem:[%s10413_s8 + $0x8] sm:$0xff]  }
 0x3f1   : > { %v6900_v45 = vadd.f32 %v6896_v33, %v6886_v41  ;;  %v6899_v50 = vadd.f32 %v6896_v33, %v6885_v32  ;;  %v6786_v48 = vpop.f32.mrb[11].mxu1 }
 0x3f2   : > { %v6906_v51 = vmax.f32 %v6898_v43, 0.0  ;;  %v6901_v53 = vadd.f32 %v6896_v33, %v6887_v30 }
 0x3f3   : > { %v6908_v54 = vmax.f32 %v6900_v45, 0.0  ;;  %v6907_v56 = vmax.f32 %v6899_v50, 0.0 }
 0x3f4   : > { %v6918_v57 = vpack.c.bf16 %v6906_v51, %v6906_v51  ;;  %v6909_v58 = vmax.f32 %v6901_v53, 0.0 }
 0x3f5   : > { %v6920_v60 = vpack.c.bf16 %v6908_v54, %v6908_v54  ;;  %v6919_v61 = vpack.c.bf16 %v6907_v56, %v6907_v56  ;;  %v6822_v63 = vpop.f32.mrb[12].mxu0 }
 0x3f6   : > { %v6921_v2 = vpack.c.bf16 %v6909_v58, %v6909_v58  ;;  %v6888_v62 = vmul.f32 %v6882_v26, %v6822_v63  ;;  %v6863_v4 = vpop.f32.mrb[12].mxu1  ;;  %v6824_v5 = vpop.f32.mrb[13].mxu0  ;;  %v6943_v3 = vsel %vm827_vm2, %v6918_v57, 0 }
 0x3f7   : > { %v6890_v7 = vmul.f32 %v6882_v26, %v6863_v4  ;;  %v6889_v0 = vmul.f32 %v6882_v26, %v6824_v5  ;;  %v6865_v9 = vpop.f32.mrb[13].mxu1  ;;  %v6826_v13 = vpop.f32.mrb[14].mxu0  ;;  %8074 = vmatprep.subr.msk.bf16.mxu0 %vm827_vm2, %v6919_v61  ;;  %v6949_v12 = vsel %vm827_vm2, %v6920_v60, 0 }
 0x3f8   : > { %v6902_v15 = vadd.f32 %v6896_v33, %v6888_v62  ;;  %v6891_v17 = vmul.f32 %v6882_v26, %v6865_v9  ;;  %v6867_v31 = vpop.f32.mrb[14].mxu1  ;;  %8077 = vmatprep.subr.msk.bf16.mxu1 %vm827_vm2, %v6921_v2  ;;  %v6827_v18 = vpop.f32.mrb[15].mxu0  ;;  %6967 = vmatpush1.bf16.msra.mxu0 %v6943_v3 }
 0x3f9   : > { %v6904_v19 = vadd.f32 %v6896_v33, %v6890_v7  ;;  %v6903_v22 = vadd.f32 %v6896_v33, %v6889_v0  ;;  %v6868_v23 = vpop.f32.mrb[15].mxu1  ;;  %7020 = vmatpush1.bf16.msra.mxu1 %v6949_v12 }
 0x3fa   : > { %v6910_v49 = vmax.f32 %v6902_v15, 0.0  ;;  %v6905_v8 = vadd.f32 %v6896_v33, %v6891_v17 }
 0x3fb   : > { %v6912_v24 = vmax.f32 %v6904_v19, 0.0  ;;  %v6911_v28 = vmax.f32 %v6903_v22, 0.0  ;;  %8075 = vmatmul.mubr.msk.bf16.vlgmr.msra.gmra.mrb[16].mxu0 %vm823_vm3, %v8553_v14 }
 0x3fc   : > { %v6922_v29 = vpack.c.bf16 %v6910_v49, %v6910_v49  ;;  %v6913_v36 = vmax.f32 %v6905_v8, 0.0  ;;  %8078 = vmatmul.mubr.msk.bf16.vlgmr.msra.gmra.mrb[16].mxu1 %vm823_vm3, %v8553_v14  ;;  %7008 = vmatprep.mubr.bf16.mxu0 %v8565_v1 }
 0x3fd   : > { %v6924_v26 = vpack.c.bf16 %v6912_v24, %v6912_v24  ;;  %v6923_v37 = vpack.c.bf16 %v6911_v28, %v6911_v28  ;;  %7061 = vmatprep.mubr.bf16.mxu1 %v8565_v1 }
 0x3fe   : > { %v6925_v41 = vpack.c.bf16 %v6913_v36, %v6913_v36  ;;  %v6955_v32 = vsel %vm827_vm2, %v6922_v29, 0 }
 0x3ff   : > { %8080 = vmatprep.subr.msk.bf16.mxu0 %vm827_vm2, %v6923_v37  ;;  %v6961_v33 = vsel %vm827_vm2, %v6924_v26, 0 }
 0x400   : > { %8083 = vmatprep.subr.msk.bf16.mxu1 %vm827_vm2, %v6925_v41  ;;  %7073 = vmatpush1.bf16.msra.mxu0 %v6955_v32 }
 0x401   : > { %7126 = vmatpush1.bf16.msra.mxu1 %v6961_v33  ;;  %7310 = vmatprep.subr.bf16.mxu0 %v8691_v6  ;;  %v8555_v6 = vld [vmem:[%s10416_s11] sm:$0xff]  }
 0x402   : > { %7363 = vmatprep.subr.bf16.mxu1 %v8693_v10  ;;  %v8556_v10 = vld [vmem:[%s10416_s11 + $0x8] sm:$0xff]  }
 0x403   : > { %8076 = vmatmul.mubr.msk.bf16.gmra.mrb[20].mxu0 %vm823_vm3, %v8554_v34 }
 0x404   : > { %8079 = vmatmul.mubr.msk.bf16.gmra.mrb[20].mxu1 %vm823_vm3, %v8554_v34  ;;  %7104 = vmatprep.mubr.bf16.mxu0 %v8565_v1 }
 0x405   : > { %7157 = vmatprep.mubr.bf16.mxu1 %v8565_v1 }
 0x40b   : > { %8081 = vmatmul.mubr.msk.bf16.vlgmr.msra.gmra.mrb[24].mxu0 %vm823_vm3, %v8553_v14 }
 0x40c   : > { %8084 = vmatmul.mubr.msk.bf16.vlgmr.msra.gmra.mrb[24].mxu1 %vm823_vm3, %v8553_v14  ;;  %7311 = vmatpush1.bf16.msra.mxu0 %v8695_v11  ;;  %v10096_v11 = vpop.permute.xlu0 %7184 }
 0x40d   : > { %7364 = vmatpush1.bf16.msra.mxu1 %v8701_v16  ;;  %7114 = vmatprep.mubr.bf16.mxu0 %v8565_v1  ;;  %v10098_v16 = vpop.permute.xlu1 %7189 }
 0x40e   : > { %7167 = vmatprep.mubr.bf16.mxu1 %v8565_v1  ;;  %7416 = vmatprep.subr.bf16.mxu0 %v8705_v20 }
 0x40f   : > { %7469 = vmatprep.subr.bf16.mxu1 %v8707_v21 }
 0x410   : > { %v10100_v20 = vpop.permute.xlu0 %7194 }
 0x411   : > { %v10102_v21 = vpop.permute.xlu1 %7199 }
 0x413   : > { %8082 = vmatmul.mubr.msk.bf16.gmra.mrb[28].mxu0 %vm823_vm3, %v8554_v34 }
 0x414   : > { %8085 = vmatmul.mubr.msk.bf16.gmra.mrb[28].mxu1 %vm823_vm3, %v8554_v34  ;;  %7342 = vmatprep.mubr.bf16.mxu0 %v8565_v1 }
 0x415   : > { %7395 = vmatprep.mubr.bf16.mxu1 %v8565_v1 }
 0x41b   : > { %8088 = vmatmul.mubr.msk.bf16.vlgmr.msra.gmra.mrb[32].mxu0 %vm495_vm0, %v8555_v6 }
 0x41c   : > { %8090 = vmatmul.mubr.msk.bf16.vlgmr.msra.gmra.mrb[32].mxu1 %vm495_vm0, %v8555_v6  ;;  %7417 = vmatpush1.bf16.msra.mxu0 %v8710_v25  ;;  %v10104_v25 = vpop.permute.xlu0 %7528 }
 0x41d   : > { %7470 = vmatpush1.bf16.msra.mxu1 %v8714_v27  ;;  %7352 = vmatprep.mubr.bf16.mxu0 %v8565_v1  ;;  %v10106_v27 = vpop.permute.xlu1 %7533 }
 0x41e   : > { %7405 = vmatprep.mubr.bf16.mxu1 %v8565_v1 }
 0x420   : > { %v10108_v48 = vpop.permute.xlu0 %7538 }
 0x421   : > { %v10110_v51 = vpop.permute.xlu1 %7543 }
 0x423   : > { %8089 = vmatmul.mubr.msk.bf16.gmra.mrb[36].mxu0 %vm495_vm0, %v8556_v10 }
 0x424   : > { %8091 = vmatmul.mubr.msk.bf16.gmra.mrb[36].mxu1 %vm495_vm0, %v8556_v10  ;;  %7448 = vmatprep.mubr.bf16.mxu0 %v8565_v1  ;;  %v10112_v2 = vpop.permute.xlu0 %7240 }
 0x425   : > { %7501 = vmatprep.mubr.bf16.mxu1 %v8565_v1  ;;  %v10114_v62 = vpop.permute.xlu1 %7245 }
 0x428   : > { %v7251_v33 = vpop.permute.xlu0 %7250 }
 0x42b   : > { %8092 = vmatmul.mubr.msk.bf16.vlgmr.msra.gmra.mrb[40].mxu0 %vm495_vm0, %v8555_v6 }
 0x42c   : > { %8094 = vmatmul.mubr.msk.bf16.vlgmr.msra.gmra.mrb[40].mxu1 %vm495_vm0, %v8555_v6  ;;  %7458 = vmatprep.mubr.bf16.mxu0 %v8565_v1 }
 0x42d   : > { %7511 = vmatprep.mubr.bf16.mxu1 %v8565_v1 }
 0x433   : > { %8093 = vmatmul.mubr.msk.bf16.gmra.mrb[44].mxu0 %vm495_vm0, %v8556_v10 }
 0x434   : > { %8095 = vmatmul.mubr.msk.bf16.gmra.mrb[44].mxu1 %vm495_vm0, %v8556_v10 }
 0x4ce   : > { %v7000_v39 = vpop.f32.mrb[16].mxu0 }
 0x4cf   : > { %v7053_v43 = vpop.f32.mrb[16].mxu1  ;;  %v7002_v30 = vpop.f32.mrb[17].mxu0  ;;  %v7202_v5 = vmul.f32 %v10096_v11, %v7000_v39 }
 0x4d0   : > { %v7055_v1 = vpop.f32.mrb[17].mxu1  ;;  %v7004_v42 = vpop.f32.mrb[18].mxu0  ;;  %v7204_v0 = vmul.f32 %v10096_v11, %v7053_v43  ;;  %v7203_v9 = vmul.f32 %v10096_v11, %v7002_v30 }
 0x4d1   : > { %v7057_v44 = vpop.f32.mrb[18].mxu1  ;;  %v7006_v45 = vpop.f32.mrb[19].mxu0  ;;  %v7205_v14 = vmul.f32 %v10096_v11, %v7055_v1  ;;  %v7210_v15 = vmul.f32 %v10098_v16, %v7004_v42  ;;  %v10127_v24 = vadd.f32 %v10112_v2, %v7202_v5 }
 0x4d2   : > { %v7059_v50 = vpop.f32.mrb[19].mxu1  ;;  %v7212_v17 = vmul.f32 %v10098_v16, %v7057_v44  ;;  %v7211_v19 = vmul.f32 %v10098_v16, %v7006_v45  ;;  %v10133_v26 = vadd.f32 %v10112_v2, %v7204_v0  ;;  %v10136_v37 = vadd.f32 %v10112_v2, %v7203_v9  ;;  %v7256_v43 = vpop.permute.xlu1 %7255 }
 0x4d3   : > { %v7213_v22 = vmul.f32 %v10098_v16, %v7059_v50  ;;  %v10141_v34 = vadd.f32 %v10112_v2, %v7205_v14  ;;  %v10144_v6 = vadd.f32 %v10114_v62, %v7210_v15 }
 0x4d4   : > { %v10147_v10 = vadd.f32 %v10114_v62, %v7212_v17  ;;  %v10151_v30 = vadd.f32 %v10114_v62, %v7211_v19 }
 0x4d5   : > { %v10154_v1 = vadd.f32 %v10114_v62, %v7213_v22 }
 0x4d6   : > { %v7010_v53 = vpop.f32.mrb[20].mxu0 }
 0x4d7   : > { %v7063_v54 = vpop.f32.mrb[20].mxu1  ;;  %v7012_v56 = vpop.f32.mrb[21].mxu0  ;;  %v7218_v23 = vmul.f32 %v10100_v20, %v7010_v53 }
 0x4d8   : > { %v7065_v57 = vpop.f32.mrb[21].mxu1  ;;  %v7014_v58 = vpop.f32.mrb[22].mxu0  ;;  %v7220_v49 = vmul.f32 %v10100_v20, %v7063_v54  ;;  %v7219_v28 = vmul.f32 %v10100_v20, %v7012_v56 }
 0x4d9   : > { %v7067_v60 = vpop.f32.mrb[22].mxu1  ;;  %v7016_v61 = vpop.f32.mrb[23].mxu0  ;;  %v7221_v29 = vmul.f32 %v10100_v20, %v7065_v57  ;;  %v7226_v36 = vmul.f32 %v10102_v21, %v7014_v58  ;;  %v10156_v42 = vadd.f32 %v7251_v33, %v7218_v23 }
 0x4da   : > { %v7069_v63 = vpop.f32.mrb[23].mxu1  ;;  %v7228_v41 = vmul.f32 %v10102_v21, %v7067_v60  ;;  %v7227_v32 = vmul.f32 %v10102_v21, %v7016_v61  ;;  %v10158_v44 = vadd.f32 %v7251_v33, %v7220_v49  ;;  %v10160_v50 = vadd.f32 %v7251_v33, %v7219_v28 }
 0x4db   : > { %v7229_v39 = vmul.f32 %v10102_v21, %v7069_v63  ;;  %v10162_v53 = vadd.f32 %v7251_v33, %v7221_v29  ;;  %v10164_v54 = vadd.f32 %v7256_v43, %v7226_v36 }
 0x4dc   : > { %v10167_v60 = vadd.f32 %v7256_v43, %v7228_v41  ;;  %v10169_v61 = vadd.f32 %v7256_v43, %v7227_v32 }
 0x4dd   : > { %v10173_v14 = vadd.f32 %v7256_v43, %v7229_v39  ;;  %v10206_v39 = vpop.permute.xlu0 %7584 }
 0x4de   : > { %v7106_v4 = vpop.f32.mrb[24].mxu0 }
 0x4df   : > { %v7159_v3 = vpop.f32.mrb[24].mxu1  ;;  %v7108_v7 = vpop.f32.mrb[25].mxu0  ;;  %v7206_v56 = vmul.f32 %v10096_v11, %v7106_v4 }
 0x4e0   : > { %v7161_v13 = vpop.f32.mrb[25].mxu1  ;;  %v7110_v12 = vpop.f32.mrb[26].mxu0  ;;  %v7208_v63 = vmul.f32 %v10096_v11, %v7159_v3  ;;  %v7207_v5 = vmul.f32 %v10096_v11, %v7108_v7 }
 0x4e1   : > { %v7163_v31 = vpop.f32.mrb[26].mxu1  ;;  %v7112_v18 = vpop.f32.mrb[27].mxu0  ;;  %v7209_v15 = vmul.f32 %v10096_v11, %v7161_v13  ;;  %v7214_v17 = vmul.f32 %v10098_v16, %v7110_v12  ;;  %v10183_v29 = vadd.f32 %v10112_v2, %v7206_v56 }
 0x4e2   : > { %v7165_v8 = vpop.f32.mrb[27].mxu1  ;;  %v7216_v4 = vmul.f32 %v10098_v16, %v7163_v31  ;;  %v7215_v23 = vmul.f32 %v10098_v16, %v7112_v18  ;;  %v10189_v31 = vadd.f32 %v10112_v2, %v7208_v63  ;;  %v10192_v18 = vadd.f32 %v10112_v2, %v7207_v5 }
 0x4e3   : > { %v7217_v49 = vmul.f32 %v10098_v16, %v7165_v8  ;;  %v10197_v36 = vadd.f32 %v10112_v2, %v7209_v15  ;;  %v10200_v41 = vadd.f32 %v10114_v62, %v7214_v17 }
 0x4e5   : > { %v10212_v56 = vadd.f32 %v10114_v62, %v7217_v49 }
 0x4e6   : > { %v7116_v45 = vpop.f32.mrb[28].mxu0 }
 0x4e7   : > { %v7169_v57 = vpop.f32.mrb[28].mxu1  ;;  %v7118_v58 = vpop.f32.mrb[29].mxu0  ;;  %v7222_v3 = vmul.f32 %v10100_v20, %v7116_v45  ;;  %v10209_v45 = vadd.f32 %v10114_v62, %v7215_v23 }
 0x4e8   : > { %v7171_v0 = vpop.f32.mrb[29].mxu1  ;;  %v7120_v9 = vpop.f32.mrb[30].mxu0  ;;  %v7224_v7 = vmul.f32 %v10100_v20, %v7169_v57  ;;  %v7223_v11 = vmul.f32 %v10100_v20, %v7118_v58 }
 0x4e9   : > { %v7173_v19 = vpop.f32.mrb[30].mxu1  ;;  %v7122_v22 = vpop.f32.mrb[31].mxu0  ;;  %v7225_v13 = vmul.f32 %v10100_v20, %v7171_v0  ;;  %v7230_v12 = vmul.f32 %v10102_v21, %v7120_v9  ;;  %v10203_v20 = vadd.f32 %v10114_v62, %v7216_v4  ;;  %v10214_v57 = vadd.f32 %v7251_v33, %v7222_v3 }
 0x4ea   : > { %v7175_v28 = vpop.f32.mrb[31].mxu1  ;;  %v7232_v16 = vmul.f32 %v10102_v21, %v7173_v19  ;;  %v7231_v8 = vmul.f32 %v10102_v21, %v7122_v22  ;;  %v10216_v2 = vadd.f32 %v7251_v33, %v7224_v7  ;;  %v10218_v63 = vadd.f32 %v7251_v33, %v7223_v11 }
 0x4eb   : > { %v7233_v32 = vmul.f32 %v10102_v21, %v7175_v28  ;;  %v10220_v5 = vadd.f32 %v7251_v33, %v7225_v13  ;;  %v10222_v0 = vadd.f32 %v7256_v43, %v7230_v12  ;;  %v10236_v13 = vpop.permute.xlu1 %7589 }
 0x4ec   : > { %v10225_v17 = vadd.f32 %v7256_v43, %v7232_v16  ;;  %v10227_v4 = vadd.f32 %v7256_v43, %v7231_v8 }
 0x4ed   : > { %v10231_v49 = vadd.f32 %v7256_v43, %v7233_v32 }
 0x4ee   : > { %v7344_v58 = vpop.f32.mrb[32].mxu0 }
 0x4ef   : > { %v7546_v21 = vmul.f32 %v10104_v25, %v7344_v58  ;;  %v7397_v9 = vpop.f32.mrb[32].mxu1  ;;  %v7346_v15 = vpop.f32.mrb[33].mxu0  ;;  %10420 = vst [vmem:[#allocation2_spill] sm:$0xff] %v10231_v49 }
 0x4f0   : > { %v7548_v62 = vmul.f32 %v10104_v25, %v7397_v9  ;;  %v7547_v19 = vmul.f32 %v10104_v25, %v7346_v15  ;;  %v7399_v22 = vpop.f32.mrb[33].mxu1  ;;  %v7348_v23 = vpop.f32.mrb[34].mxu0 }
 0x4f1   : > { %v7602_v33 = vadd.f32 %v10206_v39, %v7546_v21  ;;  %v7549_v3 = vmul.f32 %v10104_v25, %v7399_v22  ;;  %v7554_v7 = vmul.f32 %v10106_v27, %v7348_v23  ;;  %v7401_v28 = vpop.f32.mrb[34].mxu1  ;;  %v7350_v11 = vpop.f32.mrb[35].mxu0 }
 0x4f2   : > { %v7604_v12 = vadd.f32 %v10206_v39, %v7548_v62  ;;  %v7603_v16 = vadd.f32 %v10206_v39, %v7547_v19  ;;  %v7556_v8 = vmul.f32 %v10106_v27, %v7401_v28  ;;  %v7555_v58 = vmul.f32 %v10106_v27, %v7350_v11  ;;  %v7403_v43 = vpop.f32.mrb[35].mxu1 }
 0x4f3   : > { %v7634_v32 = vadd.f32 %v7602_v33, %v10127_v24  ;;  %v7605_v21 = vadd.f32 %v10206_v39, %v7549_v3  ;;  %v7610_v9 = vadd.f32 %v10236_v13, %v7554_v7  ;;  %v7557_v15 = vmul.f32 %v10106_v27, %v7403_v43 }
 0x4f4   : > { %v7636_v22 = vadd.f32 %v7604_v12, %v10133_v26  ;;  %v7635_v62 = vadd.f32 %v7603_v16, %v10136_v37  ;;  %v7612_v19 = vadd.f32 %v10236_v13, %v7556_v8  ;;  %v7611_v23 = vadd.f32 %v10236_v13, %v7555_v58 }
 0x4f5   : > { %v7666_v28 = vmax.f32 %v7634_v32, 0.0  ;;  %v7637_v11 = vadd.f32 %v7605_v21, %v10141_v34  ;;  %v7642_v49 = vadd.f32 %v7610_v9, %v10144_v6  ;;  %v7613_v24 = vadd.f32 %v10236_v13, %v7557_v15 }
 0x4f6   : > { %v7668_v33 = vmax.f32 %v7636_v22, 0.0  ;;  %v7667_v26 = vmax.f32 %v7635_v62, 0.0  ;;  %v7644_v37 = vadd.f32 %v7612_v19, %v10147_v10  ;;  %v7643_v3 = vadd.f32 %v7611_v23, %v10151_v30  ;;  %v7354_v7 = vpop.f32.mrb[36].mxu0  ;;  %v10269_v23 = vpop.permute.xlu0 %7594 }
 0x4f7   : > { %v7698_v12 = vmul.f32 %v7666_v28, %v8741_v46  ;;  %v7669_v34 = vmax.f32 %v7637_v11, 0.0  ;;  %v7674_v16 = vmax.f32 %v7642_v49, 0.0  ;;  %v7645_v6 = vadd.f32 %v7613_v24, %v10154_v1  ;;  %v7407_v8 = vpop.f32.mrb[36].mxu1  ;;  %v7356_v58 = vpop.f32.mrb[37].mxu0 }
 0x4f8   : > { %v7700_v43 = vmul.f32 %v7668_v33, %v8749_v55  ;;  %v7699_v32 = vmul.f32 %v7667_v26, %v8746_v52  ;;  %v7676_v21 = vmax.f32 %v7644_v37, 0.0  ;;  %v7675_v9 = vmax.f32 %v7643_v3, 0.0  ;;  %v7409_v10 = vpop.f32.mrb[37].mxu1  ;;  %v7358_v15 = vpop.f32.mrb[38].mxu0 }
 0x4f9   : > { %7730 = vst [vmem:[%s10257_s27] sm:$0xff] %v7698_v12  ;;  %v7701_v30 = vmul.f32 %v7669_v34, %v8753_v59  ;;  %v7706_v49 = vmul.f32 %v7674_v16, %v8741_v46  ;;  %v7677_v1 = vmax.f32 %v7645_v6, 0.0  ;;  %v7562_v22 = vmul.f32 %v10108_v48, %v7354_v7  ;;  %v7411_v62 = vpop.f32.mrb[38].mxu1  ;;  %v7360_v19 = vpop.f32.mrb[39].mxu0 }
 0x4fa   : > { %7732 = vst [vmem:[%s10257_s27 + $0x10] sm:$0xff] %v7700_v43  ;;  %7731 = vst [vmem:[%s10257_s27 + $0x8] sm:$0xff] %v7699_v32  ;;  %v7708_v28 = vmul.f32 %v7676_v21, %v8749_v55  ;;  %v7707_v11 = vmul.f32 %v7675_v9, %v8746_v52  ;;  %v7564_v24 = vmul.f32 %v10108_v48, %v7407_v8  ;;  %v7413_v26 = vpop.f32.mrb[39].mxu1  ;;  %v10283_v34 = vpop.permute.xlu1 %7599 }
 0x4fb   : > { %v7563_v33 = vmul.f32 %v10108_v48, %v7356_v58  ;;  %7733 = vst [vmem:[%s10257_s27 + $0x18] sm:$0xff] %v7701_v30  ;;  %7738 = vst [vmem:[%s10257_s27 + $0x40] sm:$0xff] %v7706_v49  ;;  %v7709_v37 = vmul.f32 %v7677_v1, %v8753_v59  ;;  %v7618_v3 = vadd.f32 %v10269_v23, %v7562_v22 }
 0x4fc   : > { %v7565_v7 = vmul.f32 %v10108_v48, %v7409_v10  ;;  %v7570_v12 = vmul.f32 %v10110_v51, %v7358_v15  ;;  %7740 = vst [vmem:[%s10257_s27 + $0x50] sm:$0xff] %v7708_v28  ;;  %7739 = vst [vmem:[%s10257_s27 + $0x48] sm:$0xff] %v7707_v11  ;;  %v7620_v16 = vadd.f32 %v10269_v23, %v7564_v24 }
 0x4fd   : > { %v7619_v6 = vadd.f32 %v10269_v23, %v7563_v33  ;;  %v7572_v8 = vmul.f32 %v10110_v51, %v7411_v62  ;;  %v7571_v58 = vmul.f32 %v10110_v51, %v7360_v19  ;;  %7741 = vst [vmem:[%s10257_s27 + $0x58] sm:$0xff] %v7709_v37  ;;  %v7650_v43 = vadd.f32 %v7618_v3, %v10156_v42 }
 0x4fe   : > { %v7621_v32 = vadd.f32 %v10269_v23, %v7565_v7  ;;  %v7626_v21 = vadd.f32 %v10283_v34, %v7570_v12  ;;  %v7573_v9 = vmul.f32 %v10110_v51, %v7413_v26  ;;  %v7652_v10 = vadd.f32 %v7620_v16, %v10158_v44  ;;  %v7450_v1 = vpop.f32.mrb[40].mxu0 }
 0x4ff   : > { %v7651_v15 = vadd.f32 %v7619_v6, %v10160_v50  ;;  %v7628_v30 = vadd.f32 %v10283_v34, %v7572_v8  ;;  %v7627_v49 = vadd.f32 %v10283_v34, %v7571_v58  ;;  %v7682_v22 = vmax.f32 %v7650_v43, 0.0  ;;  %v7503_v28 = vpop.f32.mrb[40].mxu1  ;;  %v7452_v11 = vpop.f32.mrb[41].mxu0 }
 0x500   : > { %v7653_v62 = vadd.f32 %v7621_v32, %v10162_v53  ;;  %v7658_v42 = vadd.f32 %v7626_v21, %v10164_v54  ;;  %v7629_v19 = vadd.f32 %v10283_v34, %v7573_v9  ;;  %v7684_v24 = vmax.f32 %v7652_v10, 0.0  ;;  %v7505_v26 = vpop.f32.mrb[41].mxu1  ;;  %v7454_v37 = vpop.f32.mrb[42].mxu0 }
 0x501   : > { %v7683_v33 = vmax.f32 %v7651_v15, 0.0  ;;  %v7660_v44 = vadd.f32 %v7628_v30, %v10167_v60  ;;  %v7659_v50 = vadd.f32 %v7627_v49, %v10169_v61  ;;  %v7714_v3 = vmul.f32 %v7682_v22, %v8741_v46  ;;  %v7507_v12 = vpop.f32.mrb[42].mxu1  ;;  %v7456_v16 = vpop.f32.mrb[43].mxu0 }
 0x502   : > { %v7685_v7 = vmax.f32 %v7653_v62, 0.0  ;;  %v7690_v53 = vmax.f32 %v7658_v42, 0.0  ;;  %v7661_v54 = vadd.f32 %v7629_v19, %v10173_v14  ;;  %v7716_v6 = vmul.f32 %v7684_v24, %v8749_v55  ;;  %v7509_v58 = vpop.f32.mrb[43].mxu1 }
 0x503   : > { %v7715_v8 = vmul.f32 %v7683_v33, %v8746_v52  ;;  %v7692_v60 = vmax.f32 %v7660_v44, 0.0  ;;  %v7691_v61 = vmax.f32 %v7659_v50, 0.0  ;;  %7746 = vst [vmem:[%s10257_s27 + $0x80] sm:$0xff] %v7714_v3  ;;  %v7550_v14 = vmul.f32 %v10104_v25, %v7450_v1 }
 0x504   : > { %v7717_v43 = vmul.f32 %v7685_v7, %v8753_v59  ;;  %v7722_v32 = vmul.f32 %v7690_v53, %v8741_v46  ;;  %v7693_v21 = vmax.f32 %v7661_v54, 0.0  ;;  %7748 = vst [vmem:[%s10257_s27 + $0x90] sm:$0xff] %v7716_v6  ;;  %v7552_v15 = vmul.f32 %v10104_v25, %v7503_v28 }
 0x505   : > { %7747 = vst [vmem:[%s10257_s27 + $0x88] sm:$0xff] %v7715_v8  ;;  %v7724_v9 = vmul.f32 %v7692_v60, %v8749_v55  ;;  %v7723_v10 = vmul.f32 %v7691_v61, %v8746_v52  ;;  %v7551_v30 = vmul.f32 %v10104_v25, %v7452_v11  ;;  %v7606_v46 = vadd.f32 %v10206_v39, %v7550_v14 }
 0x506   : > { %7749 = vst [vmem:[%s10257_s27 + $0x98] sm:$0xff] %v7717_v43  ;;  %7754 = vst [vmem:[%s10257_s27 + $0xc0] sm:$0xff] %v7722_v32  ;;  %v7725_v49 = vmul.f32 %v7693_v21, %v8753_v59  ;;  %v7553_v22 = vmul.f32 %v10104_v25, %v7505_v26  ;;  %v7558_v1 = vmul.f32 %v10106_v27, %v7454_v37  ;;  %v7460_v19 = vpop.f32.mrb[44].mxu0 }
 0x507   : > { %7756 = vst [vmem:[%s10257_s27 + $0xd0] sm:$0xff] %v7724_v9  ;;  %7755 = vst [vmem:[%s10257_s27 + $0xc8] sm:$0xff] %v7723_v10  ;;  %v7608_v55 = vadd.f32 %v10206_v39, %v7552_v15  ;;  %v7607_v52 = vadd.f32 %v10206_v39, %v7551_v30  ;;  %v7560_v62 = vmul.f32 %v10106_v27, %v7507_v12  ;;  %v7513_v24 = vpop.f32.mrb[44].mxu1  ;;  %v7462_v33 = vpop.f32.mrb[45].mxu0 }
 0x508   : > { %v7559_v42 = vmul.f32 %v10106_v27, %v7456_v16  ;;  %7757 = vst [vmem:[%s10257_s27 + $0xd8] sm:$0xff] %v7725_v49  ;;  %v7638_v59 = vadd.f32 %v7606_v46, %v10183_v29  ;;  %v7609_v28 = vadd.f32 %v10206_v39, %v7553_v22  ;;  %v7614_v25 = vadd.f32 %v10236_v13, %v7558_v1  ;;  %v7515_v3 = vpop.f32.mrb[45].mxu1  ;;  %v7464_v7 = vpop.f32.mrb[46].mxu0 }
 0x509   : > { %v7561_v11 = vmul.f32 %v10106_v27, %v7509_v58  ;;  %v7640_v44 = vadd.f32 %v7608_v55, %v10189_v31  ;;  %v7639_v50 = vadd.f32 %v7607_v52, %v10192_v18  ;;  %v7616_v26 = vadd.f32 %v10236_v13, %v7560_v62  ;;  %v7517_v27 = vpop.f32.mrb[46].mxu1  ;;  %v7466_v12 = vpop.f32.mrb[47].mxu0 }
 0x50a   : > { %v7615_v37 = vadd.f32 %v10236_v13, %v7559_v42  ;;  %v7670_v53 = vmax.f32 %v7638_v59, 0.0  ;;  %v7641_v29 = vadd.f32 %v7609_v28, %v10197_v36  ;;  %v7646_v39 = vadd.f32 %v7614_v25, %v10200_v41  ;;  %v7519_v8 = vpop.f32.mrb[47].mxu1 }
 0x50b   : > { %v7617_v54 = vadd.f32 %v10236_v13, %v7561_v11  ;;  %v7672_v16 = vmax.f32 %v7640_v44, 0.0  ;;  %v7671_v31 = vmax.f32 %v7639_v50, 0.0  ;;  %v7648_v18 = vadd.f32 %v7616_v26, %v10203_v20 }
 0x50c   : > { %v7647_v6 = vadd.f32 %v7615_v37, %v10209_v45  ;;  %v7702_v60 = vmul.f32 %v7670_v53, %v8785_v40  ;;  %v7673_v61 = vmax.f32 %v7641_v29, 0.0  ;;  %v7678_v36 = vmax.f32 %v7646_v39, 0.0 }
 0x50d   : > { %v7649_v41 = vadd.f32 %v7617_v54, %v10212_v56  ;;  %v7704_v13 = vmul.f32 %v7672_v16, %v8796_v47  ;;  %v7703_v58 = vmul.f32 %v7671_v31, %v8782_v38  ;;  %v7680_v43 = vmax.f32 %v7648_v18, 0.0 }
 0x50e   : > { %v7679_v32 = vmax.f32 %v7647_v6, 0.0  ;;  %7734 = vst [vmem:[%s10257_s27 + $0x20] sm:$0xff] %v7702_v60  ;;  %v7705_v20 = vmul.f32 %v7673_v61, %v8776_v35  ;;  %v7710_v45 = vmul.f32 %v7678_v36, %v8785_v40  ;;  %v7566_v14 = vmul.f32 %v10108_v48, %v7460_v19 }
 0x50f   : > { %v7681_v21 = vmax.f32 %v7649_v41, 0.0  ;;  %7736 = vst [vmem:[%s10257_s27 + $0x30] sm:$0xff] %v7704_v13  ;;  %7735 = vst [vmem:[%s10257_s27 + $0x28] sm:$0xff] %v7703_v58  ;;  %v7712_v56 = vmul.f32 %v7680_v43, %v8796_v47  ;;  %v7568_v10 = vmul.f32 %v10108_v48, %v7513_v24  ;;  %v7567_v15 = vmul.f32 %v10108_v48, %v7462_v33 }
 0x510   : > { %v7711_v9 = vmul.f32 %v7679_v32, %v8782_v38  ;;  %7737 = vst [vmem:[%s10257_s27 + $0x38] sm:$0xff] %v7705_v20  ;;  %7742 = vst [vmem:[%s10257_s27 + $0x60] sm:$0xff] %v7710_v45  ;;  %v7622_v49 = vadd.f32 %v10269_v23, %v7566_v14  ;;  %v7569_v46 = vmul.f32 %v10108_v48, %v7515_v3 }
 0x511   : > { %v7713_v30 = vmul.f32 %v7681_v21, %v8776_v35  ;;  %v7574_v22 = vmul.f32 %v10110_v51, %v7464_v7  ;;  %7744 = vst [vmem:[%s10257_s27 + $0x70] sm:$0xff] %v7712_v56  ;;  %v7624_v1 = vadd.f32 %v10269_v23, %v7568_v10  ;;  %v7623_v55 = vadd.f32 %v10269_v23, %v7567_v15  ;;  %v10421_v7 = vld [vmem:[#allocation2_spill] sm:$0xff] }
 0x512   : > { %7743 = vst [vmem:[%s10257_s27 + $0x68] sm:$0xff] %v7711_v9  ;;  %v7576_v52 = vmul.f32 %v10110_v51, %v7517_v27  ;;  %v7575_v62 = vmul.f32 %v10110_v51, %v7466_v12  ;;  %v7654_v42 = vadd.f32 %v7622_v49, %v10214_v57  ;;  %v7625_v19 = vadd.f32 %v10269_v23, %v7569_v46 }
 0x513   : > { %7745 = vst [vmem:[%s10257_s27 + $0x78] sm:$0xff] %v7713_v30  ;;  %v7630_v59 = vadd.f32 %v10283_v34, %v7574_v22  ;;  %v7577_v48 = vmul.f32 %v10110_v51, %v7519_v8  ;;  %v7656_v28 = vadd.f32 %v7624_v1, %v10216_v2  ;;  %v7655_v25 = vadd.f32 %v7623_v55, %v10218_v63 }
 0x514   : > { %v7632_v11 = vadd.f32 %v10283_v34, %v7576_v52  ;;  %v7631_v24 = vadd.f32 %v10283_v34, %v7575_v62  ;;  %v7686_v33 = vmax.f32 %v7654_v42, 0.0  ;;  %v7657_v44 = vadd.f32 %v7625_v19, %v10220_v5 }
 0x515   : > { %v7662_v57 = vadd.f32 %v7630_v59, %v10222_v0  ;;  %v7633_v23 = vadd.f32 %v10283_v34, %v7577_v48  ;;  %v7688_v50 = vmax.f32 %v7656_v28, 0.0  ;;  %v7687_v26 = vmax.f32 %v7655_v25, 0.0 }
 0x516   : > { %v7664_v51 = vadd.f32 %v7632_v11, %v10225_v17  ;;  %v7663_v2 = vadd.f32 %v7631_v24, %v10227_v4  ;;  %v7718_v63 = vmul.f32 %v7686_v33, %v8785_v40  ;;  %v7689_v37 = vmax.f32 %v7657_v44, 0.0 }
 0x517   : > { %v7694_v3 = vmax.f32 %v7662_v57, 0.0  ;;  %v7665_v5 = vadd.f32 %v7633_v23, %v10421_v7  ;;  %v7720_v0 = vmul.f32 %v7688_v50, %v8796_v47  ;;  %v7719_v34 = vmul.f32 %v7687_v26, %v8782_v38 }
 0x518   : > { %v7696_v53 = vmax.f32 %v7664_v51, 0.0  ;;  %v7695_v29 = vmax.f32 %v7663_v2, 0.0  ;;  %7750 = vst [vmem:[%s10257_s27 + $0xa0] sm:$0xff] %v7718_v63  ;;  %v7721_v17 = vmul.f32 %v7689_v37, %v8776_v35 }
 0x519   : > { %v7726_v4 = vmul.f32 %v7694_v3, %v8785_v40  ;;  %v7697_v39 = vmax.f32 %v7665_v5, 0.0  ;;  %7752 = vst [vmem:[%s10257_s27 + $0xb0] sm:$0xff] %v7720_v0  ;;  %7751 = vst [vmem:[%s10257_s27 + $0xa8] sm:$0xff] %v7719_v34 }
 0x51a   : > { %v7728_v54 = vmul.f32 %v7696_v53, %v8796_v47  ;;  %v7727_v27 = vmul.f32 %v7695_v29, %v8782_v38  ;;  %7753 = vst [vmem:[%s10257_s27 + $0xb8] sm:$0xff] %v7721_v17 }
 0x51b   : > { %7758 = vst [vmem:[%s10257_s27 + $0xe0] sm:$0xff] %v7726_v4  ;;  %v7729_v12 = vmul.f32 %v7697_v39, %v8776_v35 }
 0x51c   : > { %7760 = vst [vmem:[%s10257_s27 + $0xf0] sm:$0xff] %v7728_v54  ;;  %7759 = vst [vmem:[%s10257_s27 + $0xe8] sm:$0xff] %v7727_v27 }
 0x51d   : > { %7761 = vst [vmem:[%s10257_s27 + $0xf8] sm:$0xff] %v7729_v12 }
 0x51e PF: > { %s24_s29 = sadd.s32 1, %s8563_s29  }
 0x51f   : > { %p21_p4 = scmp.ge.s32.totalorder %s24_s29, 4  }
 0x521   :  { %23 = sbr.rel (!%p21_p4) target bundleno = 1 (0x1), region = 132 }

</bundles_post_ra>
